<compile_context>
chip_gen: v6e
topology: v6e:2x2x1
jax: 0.10.0
libtpu: 0.0.40
codegen_flags: <defaults>
</compile_context>

<pallas_src>
import functools

import jax
import jax.numpy as jnp
from jax.experimental import pallas as pl
from jax.experimental.pallas import tpu as pltpu

EPS = 1e-5            # InstanceNorm2d default eps
LRELU_SLOPE = 0.01    # PyTorch LeakyReLU default negative_slope
K = 3                 # kernel_size
CHUNK_M = 1024        # target pixels (matmul M rows) per in-kernel chunk


def _vmem_limit_bytes():
    # v5e/v6e: 128 MiB physical VMEM -> allow 64 MiB scoped.
    # v7x:      64 MiB physical       -> keep the 32 MiB default.
    try:
        cap = int(pltpu.get_tpu_info().vmem_capacity_bytes)
        if cap >= 100 * 1024 * 1024:
            return 64 * 1024 * 1024
    except Exception:
        pass
    return 32 * 1024 * 1024


_VMEM_LIMIT = _vmem_limit_bytes()


# --------------------------------------------------------------------------
# In-kernel helpers
# --------------------------------------------------------------------------
def _conv_in_chunked(read_rows, w_ref, acc_ref, ho, wo, kh, kw, chunk_h):
    """Chunked shifted-slice conv; pre-norm f32 rows are written to acc_ref.

    read_rows(r, nrows) -> bf16 value (nrows, wo + kw - 1, ci) holding padded
    input rows r .. r+nrows-1 (full padded width).  Returns the per-channel
    (sum, sum-of-squares) over all ho*wo output pixels for InstanceNorm.
    """
    co = acc_ref.shape[-1]
    s = jnp.zeros((1, co), jnp.float32)
    sq = jnp.zeros((1, co), jnp.float32)
    r0 = 0
    while r0 < ho:
        ch = min(chunk_h, ho - r0)
        acc = jnp.zeros((ch * wo, co), jnp.float32)
        for ki in range(kh):
            rows = read_rows(r0 + ki, ch)                 # (ch, wo+kw-1, ci) bf16
            for kj in range(kw):
                sl = rows[:, kj:kj + wo, :].reshape(ch * wo, -1)
                acc = acc + jnp.dot(sl, w_ref[ki * kw + kj],
                                    preferred_element_type=jnp.float32)
        acc_ref[r0 * wo:(r0 + ch) * wo, :] = acc
        s = s + jnp.sum(acc, axis=0, keepdims=True)
        sq = sq + jnp.sum(acc * acc, axis=0, keepdims=True)
        r0 += ch
    return s, sq


def _in_stats(s, sq, n_pix):
    """InstanceNorm2d(affine=False) statistics from sum / sum-of-squares."""
    inv_n = 1.0 / float(n_pix)
    mean = s * inv_n
    var = jnp.maximum(sq * inv_n - mean * mean, 0.0)
    return mean, jax.lax.rsqrt(var + EPS)


# --------------------------------------------------------------------------
# Pallas kernels
# --------------------------------------------------------------------------
def _down_kernel(xs_ref, w_ref, o_ref, acc_ref, *, ho, wo, chunk_h):
    """Stride-2 3x3 conv (space-to-depth: 2x2 taps over 4*cin) + InstanceNorm.

    xs_ref : (1, ho+1, wo+1, 4*cin) bf16 (one zero cell of padding top/left)
    w_ref  : (4, 4*cin, cout) bf16
    o_ref  : (1, ho*wo, cout) bf16
    acc_ref: (ho*wo, cout) f32 VMEM scratch (pre-norm conv output)
    """
    def read_rows(r, nrows):
        return xs_ref[0, r:r + nrows, :, :]

    s, sq = _conv_in_chunked(read_rows, w_ref, acc_ref, ho, wo, 2, 2, chunk_h)
    mean, inv_std = _in_stats(s, sq, ho * wo)

    r0 = 0
    while r0 < ho:
        ch = min(chunk_h, ho - r0)
        a = acc_ref[r0 * wo:(r0 + ch) * wo, :]
        o_ref[0, r0 * wo:(r0 + ch) * wo, :] = ((a - mean) * inv_std).astype(o_ref.dtype)
        r0 += ch


def _resnet_kernel(x_ref, w1_ref, w2_ref, o_ref, xpad_ref, hpad_ref, acc_ref,
                   *, h, w, chunk_h):
    """Fused ResnetBlock: x + IN(conv2(LeakyReLU(IN(conv1(x))))).

    x_ref   : (1, h, w, c) bf16 (unpadded input block)
    w*_ref  : (9, c, c) bf16 tap-major weights
    o_ref   : (1, h*w, c) bf16
    xpad_ref: (h+2, w+2, c) bf16 VMEM scratch (zero-bordered input)
    hpad_ref: (h+2, w+2, c) bf16 VMEM scratch (zero-bordered intermediate)
    acc_ref : (h*w, c) f32 VMEM scratch (pre-norm conv accumulator, reused)
    """
    c = x_ref.shape[-1]
    p = h * w

    # Zero only the 1-pixel halo border (cheap) and do it every step: scratch
    # persists across grid iterations, but a program_id==0 guard would be
    # skipped on the second core when the "parallel" batch axis is split.
    zrow = jnp.zeros((1, w + 2, c), xpad_ref.dtype)
    zcol = jnp.zeros((h + 2, 1, c), xpad_ref.dtype)
    for ref in (xpad_ref, hpad_ref):
        ref[0:1, :, :] = zrow
        ref[h + 1:h + 2, :, :] = zrow
        ref[:, 0:1, :] = zcol
        ref[:, w + 1:w + 2, :] = zcol

    # Stage the unpadded input into the zero-bordered halo scratch (in VMEM;
    # the wrapper-side jnp.pad HBM pass is gone).
    xpad_ref[1:h + 1, 1:w + 1, :] = x_ref[0]

    # ---- conv1 -> IN -> LeakyReLU (intermediate never leaves VMEM) ---------
    s, sq = _conv_in_chunked(lambda r, nr: xpad_ref[r:r + nr, :, :],
                             w1_ref, acc_ref, h, w, 3, 3, chunk_h)
    mean, inv_std = _in_stats(s, sq, p)
    r0 = 0
    while r0 < h:
        ch = min(chunk_h, h - r0)
        a = (acc_ref[r0 * w:(r0 + ch) * w, :] - mean) * inv_std
        a = jnp.where(a >= 0, a, LRELU_SLOPE * a)
        hpad_ref[1 + r0:1 + r0 + ch, 1:w + 1, :] = (
            a.reshape(ch, w, c).astype(hpad_ref.dtype))
        r0 += ch

    # ---- conv2 -> IN -> residual add ----------------------------------------
    s2, sq2 = _conv_in_chunked(lambda r, nr: hpad_ref[r:r + nr, :, :],
                               w2_ref, acc_ref, h, w, 3, 3, chunk_h)
    mean2, inv_std2 = _in_stats(s2, sq2, p)
    r0 = 0
    while r0 < h:
        ch = min(chunk_h, h - r0)
        y = (acc_ref[r0 * w:(r0 + ch) * w, :] - mean2) * inv_std2
        res = x_ref[0, r0:r0 + ch, :, :].reshape(ch * w, c).astype(jnp.float32)
        o_ref[0, r0 * w:(r0 + ch) * w, :] = (res + y).astype(o_ref.dtype)
        r0 += ch


# --------------------------------------------------------------------------
# Weight re-layout (plain JAX, once per call; weights are tiny)
# --------------------------------------------------------------------------
def _weight_taps(w_oihw):
    """PyTorch (Cout, Cin, 3, 3) -> (9, Cin, Cout) bf16 tap-major matrices."""
    cout, cin, kh, kw = w_oihw.shape
    w = jnp.transpose(w_oihw, (2, 3, 1, 0)).reshape(kh * kw, cin, cout)
    return w.astype(jnp.bfloat16)


def _weight_s2d(w_oihw):
    """Stride-2 pad-1 3x3 conv -> space-to-depth tap matrices (4, 4*Cin, Cout).

    Output (i,j), s2d tap (th,tw), sub-position (sh,sw) reads original pixel
    (2i + 2th + sh - 2, 2j + 2tw + sw - 2) which maps to kernel index
    ki = 2*th + sh - 1 (and likewise for kj); (th,sh)=(0,0) falls outside the
    3x3 kernel, so that weight block stays zero.
    """
    cout, cin, _, _ = w_oihw.shape
    kmap = {(0, 1): 0, (1, 0): 1, (1, 1): 2}
    w = jnp.zeros((2, 2, 2, 2, cin, cout), jnp.float32)   # (th, tw, sh, sw, ci, co)
    for th in range(2):
        for tw in range(2):
            for sh in range(2):
                for sw in range(2):
                    ki = kmap.get((th, sh))
                    kj = kmap.get((tw, sw))
                    if ki is None or kj is None:
                        continue
                    blk = jnp.transpose(w_oihw[:, :, ki, kj], (1, 0))
                    w = w.at[th, tw, sh, sw].set(blk)
    return w.reshape(4, 4 * cin, cout).astype(jnp.bfloat16)


# --------------------------------------------------------------------------
# pallas_call wrappers
# --------------------------------------------------------------------------
def _chunk_rows(ho, wo):
    return max(1, min(ho, CHUNK_M // max(wo, 1)))


def down_block(x, w_oihw):
    """ConvBlock(k=3, s=2, p=1, norm='in', act='none') on bf16 NHWC input."""
    n, hh, ww, cin = x.shape
    # TODO(synk): odd spatial sizes (PyTorch gives (H+1)//2) are unsupported.
    assert hh % 2 == 0 and ww % 2 == 0, "stride-2 space-to-depth needs even H, W"
    ho, wo = hh // 2, ww // 2
    cout = w_oihw.shape[0]

    # Fold the stride into channels (space-to-depth) + one zero cell top/left.
    xs = x.reshape(n, ho, 2, wo, 2, cin)
    xs = jnp.transpose(xs, (0, 1, 3, 2, 4, 5)).reshape(n, ho, wo, 4 * cin)
    xs = jnp.pad(xs, ((0, 0), (1, 0), (1, 0), (0, 0)))
    w = _weight_s2d(w_oihw)
    chunk_h = _chunk_rows(ho, wo)

    flops = 2 * n * ho * wo * (4 * cin) * cout
    bytes_acc = int(xs.size * 2 + w.size * 2 + n * ho * wo * cout * 2)

    out = pl.pallas_call(
        functools.partial(_down_kernel, ho=ho, wo=wo, chunk_h=chunk_h),
        out_shape=jax.ShapeDtypeStruct((n, ho * wo, cout), jnp.bfloat16),
        grid=(n,),
        in_specs=[
            pl.BlockSpec((1, ho + 1, wo + 1, 4 * cin), lambda i: (i, 0, 0, 0)),
            pl.BlockSpec((4, 4 * cin, cout), lambda i: (0, 0, 0)),
        ],
        out_specs=pl.BlockSpec((1, ho * wo, cout), lambda i: (i, 0, 0)),
        scratch_shapes=[pltpu.VMEM((ho * wo, cout), jnp.float32)],
        compiler_params=pltpu.CompilerParams(
            dimension_semantics=("parallel",),
            vmem_limit_bytes=_VMEM_LIMIT),
        cost_estimate=pl.CostEstimate(flops=flops, transcendentals=0,
                                      bytes_accessed=bytes_acc),
    )(xs, w)
    return out.reshape(n, ho, wo, cout)


def resnet_block(x, w1_oihw, w2_oihw):
    """Fused ResnetBlock on bf16 NHWC: x + IN(conv2(lrelu(IN(conv1(x)))))."""
    n, hh, ww, c = x.shape
    w1 = _weight_taps(w1_oihw)
    w2 = _weight_taps(w2_oihw)
    chunk_h = _chunk_rows(hh, ww)

    flops = 2 * 2 * n * hh * ww * c * c * 9
    bytes_acc = int(x.size * 2 + (w1.size + w2.size) * 2 + n * hh * ww * c * 2)

    out = pl.pallas_call(
        functools.partial(_resnet_kernel, h=hh, w=ww, chunk_h=chunk_h),
        out_shape=jax.ShapeDtypeStruct((n, hh * ww, c), jnp.bfloat16),
        grid=(n,),
        in_specs=[
            pl.BlockSpec((1, hh, ww, c), lambda i: (i, 0, 0, 0)),
            pl.BlockSpec((9, c, c), lambda i: (0, 0, 0)),
            pl.BlockSpec((9, c, c), lambda i: (0, 0, 0)),
        ],
        out_specs=pl.BlockSpec((1, hh * ww, c), lambda i: (i, 0, 0)),
        scratch_shapes=[
            pltpu.VMEM((hh + 2, ww + 2, c), jnp.bfloat16),   # zero-bordered input
            pltpu.VMEM((hh + 2, ww + 2, c), jnp.bfloat16),   # zero-bordered hidden
            pltpu.VMEM((hh * ww, c), jnp.float32),           # pre-norm accumulator
        ],
        compiler_params=pltpu.CompilerParams(
            dimension_semantics=("parallel",),
            vmem_limit_bytes=_VMEM_LIMIT),
        cost_estimate=pl.CostEstimate(flops=flops, transcendentals=0,
                                      bytes_accessed=bytes_acc),
    )(x, w1, w2)
    return out.reshape(n, hh, ww, c)


# --------------------------------------------------------------------------
# Parameter construction (deterministic, mirrors UnetEncoder2.__init__)
# --------------------------------------------------------------------------
def init_params(key, n_layers, in_cha, min_cha, max_cha):
    # Biases are generated for structural parity with the PyTorch module but
    # NOT applied in the kernels: InstanceNorm2d(affine=False) right after
    # each conv cancels them exactly (mean subtraction).
    def conv_params(k, cin, cout):
        kw, kb = jax.random.split(k)
        w = jax.random.normal(kw, (cout, cin, K, K), jnp.float32) * 0.1
        b = jax.random.normal(kb, (cout,), jnp.float32) * 0.1
        return {"w": w, "b": b}

    keys = jax.random.split(key, 1 + 3 * (n_layers - 1))
    params = {"down1": conv_params(keys[0], in_cha, min_cha), "layers": []}
    cha = min_cha
    ki = 1
    for _ in range(n_layers - 1):
        mid = min(2 * cha, max_cha)
        params["layers"].append({
            "down": conv_params(keys[ki], cha, mid),
            "res1": conv_params(keys[ki + 1], mid, mid),
            "res2": conv_params(keys[ki + 2], mid, mid),
        })
        ki += 3
        cha = mid
    return params


# --------------------------------------------------------------------------
# Forward pass (returns list of caches, each NCHW f32 like the PyTorch module)
# --------------------------------------------------------------------------
def unet_encoder2_forward(x_nchw, params):
    assert x_nchw.ndim == 4
    # NCHW -> NHWC; activations carried in bf16 between kernels (all norm /
    # activation / residual math is f32 inside the kernels).
    x = jnp.transpose(x_nchw, (0, 2, 3, 1)).astype(jnp.bfloat16)
    caches = []

    # down1: ConvBlock(in_cha, min_cha, 3, 2, 1, norm='in', act='none')
    x = down_block(x, params["down1"]["w"])
    caches.append(x)

    for layer in params["layers"]:
        x = down_block(x, layer["down"]["w"])
        x = resnet_block(x, layer["res1"]["w"], layer["res2"]["w"])
        caches.append(x)

    # back to the PyTorch NCHW / f32 convention
    return [jnp.transpose(c, (0, 3, 1, 2)).astype(jnp.float32) for c in caches]


# --------------------------------------------------------------------------
if __name__ == "__main__":
    # small, self-consistent config: n_layers=2, in_cha=4, min_cha=8, max_cha=16
    N_LAYERS, IN_CHA, MIN_CHA, MAX_CHA = 2, 4, 8, 16
    B, H, W = 2, 16, 16

    key = jax.random.PRNGKey(0)
    kx, kp = jax.random.split(key)
    x = jax.random.normal(kx, (B, IN_CHA, H, W), jnp.float32)
    params = init_params(kp, N_LAYERS, IN_CHA, MIN_CHA, MAX_CHA)

    caches = jax.jit(unet_encoder2_forward)(x, params)
    caches = [jax.block_until_ready(c) for c in caches]

    # sanity: cache shapes follow the stride-2 ladder
    assert caches[0].shape == (B, MIN_CHA, H // 2, W // 2)
    assert caches[1].shape == (B, min(2 * MIN_CHA, MAX_CHA), H // 4, W // 4)
    assert all(bool(jnp.all(jnp.isfinite(c))) for c in caches)

    print("KERNEL_OK")
</pallas_src>

<mosaic_0001>
module attributes {stable_mosaic.version = 11 : i64} {
  func.func @_down_kernel(%arg0: i32, %arg1: memref<1x9x9x16xbf16, #tpu.memory_space<vmem>>, %arg2: memref<4x16x8xbf16, #tpu.memory_space<vmem>>, %arg3: memref<1x64x8xbf16, #tpu.memory_space<vmem>>, %arg4: memref<64x8xf32, #tpu.memory_space<vmem>>) attributes {dimension_semantics = [#tpu.dimension_semantics<parallel>], iteration_bounds = array<i64: 2>, scalar_prefetch = 0 : i64, scratch_operands = 1 : i64, tpu.core_type = #tpu.core_type<tc>, window_params = [{transform_indices = @transform_0, window_bounds = array<i64: 1, 9, 9, 16>}, {pipeline_mode = #tpu.pipeline_mode<synchronous>, transform_indices = @transform_1, window_bounds = array<i64: 4, 16, 8>}, {transform_indices = @transform_2, window_bounds = array<i64: 1, 64, 8>}]} {
    %cst = arith.constant 0.000000e+00 : f32
    %0 = vector.broadcast %cst : f32 to vector<1x8xf32>
    %cst_0 = arith.constant 0.000000e+00 : f32
    %1 = vector.broadcast %cst_0 : f32 to vector<1x8xf32>
    %cst_1 = arith.constant 0.000000e+00 : f32
    %2 = vector.broadcast %cst_1 : f32 to vector<64x8xf32>
    %c0 = arith.constant 0 : index
    %c0_2 = arith.constant 0 : index
    %c0_3 = arith.constant 0 : index
    %c0_4 = arith.constant 0 : index
    %3 = vector.load %arg1[%c0, %c0_2, %c0_3, %c0_4] : memref<1x9x9x16xbf16, #tpu.memory_space<vmem>>, vector<1x8x9x16xbf16>
    %4 = vector.shape_cast %3 : vector<1x8x9x16xbf16> to vector<8x9x16xbf16>
    %5 = vector.extract_strided_slice %4 {offsets = [0, 0, 0], sizes = [8, 8, 16], strides = [1, 1, 1]} : vector<8x9x16xbf16> to vector<8x8x16xbf16>
    %6 = vector.shape_cast %5 : vector<8x8x16xbf16> to vector<64x16xbf16>
    %c0_5 = arith.constant 0 : index
    %c0_6 = arith.constant 0 : index
    %c0_7 = arith.constant 0 : index
    %7 = vector.load %arg2[%c0_5, %c0_6, %c0_7] : memref<4x16x8xbf16, #tpu.memory_space<vmem>>, vector<1x16x8xbf16>
    %8 = vector.shape_cast %7 : vector<1x16x8xbf16> to vector<16x8xbf16>
    %cst_8 = arith.constant dense<0.000000e+00> : vector<64x8xf32>
    %9 = tpu.matmul %6, %8, %cst_8 {dimension_numbers = #tpu.dot_dimension_numbers<[1], [0], [0], [1], [0, 0, 1, 1], [], []>} : vector<64x16xbf16>, vector<16x8xbf16>, vector<64x8xf32> -> vector<64x8xf32>
    %10 = arith.addf %2, %9 : vector<64x8xf32>
    %11 = vector.extract_strided_slice %4 {offsets = [0, 1, 0], sizes = [8, 8, 16], strides = [1, 1, 1]} : vector<8x9x16xbf16> to vector<8x8x16xbf16>
    %12 = vector.shape_cast %11 : vector<8x8x16xbf16> to vector<64x16xbf16>
    %c1 = arith.constant 1 : index
    %c0_9 = arith.constant 0 : index
    %c0_10 = arith.constant 0 : index
    %13 = vector.load %arg2[%c1, %c0_9, %c0_10] : memref<4x16x8xbf16, #tpu.memory_space<vmem>>, vector<1x16x8xbf16>
    %14 = vector.shape_cast %13 : vector<1x16x8xbf16> to vector<16x8xbf16>
    %cst_11 = arith.constant dense<0.000000e+00> : vector<64x8xf32>
    %15 = tpu.matmul %12, %14, %cst_11 {dimension_numbers = #tpu.dot_dimension_numbers<[1], [0], [0], [1], [0, 0, 1, 1], [], []>} : vector<64x16xbf16>, vector<16x8xbf16>, vector<64x8xf32> -> vector<64x8xf32>
    %16 = arith.addf %10, %15 : vector<64x8xf32>
    %c0_12 = arith.constant 0 : index
    %c1_13 = arith.constant 1 : index
    %c0_14 = arith.constant 0 : index
    %c0_15 = arith.constant 0 : index
    %17 = vector.load %arg1[%c0_12, %c1_13, %c0_14, %c0_15] : memref<1x9x9x16xbf16, #tpu.memory_space<vmem>>, vector<1x8x9x16xbf16>
    %18 = vector.shape_cast %17 : vector<1x8x9x16xbf16> to vector<8x9x16xbf16>
    %19 = vector.extract_strided_slice %18 {offsets = [0, 0, 0], sizes = [8, 8, 16], strides = [1, 1, 1]} : vector<8x9x16xbf16> to vector<8x8x16xbf16>
    %20 = vector.shape_cast %19 : vector<8x8x16xbf16> to vector<64x16xbf16>
    %c2 = arith.constant 2 : index
    %c0_16 = arith.constant 0 : index
    %c0_17 = arith.constant 0 : index
    %21 = vector.load %arg2[%c2, %c0_16, %c0_17] : memref<4x16x8xbf16, #tpu.memory_space<vmem>>, vector<1x16x8xbf16>
    %22 = vector.shape_cast %21 : vector<1x16x8xbf16> to vector<16x8xbf16>
    %cst_18 = arith.constant dense<0.000000e+00> : vector<64x8xf32>
    %23 = tpu.matmul %20, %22, %cst_18 {dimension_numbers = #tpu.dot_dimension_numbers<[1], [0], [0], [1], [0, 0, 1, 1], [], []>} : vector<64x16xbf16>, vector<16x8xbf16>, vector<64x8xf32> -> vector<64x8xf32>
    %24 = arith.addf %16, %23 : vector<64x8xf32>
    %25 = vector.extract_strided_slice %18 {offsets = [0, 1, 0], sizes = [8, 8, 16], strides = [1, 1, 1]} : vector<8x9x16xbf16> to vector<8x8x16xbf16>
    %26 = vector.shape_cast %25 : vector<8x8x16xbf16> to vector<64x16xbf16>
    %c3 = arith.constant 3 : index
    %c0_19 = arith.constant 0 : index
    %c0_20 = arith.constant 0 : index
    %27 = vector.load %arg2[%c3, %c0_19, %c0_20] : memref<4x16x8xbf16, #tpu.memory_space<vmem>>, vector<1x16x8xbf16>
    %28 = vector.shape_cast %27 : vector<1x16x8xbf16> to vector<16x8xbf16>
    %cst_21 = arith.constant dense<0.000000e+00> : vector<64x8xf32>
    %29 = tpu.matmul %26, %28, %cst_21 {dimension_numbers = #tpu.dot_dimension_numbers<[1], [0], [0], [1], [0, 0, 1, 1], [], []>} : vector<64x16xbf16>, vector<16x8xbf16>, vector<64x8xf32> -> vector<64x8xf32>
    %30 = arith.addf %24, %29 : vector<64x8xf32>
    %c0_22 = arith.constant 0 : index
    %c0_23 = arith.constant 0 : index
    %31 = vector.load %arg4[%c0_22, %c0_23] : memref<64x8xf32, #tpu.memory_space<vmem>>, vector<64x8xf32>
    tpu.vector_store %arg4[%c0_22, %c0_23], %30 {strides = array<i32>} : memref<64x8xf32, #tpu.memory_space<vmem>>, vector<64x8xf32>,
    %cst_24 = arith.constant dense<0.000000e+00> : vector<8xf32>
    %32 = vector.multi_reduction <add>, %30, %cst_24 [0] : vector<64x8xf32> to vector<8xf32>
    %33 = vector.shape_cast %32 : vector<8xf32> to vector<1x8xf32>
    %34 = arith.addf %0, %33 : vector<1x8xf32>
    %35 = arith.mulf %30, %30 : vector<64x8xf32>
    %cst_25 = arith.constant dense<0.000000e+00> : vector<8xf32>
    %36 = vector.multi_reduction <add>, %35, %cst_25 [0] : vector<64x8xf32> to vector<8xf32>
    %37 = vector.shape_cast %36 : vector<8xf32> to vector<1x8xf32>
    %38 = arith.addf %1, %37 : vector<1x8xf32>
    %cst_26 = arith.constant 1.562500e-02 : f32
    %39 = vector.broadcast %cst_26 : f32 to vector<1x8xf32>
    %40 = arith.mulf %34, %39 : vector<1x8xf32>
    %cst_27 = arith.constant 1.562500e-02 : f32
    %41 = vector.broadcast %cst_27 : f32 to vector<1x8xf32>
    %42 = arith.mulf %38, %41 : vector<1x8xf32>
    %43 = arith.mulf %40, %40 : vector<1x8xf32>
    %44 = arith.subf %42, %43 : vector<1x8xf32>
    %cst_28 = arith.constant 0.000000e+00 : f32
    %45 = vector.broadcast %cst_28 : f32 to vector<1x8xf32>
    %46 = arith.maximumf %44, %45 : vector<1x8xf32>
    %cst_29 = arith.constant 9.99999974E-6 : f32
    %47 = vector.broadcast %cst_29 : f32 to vector<1x8xf32>
    %48 = arith.addf %46, %47 : vector<1x8xf32>
    %49 = math.rsqrt %48 : vector<1x8xf32>
    %c0_30 = arith.constant 0 : index
    %c0_31 = arith.constant 0 : index
    %50 = vector.load %arg4[%c0_30, %c0_31] : memref<64x8xf32, #tpu.memory_space<vmem>>, vector<64x8xf32>
    %51 = vector.broadcast %40 : vector<1x8xf32> to vector<64x8xf32>
    %52 = arith.subf %50, %51 : vector<64x8xf32>
    %53 = vector.broadcast %49 : vector<1x8xf32> to vector<64x8xf32>
    %54 = arith.mulf %52, %53 : vector<64x8xf32>
    %55 = arith.truncf %54 : vector<64x8xf32> to vector<64x8xbf16>
    %c0_32 = arith.constant 0 : index
    %c0_33 = arith.constant 0 : index
    %c0_34 = arith.constant 0 : index
    %56 = vector.load %arg3[%c0_32, %c0_33, %c0_34] : memref<1x64x8xbf16, #tpu.memory_space<vmem>>, vector<1x64x8xbf16>
    %57 = vector.shape_cast %56 : vector<1x64x8xbf16> to vector<64x8xbf16>
    %58 = vector.shape_cast %55 : vector<64x8xbf16> to vector<1x64x8xbf16>
    tpu.vector_store %arg3[%c0_32, %c0_33, %c0_34], %58 {strides = array<i32>} : memref<1x64x8xbf16, #tpu.memory_space<vmem>>, vector<1x64x8xbf16>,
    return
  }
  func.func @transform_0(%arg0: i32) -> (i32, i32, i32, i32) {
    %c0_i32 = arith.constant 0 : i32
    %c0_i32_0 = arith.constant 0 : i32
    %c0_i32_1 = arith.constant 0 : i32
    %c0_i32_2 = arith.constant 0 : i32
    return %arg0, %c0_i32, %c0_i32_0, %c0_i32_1 : i32, i32, i32, i32
  }
  func.func @transform_1(%arg0: i32) -> (i32, i32, i32) {
    %c0_i32 = arith.constant 0 : i32
    %c0_i32_0 = arith.constant 0 : i32
    %c0_i32_1 = arith.constant 0 : i32
    %c0_i32_2 = arith.constant 0 : i32
    return %c0_i32, %c0_i32_0, %c0_i32_1 : i32, i32, i32
  }
  func.func @transform_2(%arg0: i32) -> (i32, i32, i32) {
    %c0_i32 = arith.constant 0 : i32
    %c0_i32_0 = arith.constant 0 : i32
    %c0_i32_1 = arith.constant 0 : i32
    return %arg0, %c0_i32, %c0_i32_0 : i32, i32, i32
  }
}

module attributes {stable_mosaic.version = 11 : i64} {
  func.func @_down_kernel(%arg0: i32, %arg1: memref<1x5x5x32xbf16, #tpu.memory_space<vmem>>, %arg2: memref<4x32x16xbf16, #tpu.memory_space<vmem>>, %arg3: memref<1x16x16xbf16, #tpu.memory_space<vmem>>, %arg4: memref<16x16xf32, #tpu.memory_space<vmem>>) attributes {dimension_semantics = [#tpu.dimension_semantics<parallel>], iteration_bounds = array<i64: 2>, scalar_prefetch = 0 : i64, scratch_operands = 1 : i64, tpu.core_type = #tpu.core_type<tc>, window_params = [{transform_indices = @transform_0, window_bounds = array<i64: 1, 5, 5, 32>}, {pipeline_mode = #tpu.pipeline_mode<synchronous>, transform_indices = @transform_1, window_bounds = array<i64: 4, 32, 16>}, {transform_indices = @transform_2, window_bounds = array<i64: 1, 16, 16>}]} {
    %cst = arith.constant 0.000000e+00 : f32
    %0 = vector.broadcast %cst : f32 to vector<1x16xf32>
    %cst_0 = arith.constant 0.000000e+00 : f32
    %1 = vector.broadcast %cst_0 : f32 to vector<1x16xf32>
    %cst_1 = arith.constant 0.000000e+00 : f32
    %2 = vector.broadcast %cst_1 : f32 to vector<16x16xf32>
    %c0 = arith.constant 0 : index
    %c0_2 = arith.constant 0 : index
    %c0_3 = arith.constant 0 : index
    %c0_4 = arith.constant 0 : index
    %3 = vector.load %arg1[%c0, %c0_2, %c0_3, %c0_4] : memref<1x5x5x32xbf16, #tpu.memory_space<vmem>>, vector<1x4x5x32xbf16>
    %4 = vector.shape_cast %3 : vector<1x4x5x32xbf16> to vector<4x5x32xbf16>
    %5 = vector.extract_strided_slice %4 {offsets = [0, 0, 0], sizes = [4, 4, 32], strides = [1, 1, 1]} : vector<4x5x32xbf16> to vector<4x4x32xbf16>
    %6 = vector.shape_cast %5 : vector<4x4x32xbf16> to vector<16x32xbf16>
    %c0_5 = arith.constant 0 : index
    %c0_6 = arith.constant 0 : index
    %c0_7 = arith.constant 0 : index
    %7 = vector.load %arg2[%c0_5, %c0_6, %c0_7] : memref<4x32x16xbf16, #tpu.memory_space<vmem>>, vector<1x32x16xbf16>
    %8 = vector.shape_cast %7 : vector<1x32x16xbf16> to vector<32x16xbf16>
    %cst_8 = arith.constant dense<0.000000e+00> : vector<16x16xf32>
    %9 = tpu.matmul %6, %8, %cst_8 {dimension_numbers = #tpu.dot_dimension_numbers<[1], [0], [0], [1], [0, 0, 1, 1], [], []>} : vector<16x32xbf16>, vector<32x16xbf16>, vector<16x16xf32> -> vector<16x16xf32>
    %10 = arith.addf %2, %9 : vector<16x16xf32>
    %11 = vector.extract_strided_slice %4 {offsets = [0, 1, 0], sizes = [4, 4, 32], strides = [1, 1, 1]} : vector<4x5x32xbf16> to vector<4x4x32xbf16>
    %12 = vector.shape_cast %11 : vector<4x4x32xbf16> to vector<16x32xbf16>
    %c1 = arith.constant 1 : index
    %c0_9 = arith.constant 0 : index
    %c0_10 = arith.constant 0 : index
    %13 = vector.load %arg2[%c1, %c0_9, %c0_10] : memref<4x32x16xbf16, #tpu.memory_space<vmem>>, vector<1x32x16xbf16>
    %14 = vector.shape_cast %13 : vector<1x32x16xbf16> to vector<32x16xbf16>
    %cst_11 = arith.constant dense<0.000000e+00> : vector<16x16xf32>
    %15 = tpu.matmul %12, %14, %cst_11 {dimension_numbers = #tpu.dot_dimension_numbers<[1], [0], [0], [1], [0, 0, 1, 1], [], []>} : vector<16x32xbf16>, vector<32x16xbf16>, vector<16x16xf32> -> vector<16x16xf32>
    %16 = arith.addf %10, %15 : vector<16x16xf32>
    %c0_12 = arith.constant 0 : index
    %c1_13 = arith.constant 1 : index
    %c0_14 = arith.constant 0 : index
    %c0_15 = arith.constant 0 : index
    %17 = vector.load %arg1[%c0_12, %c1_13, %c0_14, %c0_15] : memref<1x5x5x32xbf16, #tpu.memory_space<vmem>>, vector<1x4x5x32xbf16>
    %18 = vector.shape_cast %17 : vector<1x4x5x32xbf16> to vector<4x5x32xbf16>
    %19 = vector.extract_strided_slice %18 {offsets = [0, 0, 0], sizes = [4, 4, 32], strides = [1, 1, 1]} : vector<4x5x32xbf16> to vector<4x4x32xbf16>
    %20 = vector.shape_cast %19 : vector<4x4x32xbf16> to vector<16x32xbf16>
    %c2 = arith.constant 2 : index
    %c0_16 = arith.constant 0 : index
    %c0_17 = arith.constant 0 : index
    %21 = vector.load %arg2[%c2, %c0_16, %c0_17] : memref<4x32x16xbf16, #tpu.memory_space<vmem>>, vector<1x32x16xbf16>
    %22 = vector.shape_cast %21 : vector<1x32x16xbf16> to vector<32x16xbf16>
    %cst_18 = arith.constant dense<0.000000e+00> : vector<16x16xf32>
    %23 = tpu.matmul %20, %22, %cst_18 {dimension_numbers = #tpu.dot_dimension_numbers<[1], [0], [0], [1], [0, 0, 1, 1], [], []>} : vector<16x32xbf16>, vector<32x16xbf16>, vector<16x16xf32> -> vector<16x16xf32>
    %24 = arith.addf %16, %23 : vector<16x16xf32>
    %25 = vector.extract_strided_slice %18 {offsets = [0, 1, 0], sizes = [4, 4, 32], strides = [1, 1, 1]} : vector<4x5x32xbf16> to vector<4x4x32xbf16>
    %26 = vector.shape_cast %25 : vector<4x4x32xbf16> to vector<16x32xbf16>
    %c3 = arith.constant 3 : index
    %c0_19 = arith.constant 0 : index
    %c0_20 = arith.constant 0 : index
    %27 = vector.load %arg2[%c3, %c0_19, %c0_20] : memref<4x32x16xbf16, #tpu.memory_space<vmem>>, vector<1x32x16xbf16>
    %28 = vector.shape_cast %27 : vector<1x32x16xbf16> to vector<32x16xbf16>
    %cst_21 = arith.constant dense<0.000000e+00> : vector<16x16xf32>
    %29 = tpu.matmul %26, %28, %cst_21 {dimension_numbers = #tpu.dot_dimension_numbers<[1], [0], [0], [1], [0, 0, 1, 1], [], []>} : vector<16x32xbf16>, vector<32x16xbf16>, vector<16x16xf32> -> vector<16x16xf32>
    %30 = arith.addf %24, %29 : vector<16x16xf32>
    %c0_22 = arith.constant 0 : index
    %c0_23 = arith.constant 0 : index
    %31 = vector.load %arg4[%c0_22, %c0_23] : memref<16x16xf32, #tpu.memory_space<vmem>>, vector<16x16xf32>
    tpu.vector_store %arg4[%c0_22, %c0_23], %30 {strides = array<i32>} : memref<16x16xf32, #tpu.memory_space<vmem>>, vector<16x16xf32>,
    %cst_24 = arith.constant dense<0.000000e+00> : vector<16xf32>
    %32 = vector.multi_reduction <add>, %30, %cst_24 [0] : vector<16x16xf32> to vector<16xf32>
    %33 = vector.shape_cast %32 : vector<16xf32> to vector<1x16xf32>
    %34 = arith.addf %0, %33 : vector<1x16xf32>
    %35 = arith.mulf %30, %30 : vector<16x16xf32>
    %cst_25 = arith.constant dense<0.000000e+00> : vector<16xf32>
    %36 = vector.multi_reduction <add>, %35, %cst_25 [0] : vector<16x16xf32> to vector<16xf32>
    %37 = vector.shape_cast %36 : vector<16xf32> to vector<1x16xf32>
    %38 = arith.addf %1, %37 : vector<1x16xf32>
    %cst_26 = arith.constant 6.250000e-02 : f32
    %39 = vector.broadcast %cst_26 : f32 to vector<1x16xf32>
    %40 = arith.mulf %34, %39 : vector<1x16xf32>
    %cst_27 = arith.constant 6.250000e-02 : f32
    %41 = vector.broadcast %cst_27 : f32 to vector<1x16xf32>
    %42 = arith.mulf %38, %41 : vector<1x16xf32>
    %43 = arith.mulf %40, %40 : vector<1x16xf32>
    %44 = arith.subf %42, %43 : vector<1x16xf32>
    %cst_28 = arith.constant 0.000000e+00 : f32
    %45 = vector.broadcast %cst_28 : f32 to vector<1x16xf32>
    %46 = arith.maximumf %44, %45 : vector<1x16xf32>
    %cst_29 = arith.constant 9.99999974E-6 : f32
    %47 = vector.broadcast %cst_29 : f32 to vector<1x16xf32>
    %48 = arith.addf %46, %47 : vector<1x16xf32>
    %49 = math.rsqrt %48 : vector<1x16xf32>
    %c0_30 = arith.constant 0 : index
    %c0_31 = arith.constant 0 : index
    %50 = vector.load %arg4[%c0_30, %c0_31] : memref<16x16xf32, #tpu.memory_space<vmem>>, vector<16x16xf32>
    %51 = vector.broadcast %40 : vector<1x16xf32> to vector<16x16xf32>
    %52 = arith.subf %50, %51 : vector<16x16xf32>
    %53 = vector.broadcast %49 : vector<1x16xf32> to vector<16x16xf32>
    %54 = arith.mulf %52, %53 : vector<16x16xf32>
    %55 = arith.truncf %54 : vector<16x16xf32> to vector<16x16xbf16>
    %c0_32 = arith.constant 0 : index
    %c0_33 = arith.constant 0 : index
    %c0_34 = arith.constant 0 : index
    %56 = vector.load %arg3[%c0_32, %c0_33, %c0_34] : memref<1x16x16xbf16, #tpu.memory_space<vmem>>, vector<1x16x16xbf16>
    %57 = vector.shape_cast %56 : vector<1x16x16xbf16> to vector<16x16xbf16>
    %58 = vector.shape_cast %55 : vector<16x16xbf16> to vector<1x16x16xbf16>
    tpu.vector_store %arg3[%c0_32, %c0_33, %c0_34], %58 {strides = array<i32>} : memref<1x16x16xbf16, #tpu.memory_space<vmem>>, vector<1x16x16xbf16>,
    return
  }
  func.func @transform_0(%arg0: i32) -> (i32, i32, i32, i32) {
    %c0_i32 = arith.constant 0 : i32
    %c0_i32_0 = arith.constant 0 : i32
    %c0_i32_1 = arith.constant 0 : i32
    %c0_i32_2 = arith.constant 0 : i32
    return %arg0, %c0_i32, %c0_i32_0, %c0_i32_1 : i32, i32, i32, i32
  }
  func.func @transform_1(%arg0: i32) -> (i32, i32, i32) {
    %c0_i32 = arith.constant 0 : i32
    %c0_i32_0 = arith.constant 0 : i32
    %c0_i32_1 = arith.constant 0 : i32
    %c0_i32_2 = arith.constant 0 : i32
    return %c0_i32, %c0_i32_0, %c0_i32_1 : i32, i32, i32
  }
  func.func @transform_2(%arg0: i32) -> (i32, i32, i32) {
    %c0_i32 = arith.constant 0 : i32
    %c0_i32_0 = arith.constant 0 : i32
    %c0_i32_1 = arith.constant 0 : i32
    return %arg0, %c0_i32, %c0_i32_0 : i32, i32, i32
  }
}

module attributes {stable_mosaic.version = 11 : i64} {
  func.func @_resnet_kernel(%arg0: i32, %arg1: memref<1x4x4x16xbf16, #tpu.memory_space<vmem>>, %arg2: memref<9x16x16xbf16, #tpu.memory_space<vmem>>, %arg3: memref<9x16x16xbf16, #tpu.memory_space<vmem>>, %arg4: memref<1x16x16xbf16, #tpu.memory_space<vmem>>, %arg5: memref<6x6x16xbf16, #tpu.memory_space<vmem>>, %arg6: memref<6x6x16xbf16, #tpu.memory_space<vmem>>, %arg7: memref<16x16xf32, #tpu.memory_space<vmem>>) attributes {dimension_semantics = [#tpu.dimension_semantics<parallel>], iteration_bounds = array<i64: 2>, scalar_prefetch = 0 : i64, scratch_operands = 3 : i64, tpu.core_type = #tpu.core_type<tc>, window_params = [{transform_indices = @transform_0, window_bounds = array<i64: 1, 4, 4, 16>}, {pipeline_mode = #tpu.pipeline_mode<synchronous>, transform_indices = @transform_1, window_bounds = array<i64: 9, 16, 16>}, {pipeline_mode = #tpu.pipeline_mode<synchronous>, transform_indices = @transform_2, window_bounds = array<i64: 9, 16, 16>}, {transform_indices = @transform_3, window_bounds = array<i64: 1, 16, 16>}]} {
    %cst = arith.constant 0.000000e+00 : bf16
    %0 = vector.broadcast %cst : bf16 to vector<1x6x16xbf16>
    %cst_0 = arith.constant 0.000000e+00 : bf16
    %1 = vector.broadcast %cst_0 : bf16 to vector<6x1x16xbf16>
    %c0 = arith.constant 0 : index
    %c0_1 = arith.constant 0 : index
    %c0_2 = arith.constant 0 : index
    %2 = vector.load %arg5[%c0, %c0_1, %c0_2] : memref<6x6x16xbf16, #tpu.memory_space<vmem>>, vector<1x6x16xbf16>
    tpu.vector_store %arg5[%c0, %c0_1, %c0_2], %0 {strides = array<i32>} : memref<6x6x16xbf16, #tpu.memory_space<vmem>>, vector<1x6x16xbf16>,
    %c5 = arith.constant 5 : index
    %c0_3 = arith.constant 0 : index
    %c0_4 = arith.constant 0 : index
    %3 = vector.load %arg5[%c5, %c0_3, %c0_4] : memref<6x6x16xbf16, #tpu.memory_space<vmem>>, vector<1x6x16xbf16>
    tpu.vector_store %arg5[%c5, %c0_3, %c0_4], %0 {strides = array<i32>} : memref<6x6x16xbf16, #tpu.memory_space<vmem>>, vector<1x6x16xbf16>,
    %c0_5 = arith.constant 0 : index
    %c0_6 = arith.constant 0 : index
    %c0_7 = arith.constant 0 : index
    %4 = vector.load %arg5[%c0_5, %c0_6, %c0_7] : memref<6x6x16xbf16, #tpu.memory_space<vmem>>, vector<6x1x16xbf16>
    tpu.vector_store %arg5[%c0_5, %c0_6, %c0_7], %1 {strides = array<i32>} : memref<6x6x16xbf16, #tpu.memory_space<vmem>>, vector<6x1x16xbf16>,
    %c0_8 = arith.constant 0 : index
    %c5_9 = arith.constant 5 : index
    %c0_10 = arith.constant 0 : index
    %5 = vector.load %arg5[%c0_8, %c5_9, %c0_10] : memref<6x6x16xbf16, #tpu.memory_space<vmem>>, vector<6x1x16xbf16>
    tpu.vector_store %arg5[%c0_8, %c5_9, %c0_10], %1 {strides = array<i32>} : memref<6x6x16xbf16, #tpu.memory_space<vmem>>, vector<6x1x16xbf16>,
    %c0_11 = arith.constant 0 : index
    %c0_12 = arith.constant 0 : index
    %c0_13 = arith.constant 0 : index
    %6 = vector.load %arg6[%c0_11, %c0_12, %c0_13] : memref<6x6x16xbf16, #tpu.memory_space<vmem>>, vector<1x6x16xbf16>
    tpu.vector_store %arg6[%c0_11, %c0_12, %c0_13], %0 {strides = array<i32>} : memref<6x6x16xbf16, #tpu.memory_space<vmem>>, vector<1x6x16xbf16>,
    %c5_14 = arith.constant 5 : index
    %c0_15 = arith.constant 0 : index
    %c0_16 = arith.constant 0 : index
    %7 = vector.load %arg6[%c5_14, %c0_15, %c0_16] : memref<6x6x16xbf16, #tpu.memory_space<vmem>>, vector<1x6x16xbf16>
    tpu.vector_store %arg6[%c5_14, %c0_15, %c0_16], %0 {strides = array<i32>} : memref<6x6x16xbf16, #tpu.memory_space<vmem>>, vector<1x6x16xbf16>,
    %c0_17 = arith.constant 0 : index
    %c0_18 = arith.constant 0 : index
    %c0_19 = arith.constant 0 : index
    %8 = vector.load %arg6[%c0_17, %c0_18, %c0_19] : memref<6x6x16xbf16, #tpu.memory_space<vmem>>, vector<6x1x16xbf16>
    tpu.vector_store %arg6[%c0_17, %c0_18, %c0_19], %1 {strides = array<i32>} : memref<6x6x16xbf16, #tpu.memory_space<vmem>>, vector<6x1x16xbf16>,
    %c0_20 = arith.constant 0 : index
    %c5_21 = arith.constant 5 : index
    %c0_22 = arith.constant 0 : index
    %9 = vector.load %arg6[%c0_20, %c5_21, %c0_22] : memref<6x6x16xbf16, #tpu.memory_space<vmem>>, vector<6x1x16xbf16>
    tpu.vector_store %arg6[%c0_20, %c5_21, %c0_22], %1 {strides = array<i32>} : memref<6x6x16xbf16, #tpu.memory_space<vmem>>, vector<6x1x16xbf16>,
    %c0_23 = arith.constant 0 : index
    %c0_24 = arith.constant 0 : index
    %c0_25 = arith.constant 0 : index
    %c0_26 = arith.constant 0 : index
    %10 = vector.load %arg1[%c0_23, %c0_24, %c0_25, %c0_26] : memref<1x4x4x16xbf16, #tpu.memory_space<vmem>>, vector<1x4x4x16xbf16>
    %11 = vector.shape_cast %10 : vector<1x4x4x16xbf16> to vector<4x4x16xbf16>
    %c1 = arith.constant 1 : index
    %c1_27 = arith.constant 1 : index
    %c0_28 = arith.constant 0 : index
    %12 = vector.load %arg5[%c1, %c1_27, %c0_28] : memref<6x6x16xbf16, #tpu.memory_space<vmem>>, vector<4x4x16xbf16>
    tpu.vector_store %arg5[%c1, %c1_27, %c0_28], %11 {strides = array<i32>} : memref<6x6x16xbf16, #tpu.memory_space<vmem>>, vector<4x4x16xbf16>,
    %cst_29 = arith.constant 0.000000e+00 : f32
    %13 = vector.broadcast %cst_29 : f32 to vector<1x16xf32>
    %cst_30 = arith.constant 0.000000e+00 : f32
    %14 = vector.broadcast %cst_30 : f32 to vector<1x16xf32>
    %cst_31 = arith.constant 0.000000e+00 : f32
    %15 = vector.broadcast %cst_31 : f32 to vector<16x16xf32>
    %c0_32 = arith.constant 0 : index
    %c0_33 = arith.constant 0 : index
    %c0_34 = arith.constant 0 : index
    %16 = vector.load %arg5[%c0_32, %c0_33, %c0_34] : memref<6x6x16xbf16, #tpu.memory_space<vmem>>, vector<4x6x16xbf16>
    %17 = vector.extract_strided_slice %16 {offsets = [0, 0, 0], sizes = [4, 4, 16], strides = [1, 1, 1]} : vector<4x6x16xbf16> to vector<4x4x16xbf16>
    %18 = vector.shape_cast %17 : vector<4x4x16xbf16> to vector<16x16xbf16>
    %c0_35 = arith.constant 0 : index
    %c0_36 = arith.constant 0 : index
    %c0_37 = arith.constant 0 : index
    %19 = vector.load %arg2[%c0_35, %c0_36, %c0_37] : memref<9x16x16xbf16, #tpu.memory_space<vmem>>, vector<1x16x16xbf16>
    %20 = vector.shape_cast %19 : vector<1x16x16xbf16> to vector<16x16xbf16>
    %cst_38 = arith.constant dense<0.000000e+00> : vector<16x16xf32>
    %21 = tpu.matmul %18, %20, %cst_38 {dimension_numbers = #tpu.dot_dimension_numbers<[1], [0], [0], [1], [0, 0, 1, 1], [], []>} : vector<16x16xbf16>, vector<16x16xbf16>, vector<16x16xf32> -> vector<16x16xf32>
    %22 = arith.addf %15, %21 : vector<16x16xf32>
    %23 = vector.extract_strided_slice %16 {offsets = [0, 1, 0], sizes = [4, 4, 16], strides = [1, 1, 1]} : vector<4x6x16xbf16> to vector<4x4x16xbf16>
    %24 = vector.shape_cast %23 : vector<4x4x16xbf16> to vector<16x16xbf16>
    %c1_39 = arith.constant 1 : index
    %c0_40 = arith.constant 0 : index
    %c0_41 = arith.constant 0 : index
    %25 = vector.load %arg2[%c1_39, %c0_40, %c0_41] : memref<9x16x16xbf16, #tpu.memory_space<vmem>>, vector<1x16x16xbf16>
    %26 = vector.shape_cast %25 : vector<1x16x16xbf16> to vector<16x16xbf16>
    %cst_42 = arith.constant dense<0.000000e+00> : vector<16x16xf32>
    %27 = tpu.matmul %24, %26, %cst_42 {dimension_numbers = #tpu.dot_dimension_numbers<[1], [0], [0], [1], [0, 0, 1, 1], [], []>} : vector<16x16xbf16>, vector<16x16xbf16>, vector<16x16xf32> -> vector<16x16xf32>
    %28 = arith.addf %22, %27 : vector<16x16xf32>
    %29 = vector.extract_strided_slice %16 {offsets = [0, 2, 0], sizes = [4, 4, 16], strides = [1, 1, 1]} : vector<4x6x16xbf16> to vector<4x4x16xbf16>
    %30 = vector.shape_cast %29 : vector<4x4x16xbf16> to vector<16x16xbf16>
    %c2 = arith.constant 2 : index
    %c0_43 = arith.constant 0 : index
    %c0_44 = arith.constant 0 : index
    %31 = vector.load %arg2[%c2, %c0_43, %c0_44] : memref<9x16x16xbf16, #tpu.memory_space<vmem>>, vector<1x16x16xbf16>
    %32 = vector.shape_cast %31 : vector<1x16x16xbf16> to vector<16x16xbf16>
    %cst_45 = arith.constant dense<0.000000e+00> : vector<16x16xf32>
    %33 = tpu.matmul %30, %32, %cst_45 {dimension_numbers = #tpu.dot_dimension_numbers<[1], [0], [0], [1], [0, 0, 1, 1], [], []>} : vector<16x16xbf16>, vector<16x16xbf16>, vector<16x16xf32> -> vector<16x16xf32>
    %34 = arith.addf %28, %33 : vector<16x16xf32>
    %c1_46 = arith.constant 1 : index
    %c0_47 = arith.constant 0 : index
    %c0_48 = arith.constant 0 : index
    %35 = vector.load %arg5[%c1_46, %c0_47, %c0_48] : memref<6x6x16xbf16, #tpu.memory_space<vmem>>, vector<4x6x16xbf16>
    %36 = vector.extract_strided_slice %35 {offsets = [0, 0, 0], sizes = [4, 4, 16], strides = [1, 1, 1]} : vector<4x6x16xbf16> to vector<4x4x16xbf16>
    %37 = vector.shape_cast %36 : vector<4x4x16xbf16> to vector<16x16xbf16>
    %c3 = arith.constant 3 : index
    %c0_49 = arith.constant 0 : index
    %c0_50 = arith.constant 0 : index
    %38 = vector.load %arg2[%c3, %c0_49, %c0_50] : memref<9x16x16xbf16, #tpu.memory_space<vmem>>, vector<1x16x16xbf16>
    %39 = vector.shape_cast %38 : vector<1x16x16xbf16> to vector<16x16xbf16>
    %cst_51 = arith.constant dense<0.000000e+00> : vector<16x16xf32>
    %40 = tpu.matmul %37, %39, %cst_51 {dimension_numbers = #tpu.dot_dimension_numbers<[1], [0], [0], [1], [0, 0, 1, 1], [], []>} : vector<16x16xbf16>, vector<16x16xbf16>, vector<16x16xf32> -> vector<16x16xf32>
    %41 = arith.addf %34, %40 : vector<16x16xf32>
    %42 = vector.extract_strided_slice %35 {offsets = [0, 1, 0], sizes = [4, 4, 16], strides = [1, 1, 1]} : vector<4x6x16xbf16> to vector<4x4x16xbf16>
    %43 = vector.shape_cast %42 : vector<4x4x16xbf16> to vector<16x16xbf16>
    %c4 = arith.constant 4 : index
    %c0_52 = arith.constant 0 : index
    %c0_53 = arith.constant 0 : index
    %44 = vector.load %arg2[%c4, %c0_52, %c0_53] : memref<9x16x16xbf16, #tpu.memory_space<vmem>>, vector<1x16x16xbf16>
    %45 = vector.shape_cast %44 : vector<1x16x16xbf16> to vector<16x16xbf16>
    %cst_54 = arith.constant dense<0.000000e+00> : vector<16x16xf32>
    %46 = tpu.matmul %43, %45, %cst_54 {dimension_numbers = #tpu.dot_dimension_numbers<[1], [0], [0], [1], [0, 0, 1, 1], [], []>} : vector<16x16xbf16>, vector<16x16xbf16>, vector<16x16xf32> -> vector<16x16xf32>
    %47 = arith.addf %41, %46 : vector<16x16xf32>
    %48 = vector.extract_strided_slice %35 {offsets = [0, 2, 0], sizes = [4, 4, 16], strides = [1, 1, 1]} : vector<4x6x16xbf16> to vector<4x4x16xbf16>
    %49 = vector.shape_cast %48 : vector<4x4x16xbf16> to vector<16x16xbf16>
    %c5_55 = arith.constant 5 : index
    %c0_56 = arith.constant 0 : index
    %c0_57 = arith.constant 0 : index
    %50 = vector.load %arg2[%c5_55, %c0_56, %c0_57] : memref<9x16x16xbf16, #tpu.memory_space<vmem>>, vector<1x16x16xbf16>
    %51 = vector.shape_cast %50 : vector<1x16x16xbf16> to vector<16x16xbf16>
    %cst_58 = arith.constant dense<0.000000e+00> : vector<16x16xf32>
    %52 = tpu.matmul %49, %51, %cst_58 {dimension_numbers = #tpu.dot_dimension_numbers<[1], [0], [0], [1], [0, 0, 1, 1], [], []>} : vector<16x16xbf16>, vector<16x16xbf16>, vector<16x16xf32> -> vector<16x16xf32>
    %53 = arith.addf %47, %52 : vector<16x16xf32>
    %c2_59 = arith.constant 2 : index
    %c0_60 = arith.constant 0 : index
    %c0_61 = arith.constant 0 : index
    %54 = vector.load %arg5[%c2_59, %c0_60, %c0_61] : memref<6x6x16xbf16, #tpu.memory_space<vmem>>, vector<4x6x16xbf16>
    %55 = vector.extract_strided_slice %54 {offsets = [0, 0, 0], sizes = [4, 4, 16], strides = [1, 1, 1]} : vector<4x6x16xbf16> to vector<4x4x16xbf16>
    %56 = vector.shape_cast %55 : vector<4x4x16xbf16> to vector<16x16xbf16>
    %c6 = arith.constant 6 : index
    %c0_62 = arith.constant 0 : index
    %c0_63 = arith.constant 0 : index
    %57 = vector.load %arg2[%c6, %c0_62, %c0_63] : memref<9x16x16xbf16, #tpu.memory_space<vmem>>, vector<1x16x16xbf16>
    %58 = vector.shape_cast %57 : vector<1x16x16xbf16> to vector<16x16xbf16>
    %cst_64 = arith.constant dense<0.000000e+00> : vector<16x16xf32>
    %59 = tpu.matmul %56, %58, %cst_64 {dimension_numbers = #tpu.dot_dimension_numbers<[1], [0], [0], [1], [0, 0, 1, 1], [], []>} : vector<16x16xbf16>, vector<16x16xbf16>, vector<16x16xf32> -> vector<16x16xf32>
    %60 = arith.addf %53, %59 : vector<16x16xf32>
    %61 = vector.extract_strided_slice %54 {offsets = [0, 1, 0], sizes = [4, 4, 16], strides = [1, 1, 1]} : vector<4x6x16xbf16> to vector<4x4x16xbf16>
    %62 = vector.shape_cast %61 : vector<4x4x16xbf16> to vector<16x16xbf16>
    %c7 = arith.constant 7 : index
    %c0_65 = arith.constant 0 : index
    %c0_66 = arith.constant 0 : index
    %63 = vector.load %arg2[%c7, %c0_65, %c0_66] : memref<9x16x16xbf16, #tpu.memory_space<vmem>>, vector<1x16x16xbf16>
    %64 = vector.shape_cast %63 : vector<1x16x16xbf16> to vector<16x16xbf16>
    %cst_67 = arith.constant dense<0.000000e+00> : vector<16x16xf32>
    %65 = tpu.matmul %62, %64, %cst_67 {dimension_numbers = #tpu.dot_dimension_numbers<[1], [0], [0], [1], [0, 0, 1, 1], [], []>} : vector<16x16xbf16>, vector<16x16xbf16>, vector<16x16xf32> -> vector<16x16xf32>
    %66 = arith.addf %60, %65 : vector<16x16xf32>
    %67 = vector.extract_strided_slice %54 {offsets = [0, 2, 0], sizes = [4, 4, 16], strides = [1, 1, 1]} : vector<4x6x16xbf16> to vector<4x4x16xbf16>
    %68 = vector.shape_cast %67 : vector<4x4x16xbf16> to vector<16x16xbf16>
    %c8 = arith.constant 8 : index
    %c0_68 = arith.constant 0 : index
    %c0_69 = arith.constant 0 : index
    %69 = vector.load %arg2[%c8, %c0_68, %c0_69] : memref<9x16x16xbf16, #tpu.memory_space<vmem>>, vector<1x16x16xbf16>
    %70 = vector.shape_cast %69 : vector<1x16x16xbf16> to vector<16x16xbf16>
    %cst_70 = arith.constant dense<0.000000e+00> : vector<16x16xf32>
    %71 = tpu.matmul %68, %70, %cst_70 {dimension_numbers = #tpu.dot_dimension_numbers<[1], [0], [0], [1], [0, 0, 1, 1], [], []>} : vector<16x16xbf16>, vector<16x16xbf16>, vector<16x16xf32> -> vector<16x16xf32>
    %72 = arith.addf %66, %71 : vector<16x16xf32>
    %c0_71 = arith.constant 0 : index
    %c0_72 = arith.constant 0 : index
    %73 = vector.load %arg7[%c0_71, %c0_72] : memref<16x16xf32, #tpu.memory_space<vmem>>, vector<16x16xf32>
    tpu.vector_store %arg7[%c0_71, %c0_72], %72 {strides = array<i32>} : memref<16x16xf32, #tpu.memory_space<vmem>>, vector<16x16xf32>,
    %cst_73 = arith.constant dense<0.000000e+00> : vector<16xf32>
    %74 = vector.multi_reduction <add>, %72, %cst_73 [0] : vector<16x16xf32> to vector<16xf32>
    %75 = vector.shape_cast %74 : vector<16xf32> to vector<1x16xf32>
    %76 = arith.addf %13, %75 : vector<1x16xf32>
    %77 = arith.mulf %72, %72 : vector<16x16xf32>
    %cst_74 = arith.constant dense<0.000000e+00> : vector<16xf32>
    %78 = vector.multi_reduction <add>, %77, %cst_74 [0] : vector<16x16xf32> to vector<16xf32>
    %79 = vector.shape_cast %78 : vector<16xf32> to vector<1x16xf32>
    %80 = arith.addf %14, %79 : vector<1x16xf32>
    %cst_75 = arith.constant 6.250000e-02 : f32
    %81 = vector.broadcast %cst_75 : f32 to vector<1x16xf32>
    %82 = arith.mulf %76, %81 : vector<1x16xf32>
    %cst_76 = arith.constant 6.250000e-02 : f32
    %83 = vector.broadcast %cst_76 : f32 to vector<1x16xf32>
    %84 = arith.mulf %80, %83 : vector<1x16xf32>
    %85 = arith.mulf %82, %82 : vector<1x16xf32>
    %86 = arith.subf %84, %85 : vector<1x16xf32>
    %cst_77 = arith.constant 0.000000e+00 : f32
    %87 = vector.broadcast %cst_77 : f32 to vector<1x16xf32>
    %88 = arith.maximumf %86, %87 : vector<1x16xf32>
    %cst_78 = arith.constant 9.99999974E-6 : f32
    %89 = vector.broadcast %cst_78 : f32 to vector<1x16xf32>
    %90 = arith.addf %88, %89 : vector<1x16xf32>
    %91 = math.rsqrt %90 : vector<1x16xf32>
    %c0_79 = arith.constant 0 : index
    %c0_80 = arith.constant 0 : index
    %92 = vector.load %arg7[%c0_79, %c0_80] : memref<16x16xf32, #tpu.memory_space<vmem>>, vector<16x16xf32>
    %93 = vector.broadcast %82 : vector<1x16xf32> to vector<16x16xf32>
    %94 = arith.subf %92, %93 : vector<16x16xf32>
    %95 = vector.broadcast %91 : vector<1x16xf32> to vector<16x16xf32>
    %96 = arith.mulf %94, %95 : vector<16x16xf32>
    %cst_81 = arith.constant 0.000000e+00 : f32
    %97 = vector.broadcast %cst_81 : f32 to vector<16x16xf32>
    %98 = arith.cmpf oge, %96, %97 : vector<16x16xf32>
    %cst_82 = arith.constant 0.00999999977 : f32
    %99 = vector.broadcast %cst_82 : f32 to vector<16x16xf32>
    %100 = arith.mulf %99, %96 : vector<16x16xf32>
    %101 = arith.select %98, %96, %100 : vector<16x16xi1>, vector<16x16xf32>
    %102 = vector.shape_cast %101 : vector<16x16xf32> to vector<4x4x16xf32>
    %103 = arith.truncf %102 : vector<4x4x16xf32> to vector<4x4x16xbf16>
    %c1_83 = arith.constant 1 : index
    %c1_84 = arith.constant 1 : index
    %c0_85 = arith.constant 0 : index
    %104 = vector.load %arg6[%c1_83, %c1_84, %c0_85] : memref<6x6x16xbf16, #tpu.memory_space<vmem>>, vector<4x4x16xbf16>
    tpu.vector_store %arg6[%c1_83, %c1_84, %c0_85], %103 {strides = array<i32>} : memref<6x6x16xbf16, #tpu.memory_space<vmem>>, vector<4x4x16xbf16>,
    %cst_86 = arith.constant 0.000000e+00 : f32
    %105 = vector.broadcast %cst_86 : f32 to vector<1x16xf32>
    %cst_87 = arith.constant 0.000000e+00 : f32
    %106 = vector.broadcast %cst_87 : f32 to vector<1x16xf32>
    %cst_88 = arith.constant 0.000000e+00 : f32
    %107 = vector.broadcast %cst_88 : f32 to vector<16x16xf32>
    %c0_89 = arith.constant 0 : index
    %c0_90 = arith.constant 0 : index
    %c0_91 = arith.constant 0 : index
    %108 = vector.load %arg6[%c0_89, %c0_90, %c0_91] : memref<6x6x16xbf16, #tpu.memory_space<vmem>>, vector<4x6x16xbf16>
    %109 = vector.extract_strided_slice %108 {offsets = [0, 0, 0], sizes = [4, 4, 16], strides = [1, 1, 1]} : vector<4x6x16xbf16> to vector<4x4x16xbf16>
    %110 = vector.shape_cast %109 : vector<4x4x16xbf16> to vector<16x16xbf16>
    %c0_92 = arith.constant 0 : index
    %c0_93 = arith.constant 0 : index
    %c0_94 = arith.constant 0 : index
    %111 = vector.load %arg3[%c0_92, %c0_93, %c0_94] : memref<9x16x16xbf16, #tpu.memory_space<vmem>>, vector<1x16x16xbf16>
    %112 = vector.shape_cast %111 : vector<1x16x16xbf16> to vector<16x16xbf16>
    %cst_95 = arith.constant dense<0.000000e+00> : vector<16x16xf32>
    %113 = tpu.matmul %110, %112, %cst_95 {dimension_numbers = #tpu.dot_dimension_numbers<[1], [0], [0], [1], [0, 0, 1, 1], [], []>} : vector<16x16xbf16>, vector<16x16xbf16>, vector<16x16xf32> -> vector<16x16xf32>
    %114 = arith.addf %107, %113 : vector<16x16xf32>
    %115 = vector.extract_strided_slice %108 {offsets = [0, 1, 0], sizes = [4, 4, 16], strides = [1, 1, 1]} : vector<4x6x16xbf16> to vector<4x4x16xbf16>
    %116 = vector.shape_cast %115 : vector<4x4x16xbf16> to vector<16x16xbf16>
    %c1_96 = arith.constant 1 : index
    %c0_97 = arith.constant 0 : index
    %c0_98 = arith.constant 0 : index
    %117 = vector.load %arg3[%c1_96, %c0_97, %c0_98] : memref<9x16x16xbf16, #tpu.memory_space<vmem>>, vector<1x16x16xbf16>
    %118 = vector.shape_cast %117 : vector<1x16x16xbf16> to vector<16x16xbf16>
    %cst_99 = arith.constant dense<0.000000e+00> : vector<16x16xf32>
    %119 = tpu.matmul %116, %118, %cst_99 {dimension_numbers = #tpu.dot_dimension_numbers<[1], [0], [0], [1], [0, 0, 1, 1], [], []>} : vector<16x16xbf16>, vector<16x16xbf16>, vector<16x16xf32> -> vector<16x16xf32>
    %120 = arith.addf %114, %119 : vector<16x16xf32>
    %121 = vector.extract_strided_slice %108 {offsets = [0, 2, 0], sizes = [4, 4, 16], strides = [1, 1, 1]} : vector<4x6x16xbf16> to vector<4x4x16xbf16>
    %122 = vector.shape_cast %121 : vector<4x4x16xbf16> to vector<16x16xbf16>
    %c2_100 = arith.constant 2 : index
    %c0_101 = arith.constant 0 : index
    %c0_102 = arith.constant 0 : index
    %123 = vector.load %arg3[%c2_100, %c0_101, %c0_102] : memref<9x16x16xbf16, #tpu.memory_space<vmem>>, vector<1x16x16xbf16>
    %124 = vector.shape_cast %123 : vector<1x16x16xbf16> to vector<16x16xbf16>
    %cst_103 = arith.constant dense<0.000000e+00> : vector<16x16xf32>
    %125 = tpu.matmul %122, %124, %cst_103 {dimension_numbers = #tpu.dot_dimension_numbers<[1], [0], [0], [1], [0, 0, 1, 1], [], []>} : vector<16x16xbf16>, vector<16x16xbf16>, vector<16x16xf32> -> vector<16x16xf32>
    %126 = arith.addf %120, %125 : vector<16x16xf32>
    %c1_104 = arith.constant 1 : index
    %c0_105 = arith.constant 0 : index
    %c0_106 = arith.constant 0 : index
    %127 = vector.load %arg6[%c1_104, %c0_105, %c0_106] : memref<6x6x16xbf16, #tpu.memory_space<vmem>>, vector<4x6x16xbf16>
    %128 = vector.extract_strided_slice %127 {offsets = [0, 0, 0], sizes = [4, 4, 16], strides = [1, 1, 1]} : vector<4x6x16xbf16> to vector<4x4x16xbf16>
    %129 = vector.shape_cast %128 : vector<4x4x16xbf16> to vector<16x16xbf16>
    %c3_107 = arith.constant 3 : index
    %c0_108 = arith.constant 0 : index
    %c0_109 = arith.constant 0 : index
    %130 = vector.load %arg3[%c3_107, %c0_108, %c0_109] : memref<9x16x16xbf16, #tpu.memory_space<vmem>>, vector<1x16x16xbf16>
    %131 = vector.shape_cast %130 : vector<1x16x16xbf16> to vector<16x16xbf16>
    %cst_110 = arith.constant dense<0.000000e+00> : vector<16x16xf32>
    %132 = tpu.matmul %129, %131, %cst_110 {dimension_numbers = #tpu.dot_dimension_numbers<[1], [0], [0], [1], [0, 0, 1, 1], [], []>} : vector<16x16xbf16>, vector<16x16xbf16>, vector<16x16xf32> -> vector<16x16xf32>
    %133 = arith.addf %126, %132 : vector<16x16xf32>
    %134 = vector.extract_strided_slice %127 {offsets = [0, 1, 0], sizes = [4, 4, 16], strides = [1, 1, 1]} : vector<4x6x16xbf16> to vector<4x4x16xbf16>
    %135 = vector.shape_cast %134 : vector<4x4x16xbf16> to vector<16x16xbf16>
    %c4_111 = arith.constant 4 : index
    %c0_112 = arith.constant 0 : index
    %c0_113 = arith.constant 0 : index
    %136 = vector.load %arg3[%c4_111, %c0_112, %c0_113] : memref<9x16x16xbf16, #tpu.memory_space<vmem>>, vector<1x16x16xbf16>
    %137 = vector.shape_cast %136 : vector<1x16x16xbf16> to vector<16x16xbf16>
    %cst_114 = arith.constant dense<0.000000e+00> : vector<16x16xf32>
    %138 = tpu.matmul %135, %137, %cst_114 {dimension_numbers = #tpu.dot_dimension_numbers<[1], [0], [0], [1], [0, 0, 1, 1], [], []>} : vector<16x16xbf16>, vector<16x16xbf16>, vector<16x16xf32> -> vector<16x16xf32>
    %139 = arith.addf %133, %138 : vector<16x16xf32>
    %140 = vector.extract_strided_slice %127 {offsets = [0, 2, 0], sizes = [4, 4, 16], strides = [1, 1, 1]} : vector<4x6x16xbf16> to vector<4x4x16xbf16>
    %141 = vector.shape_cast %140 : vector<4x4x16xbf16> to vector<16x16xbf16>
    %c5_115 = arith.constant 5 : index
    %c0_116 = arith.constant 0 : index
    %c0_117 = arith.constant 0 : index
    %142 = vector.load %arg3[%c5_115, %c0_116, %c0_117] : memref<9x16x16xbf16, #tpu.memory_space<vmem>>, vector<1x16x16xbf16>
    %143 = vector.shape_cast %142 : vector<1x16x16xbf16> to vector<16x16xbf16>
    %cst_118 = arith.constant dense<0.000000e+00> : vector<16x16xf32>
    %144 = tpu.matmul %141, %143, %cst_118 {dimension_numbers = #tpu.dot_dimension_numbers<[1], [0], [0], [1], [0, 0, 1, 1], [], []>} : vector<16x16xbf16>, vector<16x16xbf16>, vector<16x16xf32> -> vector<16x16xf32>
    %145 = arith.addf %139, %144 : vector<16x16xf32>
    %c2_119 = arith.constant 2 : index
    %c0_120 = arith.constant 0 : index
    %c0_121 = arith.constant 0 : index
    %146 = vector.load %arg6[%c2_119, %c0_120, %c0_121] : memref<6x6x16xbf16, #tpu.memory_space<vmem>>, vector<4x6x16xbf16>
    %147 = vector.extract_strided_slice %146 {offsets = [0, 0, 0], sizes = [4, 4, 16], strides = [1, 1, 1]} : vector<4x6x16xbf16> to vector<4x4x16xbf16>
    %148 = vector.shape_cast %147 : vector<4x4x16xbf16> to vector<16x16xbf16>
    %c6_122 = arith.constant 6 : index
    %c0_123 = arith.constant 0 : index
    %c0_124 = arith.constant 0 : index
    %149 = vector.load %arg3[%c6_122, %c0_123, %c0_124] : memref<9x16x16xbf16, #tpu.memory_space<vmem>>, vector<1x16x16xbf16>
    %150 = vector.shape_cast %149 : vector<1x16x16xbf16> to vector<16x16xbf16>
    %cst_125 = arith.constant dense<0.000000e+00> : vector<16x16xf32>
    %151 = tpu.matmul %148, %150, %cst_125 {dimension_numbers = #tpu.dot_dimension_numbers<[1], [0], [0], [1], [0, 0, 1, 1], [], []>} : vector<16x16xbf16>, vector<16x16xbf16>, vector<16x16xf32> -> vector<16x16xf32>
    %152 = arith.addf %145, %151 : vector<16x16xf32>
    %153 = vector.extract_strided_slice %146 {offsets = [0, 1, 0], sizes = [4, 4, 16], strides = [1, 1, 1]} : vector<4x6x16xbf16> to vector<4x4x16xbf16>
    %154 = vector.shape_cast %153 : vector<4x4x16xbf16> to vector<16x16xbf16>
    %c7_126 = arith.constant 7 : index
    %c0_127 = arith.constant 0 : index
    %c0_128 = arith.constant 0 : index
    %155 = vector.load %arg3[%c7_126, %c0_127, %c0_128] : memref<9x16x16xbf16, #tpu.memory_space<vmem>>, vector<1x16x16xbf16>
    %156 = vector.shape_cast %155 : vector<1x16x16xbf16> to vector<16x16xbf16>
    %cst_129 = arith.constant dense<0.000000e+00> : vector<16x16xf32>
    %157 = tpu.matmul %154, %156, %cst_129 {dimension_numbers = #tpu.dot_dimension_numbers<[1], [0], [0], [1], [0, 0, 1, 1], [], []>} : vector<16x16xbf16>, vector<16x16xbf16>, vector<16x16xf32> -> vector<16x16xf32>
    %158 = arith.addf %152, %157 : vector<16x16xf32>
    %159 = vector.extract_strided_slice %146 {offsets = [0, 2, 0], sizes = [4, 4, 16], strides = [1, 1, 1]} : vector<4x6x16xbf16> to vector<4x4x16xbf16>
    %160 = vector.shape_cast %159 : vector<4x4x16xbf16> to vector<16x16xbf16>
    %c8_130 = arith.constant 8 : index
    %c0_131 = arith.constant 0 : index
    %c0_132 = arith.constant 0 : index
    %161 = vector.load %arg3[%c8_130, %c0_131, %c0_132] : memref<9x16x16xbf16, #tpu.memory_space<vmem>>, vector<1x16x16xbf16>
    %162 = vector.shape_cast %161 : vector<1x16x16xbf16> to vector<16x16xbf16>
    %cst_133 = arith.constant dense<0.000000e+00> : vector<16x16xf32>
    %163 = tpu.matmul %160, %162, %cst_133 {dimension_numbers = #tpu.dot_dimension_numbers<[1], [0], [0], [1], [0, 0, 1, 1], [], []>} : vector<16x16xbf16>, vector<16x16xbf16>, vector<16x16xf32> -> vector<16x16xf32>
    %164 = arith.addf %158, %163 : vector<16x16xf32>
    %c0_134 = arith.constant 0 : index
    %c0_135 = arith.constant 0 : index
    %165 = vector.load %arg7[%c0_134, %c0_135] : memref<16x16xf32, #tpu.memory_space<vmem>>, vector<16x16xf32>
    tpu.vector_store %arg7[%c0_134, %c0_135], %164 {strides = array<i32>} : memref<16x16xf32, #tpu.memory_space<vmem>>, vector<16x16xf32>,
    %cst_136 = arith.constant dense<0.000000e+00> : vector<16xf32>
    %166 = vector.multi_reduction <add>, %164, %cst_136 [0] : vector<16x16xf32> to vector<16xf32>
    %167 = vector.shape_cast %166 : vector<16xf32> to vector<1x16xf32>
    %168 = arith.addf %105, %167 : vector<1x16xf32>
    %169 = arith.mulf %164, %164 : vector<16x16xf32>
    %cst_137 = arith.constant dense<0.000000e+00> : vector<16xf32>
    %170 = vector.multi_reduction <add>, %169, %cst_137 [0] : vector<16x16xf32> to vector<16xf32>
    %171 = vector.shape_cast %170 : vector<16xf32> to vector<1x16xf32>
    %172 = arith.addf %106, %171 : vector<1x16xf32>
    %cst_138 = arith.constant 6.250000e-02 : f32
    %173 = vector.broadcast %cst_138 : f32 to vector<1x16xf32>
    %174 = arith.mulf %168, %173 : vector<1x16xf32>
    %cst_139 = arith.constant 6.250000e-02 : f32
    %175 = vector.broadcast %cst_139 : f32 to vector<1x16xf32>
    %176 = arith.mulf %172, %175 : vector<1x16xf32>
    %177 = arith.mulf %174, %174 : vector<1x16xf32>
    %178 = arith.subf %176, %177 : vector<1x16xf32>
    %cst_140 = arith.constant 0.000000e+00 : f32
    %179 = vector.broadcast %cst_140 : f32 to vector<1x16xf32>
    %180 = arith.maximumf %178, %179 : vector<1x16xf32>
    %cst_141 = arith.constant 9.99999974E-6 : f32
    %181 = vector.broadcast %cst_141 : f32 to vector<1x16xf32>
    %182 = arith.addf %180, %181 : vector<1x16xf32>
    %183 = math.rsqrt %182 : vector<1x16xf32>
    %c0_142 = arith.constant 0 : index
    %c0_143 = arith.constant 0 : index
    %184 = vector.load %arg7[%c0_142, %c0_143] : memref<16x16xf32, #tpu.memory_space<vmem>>, vector<16x16xf32>
    %185 = vector.broadcast %174 : vector<1x16xf32> to vector<16x16xf32>
    %186 = arith.subf %184, %185 : vector<16x16xf32>
    %187 = vector.broadcast %183 : vector<1x16xf32> to vector<16x16xf32>
    %188 = arith.mulf %186, %187 : vector<16x16xf32>
    %c0_144 = arith.constant 0 : index
    %c0_145 = arith.constant 0 : index
    %c0_146 = arith.constant 0 : index
    %c0_147 = arith.constant 0 : index
    %189 = vector.load %arg1[%c0_144, %c0_145, %c0_146, %c0_147] : memref<1x4x4x16xbf16, #tpu.memory_space<vmem>>, vector<1x4x4x16xbf16>
    %190 = vector.shape_cast %189 : vector<1x4x4x16xbf16> to vector<4x4x16xbf16>
    %191 = vector.shape_cast %190 : vector<4x4x16xbf16> to vector<16x16xbf16>
    %192 = arith.extf %191 : vector<16x16xbf16> to vector<16x16xf32>
    %193 = arith.addf %192, %188 : vector<16x16xf32>
    %194 = arith.truncf %193 : vector<16x16xf32> to vector<16x16xbf16>
    %c0_148 = arith.constant 0 : index
    %c0_149 = arith.constant 0 : index
    %c0_150 = arith.constant 0 : index
    %195 = vector.load %arg4[%c0_148, %c0_149, %c0_150] : memref<1x16x16xbf16, #tpu.memory_space<vmem>>, vector<1x16x16xbf16>
    %196 = vector.shape_cast %195 : vector<1x16x16xbf16> to vector<16x16xbf16>
    %197 = vector.shape_cast %194 : vector<16x16xbf16> to vector<1x16x16xbf16>
    tpu.vector_store %arg4[%c0_148, %c0_149, %c0_150], %197 {strides = array<i32>} : memref<1x16x16xbf16, #tpu.memory_space<vmem>>, vector<1x16x16xbf16>,
    return
  }
  func.func @transform_0(%arg0: i32) -> (i32, i32, i32, i32) {
    %c0_i32 = arith.constant 0 : i32
    %c0_i32_0 = arith.constant 0 : i32
    %c0_i32_1 = arith.constant 0 : i32
    %c0_i32_2 = arith.constant 0 : i32
    return %arg0, %c0_i32, %c0_i32_0, %c0_i32_1 : i32, i32, i32, i32
  }
  func.func @transform_1(%arg0: i32) -> (i32, i32, i32) {
    %c0_i32 = arith.constant 0 : i32
    %c0_i32_0 = arith.constant 0 : i32
    %c0_i32_1 = arith.constant 0 : i32
    %c0_i32_2 = arith.constant 0 : i32
    return %c0_i32, %c0_i32_0, %c0_i32_1 : i32, i32, i32
  }
  func.func @transform_2(%arg0: i32) -> (i32, i32, i32) {
    %c0_i32 = arith.constant 0 : i32
    %c0_i32_0 = arith.constant 0 : i32
    %c0_i32_1 = arith.constant 0 : i32
    %c0_i32_2 = arith.constant 0 : i32
    return %c0_i32, %c0_i32_0, %c0_i32_1 : i32, i32, i32
  }
  func.func @transform_3(%arg0: i32) -> (i32, i32, i32) {
    %c0_i32 = arith.constant 0 : i32
    %c0_i32_0 = arith.constant 0 : i32
    %c0_i32_1 = arith.constant 0 : i32
    return %arg0, %c0_i32, %c0_i32_0 : i32, i32, i32
  }
}

</mosaic_0001>

<bundles_post_ra>
// kernel: unet_encoder2_forward.3
= control target key start
LH: loop header
LB: loop body
LE: loop exit
PB: predicated region body
PF: predicated region fallthrough
CT: control target
= control target key end

     0   :  { %s1208_s9 = smov 0   ;;  %s1380_s0 = inlined_call_operand.vmem [shape: bf16[2,9,9,16], index: 0, kind: input, shape index: {}]   ;;  %s1381_s1 = inlined_call_operand.vmem [shape: bf16[4,16,8], index: 1, kind: input, shape index: {}]   ;;  %s1382_s2 = inlined_call_operand.vmem [shape: bf16[2,64,8], index: 2, kind: output, shape index: {}]  }
   0x1 LB: > { %s1017_s10 = sadd.s32 4294967295, %s1191_s9   ;;  %p1021_p0 = scmp.ge.s32.totalorder %s1191_s9, 1  ;;  %s1191_s9 = sphi %s1208_s9, %s12_s9  }
   0x2   : > { %p112_p1 = scmp.lt.s32.totalorder %s1191_s9, 3 }
   0x4   : > { %p113_p2 = pnand %p1021_p0, %p112_p1 }
   0x5   : > { %p134_p3 = scmp.lt.s32.totalorder (!%p113_p2), %s1017_s10, 1 }
   0x6   : > { %116 = sbr.rel (%p113_p2) target bundleno = 314 (0x13a), region = 28 }
   0xb   : > { %v1171_v0 = vld [vmem:[%s1381_s1] sm:$0xff]   ;;  %v1172_v1 = vld [vmem:[%s1381_s1 + $0x8] sm:$0xff]   ;;  %s1386_s10 = smov (!%p134_p3, %s1017_s10), 1  ;;  %v1227_v2 = vld [vmem:[%s1381_s1 + $0x10] sm:$0xff]   ;;  %vm299_vm0 = vcmask 130048   ;;  %vm829_vm4 = vcmask 64512  }
   0xc   : > { %1132 = vmatprep.subr.bf16.mxu1 %v1171_v0  ;;  %1122 = vmatprep.subr.bf16.mxu0 %v1172_v1  ;;  %s1162_s17 = smul.u32 72, %s1386_s10  ;;  %v1176_v3 = vld [vmem:[%s1381_s1 + $0x18] sm:$0xff]   ;;  %vm163_vm1 = vsmask.f32 3328  ;;  %vm164_vm2 = vsmask.f32 7440 }
   0xd   : > { %1133 = vmatpush3.bf16.msra.mxu1 %v1171_v0  ;;  %1123 = vmatpush3.bf16.msra.mxu0 %v1172_v1  ;;  %vm1250_vm3 = vmor %vm163_vm1, %vm164_vm2  ;;  %vm953_vm5 = vcmask 60416   ;;  %s1093_s23 = sshll.u32 %s1386_s10, 5 }
   0xe   : > { %1142 = vmatprep.subr.bf16.mxu0 %v1227_v2  ;;  %s1237_s22 = scalar_lea.vmem %s1380_s0, %s1162_s17  ;;  %1152 = vmatprep.subr.bf16.mxu1 %v1176_v3  ;;  %s143_s26 = scalar_lea.vmem %s1382_s2, %s1093_s23 }
   0xf   : > { %v145_v4 = vld [vmem:[%s1237_s22] sm:$0xf]  ;;  %v147_v5 = vld [vmem:[%s1237_s22 + $0x8] sm:$0xf]  ;;  %v149_v6 = vld [vmem:[%s1237_s22 + $0x10] sm:$0xf] }
  0x10   : > { %v167_v7 = vshrl.u32 %v145_v4, 16  ;;  %v170_v8 = vshll.u32 %v145_v4, 16  ;;  %v181_v9 = vshrl.u32 %v147_v5, 16  ;;  %v184_v10 = vshll.u32 %v147_v5, 16  ;;  %v151_v11 = vld [vmem:[%s1237_s22 + $0x18] sm:$0xf] }
  0x11   : > { %v1036_v12 = vcombine.low %v145_v4, %v147_v5  ;;  %v195_v13 = vshrl.u32 %v149_v6, 16  ;;  %v198_v14 = vshll.u32 %v149_v6, 16  ;;  %v209_v15 = vshrl.u32 %v151_v11, 16  ;;  %v146_v16 = vld [vmem:[%s1237_s22 + $0x4] sm:$0x1] }
  0x12   : > { %v169_v17 = vrot.slane %v167_v7, 4  ;;  %v172_v18 = vrot.slane %v170_v8, 5  ;;  %v183_v19 = vrot.slane %v181_v9, 4  ;;  %v186_v20 = vrot.slane %v184_v10, 5  ;;  %v148_v21 = vld [vmem:[%s1237_s22 + $0xc] sm:$0x1] }
  0x13   : > { %1134 = vmatprep.mubr.msk.bf16.mxu1 %vm299_vm0, %v1036_v12  ;;  %v197_v22 = vrot.slane %v195_v13, 4  ;;  %v200_v23 = vrot.slane %v198_v14, 5  ;;  %v211_v24 = vrot.slane %v209_v15, 4  ;;  %v212_v25 = vshll.u32 %v151_v11, 16  ;;  %v150_v26 = vld [vmem:[%s1237_s22 + $0x14] sm:$0x1] }
  0x14   : > { %v1037_v27 = vcombine.low %v149_v6, %v151_v11  ;;  %v173_v28 = vor.u32 %v172_v18, %v169_v17  ;;  %v176_v29 = vshll.u32 %v146_v16, 16  ;;  %v187_v30 = vor.u32 %v186_v20, %v183_v19  ;;  %v152_v31 = vld [vmem:[%s1237_s22 + $0x1c] sm:$0x1]  ;;  %v153_v37 = vld [vmem:[%s1237_s22 + $0x20] sm:$0xf] }
  0x15   : > { %v214_v32 = vrot.slane %v212_v25, 5  ;;  %v190_v34 = vshll.u32 %v148_v21, 16  ;;  %v201_v35 = vor.u32 %v200_v23, %v197_v22  ;;  %v204_v36 = vshll.u32 %v150_v26, 16  ;;  %v155_v42 = vld [vmem:[%s1237_s22 + $0x28] sm:$0xf] }
  0x16   : > { %1135 = vmatmul.mubr.msk.bf16.vlgmr.msra.gmra.mxu1 %vm299_vm0, %v1037_v27  ;;  %v174_v38 = vrot.slane %v173_v28, 4  ;;  %v178_v39 = vrot.slane %v176_v29, 5  ;;  %v188_v40 = vrot.slane %v187_v30, 4  ;;  %v218_v41 = vshll.u32 %v152_v31, 16  ;;  %v157_v51 = vld [vmem:[%s1237_s22 + $0x30] sm:$0xf] }
  0x17   : > { %v192_v43 = vrot.slane %v190_v34, 5  ;;  %v202_v44 = vrot.slane %v201_v35, 4  ;;  %v206_v45 = vrot.slane %v204_v36, 5  ;;  %v215_v46 = vor.u32 %v214_v32, %v211_v24  ;;  %1153 = vmatpush3.bf16.msra.mxu1 %v1176_v3  ;;  %v159_v56 = vld [vmem:[%s1237_s22 + $0x38] sm:$0xf] }
  0x18   : > { %v179_v47 = vsel %vm1250_vm3, %v174_v38, %v178_v39  ;;  %v220_v48 = vrot.slane %v218_v41, 5  ;;  %v223_v49 = vshrl.u32 %v153_v37, 16  ;;  %v226_v50 = vshll.u32 %v153_v37, 16  ;;  %v154_v1 = vld [vmem:[%s1237_s22 + $0x24] sm:$0x1] }
  0x19   : > { %v193_v52 = vsel %vm1250_vm3, %v188_v40, %v192_v43  ;;  %v207_v53 = vsel %vm1250_vm3, %v202_v44, %v206_v45  ;;  %v216_v54 = vrot.slane %v215_v46, 4  ;;  %v237_v55 = vshrl.u32 %v155_v42, 16  ;;  %v156_v3 = vld [vmem:[%s1237_s22 + $0x2c] sm:$0x1]  ;;  %v158_v8 = vld [vmem:[%s1237_s22 + $0x34] sm:$0x1] }
  0x1a   : > { %v1027_v57 = vcombine.low %v179_v47, %v193_v52  ;;  %v225_v58 = vrot.slane %v223_v49, 4  ;;  %v228_v59 = vrot.slane %v226_v50, 5  ;;  %v240_v60 = vshll.u32 %v155_v42, 16  ;;  %v160_v13 = vld [vmem:[%s1237_s22 + $0x3c] sm:$0x1] }
  0x1b   : > { %v221_v61 = vsel %vm1250_vm3, %v216_v54, %v220_v48  ;;  %v239_v62 = vrot.slane %v237_v55, 4  ;;  %v1038_v63 = vcombine.low %v153_v37, %v155_v42  ;;  %v251_v0 = vshrl.u32 %v157_v51, 16  ;;  %v1275_v18 = vld [vmem:[%s1237_s22 + $0x8] sm:$0xf]  ;;  %v1046_v27 = vld [vmem:[%s1237_s22 + $0xc] sm:$0x1] }
  0x1c   : > { %1124 = vmatprep.mubr.msk.bf16.mxu0 %vm299_vm0, %v1027_v57  ;;  %v1028_v4 = vcombine.low %v207_v53, %v221_v61  ;;  %v242_v5 = vrot.slane %v240_v60, 5  ;;  %v254_v6 = vshll.u32 %v157_v51, 16  ;;  %v265_v7 = vshrl.u32 %v159_v56, 16  ;;  %v1047_v31 = vld [vmem:[%s1237_s22 + $0x10] sm:$0xf] }
  0x1d   : > { %1138 = vmatprep.mubr.msk.bf16.mxu1 %vm299_vm0, %v1038_v63  ;;  %v253_v9 = vrot.slane %v251_v0, 4  ;;  %v268_v10 = vshll.u32 %v159_v56, 16  ;;  %v1039_v11 = vcombine.low %v157_v51, %v159_v56  ;;  %v229_v12 = vor.u32 %v228_v59, %v225_v58  ;;  %v1048_v36 = vld [vmem:[%s1237_s22 + $0x14] sm:$0x1]  ;;  %v1289_v42 = vld [vmem:[%s1237_s22 + $0x18] sm:$0xf] }
  0x1e   : > { %1125 = vmatmul.mubr.msk.bf16.vlgmr.msra.gmra.mxu0 %vm299_vm0, %v1028_v4  ;;  %v256_v14 = vrot.slane %v254_v6, 5  ;;  %v267_v15 = vrot.slane %v265_v7, 4  ;;  %v232_v16 = vshll.u32 %v154_v1, 16  ;;  %v243_v17 = vor.u32 %v242_v5, %v239_v62  ;;  %v1050_v47 = vld [vmem:[%s1237_s22 + $0x1c] sm:$0x1] }
  0x1f   : > { %1143 = vmatpush3.bf16.msra.mxu0 %v1227_v2  ;;  %v270_v19 = vrot.slane %v268_v10, 5  ;;  %1139 = vmatmul.mubr.msk.bf16.gmra.mxu1 %vm299_vm0, %v1039_v11  ;;  %v230_v20 = vrot.slane %v229_v12, 4  ;;  %v246_v21 = vshll.u32 %v156_v3, 16  ;;  %v260_v22 = vshll.u32 %v158_v8, 16  ;;  %v1051_v52 = vld [vmem:[%s1237_s22 + $0x20] sm:$0xf] }
  0x20   : > { %v234_v23 = vrot.slane %v232_v16, 5  ;;  %v244_v24 = vrot.slane %v243_v17, 4  ;;  %v257_v25 = vor.u32 %v256_v14, %v253_v9  ;;  %v274_v26 = vshll.u32 %v160_v13, 16  ;;  %v1052_v56 = vld [vmem:[%s1237_s22 + $0x24] sm:$0x1] }
  0x21   : > { %v248_v28 = vrot.slane %v246_v21, 5  ;;  %v262_v29 = vrot.slane %v260_v22, 5  ;;  %v271_v30 = vor.u32 %v270_v19, %v267_v15  ;;  %v612_v2 = vshrl.u32 %v1275_v18, 16  ;;  %v1303_v3 = vld [vmem:[%s1237_s22 + $0x28] sm:$0xf] }
  0x22   : > { %v235_v32 = vsel %vm1250_vm3, %v230_v20, %v234_v23  ;;  %v258_v34 = vrot.slane %v257_v25, 4  ;;  %v276_v35 = vrot.slane %v274_v26, 5  ;;  %v615_v37 = vshll.u32 %v1275_v18, 16  ;;  %v1054_v8 = vld [vmem:[%s1237_s22 + $0x2c] sm:$0x1] }
  0x23   : > { %v249_v38 = vsel %vm1250_vm3, %v244_v24, %v248_v28  ;;  %v272_v39 = vrot.slane %v271_v30, 4  ;;  %v614_v40 = vrot.slane %v612_v2, 4  ;;  %v621_v41 = vshll.u32 %v1046_v27, 16  ;;  %v1055_v13 = vld [vmem:[%s1237_s22 + $0x30] sm:$0xf] }
  0x24   : > { %v1029_v43 = vcombine.low %v235_v32, %v249_v38  ;;  %v263_v44 = vsel %vm1250_vm3, %v258_v34, %v262_v29  ;;  %v617_v45 = vrot.slane %v615_v37, 5  ;;  %v626_v46 = vshrl.u32 %v1047_v31, 16  ;;  %v1056_v20 = vld [vmem:[%s1237_s22 + $0x34] sm:$0x1]  ;;  %v1057_v27 = vld [vmem:[%s1237_s22 + $0x38] sm:$0xf] }
  0x25   : > { %v277_v48 = vsel %vm1250_vm3, %v272_v39, %v276_v35  ;;  %v623_v49 = vrot.slane %v621_v41, 5  ;;  %v629_v50 = vshll.u32 %v1047_v31, 16  ;;  %v635_v51 = vshll.u32 %v1048_v36, 16  ;;  %v1058_v2 = vld [vmem:[%s1237_s22 + $0x3c] sm:$0x1] }
  0x26   : > { %1128 = vmatprep.mubr.msk.bf16.mxu0 %vm299_vm0, %v1029_v43  ;;  %v1030_v53 = vcombine.low %v263_v44, %v277_v48  ;;  %v618_v54 = vor.u32 %v617_v45, %v614_v40  ;;  %v628_v55 = vrot.slane %v626_v46, 4  ;;  %v640_v57 = vshrl.u32 %v1289_v42, 16  ;;  %v1059_v37 = vld [vmem:[%s1237_s22 + $0x40] sm:$0xf]  ;;  %v1060_v44 = vld [vmem:[%s1237_s22 + $0x44] sm:$0x1] }
  0x27   : > { %v631_v58 = vrot.slane %v629_v50, 5  ;;  %v637_v59 = vrot.slane %v635_v51, 5  ;;  %v643_v60 = vshll.u32 %v1289_v42, 16  ;;  %v649_v61 = vshll.u32 %v1050_v47, 16 }
  0x28   : > { %1129 = vmatmul.mubr.msk.bf16.gmra.mxu0 %vm299_vm0, %v1030_v53  ;;  %v619_v62 = vrot.slane %v618_v54, 4  ;;  %v642_v63 = vrot.slane %v640_v57, 4  ;;  %v654_v0 = vshrl.u32 %v1051_v52, 16  ;;  %v657_v1 = vshll.u32 %v1051_v52, 16 }
  0x29   : > { %v632_v4 = vor.u32 %v631_v58, %v628_v55  ;;  %v645_v5 = vrot.slane %v643_v60, 5  ;;  %v651_v6 = vrot.slane %v649_v61, 5  ;;  %v663_v7 = vshll.u32 %v1052_v56, 16 }
  0x2a   : > { %v624_v9 = vsel %vm1250_vm3, %v619_v62, %v623_v49  ;;  %v656_v10 = vrot.slane %v654_v0, 4  ;;  %v659_v11 = vrot.slane %v657_v1, 5  ;;  %v1063_v12 = vcombine.low %v1275_v18, %v1047_v31 }
  0x2b   : > { %v633_v14 = vrot.slane %v632_v4, 4  ;;  %v646_v15 = vor.u32 %v645_v5, %v642_v63  ;;  %v665_v16 = vrot.slane %v663_v7, 5  ;;  %v1064_v17 = vcombine.low %v1289_v42, %v1051_v52 }
  0x2c   : > { %v660_v19 = vor.u32 %v659_v11, %v656_v10  ;;  %1144 = vmatprep.mubr.msk.bf16.mxu0 %vm299_vm0, %v1063_v12  ;;  %v668_v21 = vshrl.u32 %v1303_v3, 16  ;;  %v671_v22 = vshll.u32 %v1303_v3, 16  ;;  %v677_v23 = vshll.u32 %v1054_v8, 16 }
  0x2d   : > { %v638_v18 = vsel %vm1250_vm3, %v633_v14, %v637_v59  ;;  %v647_v24 = vrot.slane %v646_v15, 4  ;;  %v682_v25 = vshrl.u32 %v1055_v13, 16  ;;  %v685_v26 = vshll.u32 %v1055_v13, 16 }
  0x2e   : > { %v1074_v28 = vcombine.low %v624_v9, %v638_v18  ;;  %v661_v29 = vrot.slane %v660_v19, 4  ;;  %v670_v30 = vrot.slane %v668_v21, 4  ;;  %v673_v31 = vrot.slane %v671_v22, 5 }
  0x2f   : > { %v652_v32 = vsel %vm1250_vm3, %v647_v24, %v651_v6  ;;  %v679_v34 = vrot.slane %v677_v23, 5  ;;  %v684_v35 = vrot.slane %v682_v25, 4  ;;  %v687_v36 = vrot.slane %v685_v26, 5 }
  0x30   : > { %1154 = vmatprep.mubr.msk.bf16.mxu1 %vm299_vm0, %v1074_v28  ;;  %v666_v38 = vsel %vm1250_vm3, %v661_v29, %v665_v16  ;;  %1145 = vmatmul.mubr.msk.bf16.vlgmr.msra.gmra.mxu0 %vm299_vm0, %v1064_v17  ;;  %v674_v39 = vor.u32 %v673_v31, %v670_v30  ;;  %v691_v40 = vshll.u32 %v1056_v20, 16  ;;  %v696_v41 = vshrl.u32 %v1057_v27, 16 }
  0x31   : > { %v1075_v42 = vcombine.low %v652_v32, %v666_v38  ;;  %v688_v43 = vor.u32 %v687_v36, %v684_v35  ;;  %v699_v45 = vshll.u32 %v1057_v27, 16  ;;  %v705_v46 = vshll.u32 %v1058_v2, 16 }
  0x32   : > { %v675_v47 = vrot.slane %v674_v39, 4  ;;  %v693_v48 = vrot.slane %v691_v40, 5  ;;  %v698_v49 = vrot.slane %v696_v41, 4  ;;  %v710_v50 = vshrl.u32 %v1059_v37, 16 }
  0x33   : > { %1155 = vmatmul.mubr.msk.bf16.vlgmr.msra.gmra.mxu1 %vm299_vm0, %v1075_v42  ;;  %v689_v51 = vrot.slane %v688_v43, 4  ;;  %v701_v52 = vrot.slane %v699_v45, 5  ;;  %v707_v53 = vrot.slane %v705_v46, 5  ;;  %v713_v54 = vshll.u32 %v1059_v37, 16 }
  0x34   : > { %v680_v55 = vsel %vm1250_vm3, %v675_v47, %v679_v34  ;;  %v712_v56 = vrot.slane %v710_v50, 4  ;;  %v719_v57 = vshll.u32 %v1060_v44, 16  ;;  %v1065_v58 = vcombine.low %v1303_v3, %v1055_v13 }
  0x35   : > { %v694_v59 = vsel %vm1250_vm3, %v689_v51, %v693_v48  ;;  %v702_v60 = vor.u32 %v701_v52, %v698_v49  ;;  %v715_v61 = vrot.slane %v713_v54, 5  ;;  %v1066_v62 = vcombine.low %v1057_v27, %v1059_v37 }
  0x36   : > { %v1076_v63 = vcombine.low %v680_v55, %v694_v59  ;;  %1148 = vmatprep.mubr.msk.bf16.mxu0 %vm299_vm0, %v1065_v58  ;;  %v721_v4 = vrot.slane %v719_v57, 5 }
  0x37   : > { %v703_v0 = vrot.slane %v702_v60, 4  ;;  %v716_v1 = vor.u32 %v715_v61, %v712_v56 }
  0x38   : > { %1158 = vmatprep.mubr.msk.bf16.mxu1 %vm299_vm0, %v1076_v63  ;;  %1149 = vmatmul.mubr.msk.bf16.gmra.mxu0 %vm299_vm0, %v1066_v62 }
  0x39   : > { %v708_v5 = vsel %vm1250_vm3, %v703_v0, %v707_v53  ;;  %v717_v3 = vrot.slane %v716_v1, 4 }
  0x3b   : > { %v722_v6 = vsel %vm1250_vm3, %v717_v3, %v721_v4 }
  0x3c   : > { %v1077_v7 = vcombine.low %v708_v5, %v722_v6 }
  0x3e   : > { %1159 = vmatmul.mubr.msk.bf16.gmra.mxu1 %vm299_vm0, %v1077_v7 }
  0xd6   : > { %v1136_v8 = vpop.f32.mrf.mxu1 }
  0xd8   : > { %v449_v9 = vpop.f32.mrf.mxu1 }
  0xda   : > { %v1137_v10 = vpop.f32.mrf.mxu1 }
  0xdc   : > { %v452_v12 = vpop.f32.mrf.mxu1 }
  0xde   : > { %v1126_v11 = vpop.f32.mrf.mxu0 }
  0xdf   : > { %v1140_v15 = vpop.f32.mrf.mxu1  ;;  %v458_v33 = vadd.f32 %v1136_v8, %v1126_v11 }
  0xe0   : > { %v346_v13 = vpop.f32.mrf.mxu0 }
  0xe1   : > { %v465_v17 = vpop.f32.mrf.mxu1  ;;  %v450_v25 = vadd.f32 %v449_v9, %v346_v13 }
  0xe2   : > { %v1127_v14 = vpop.f32.mrf.mxu0 }
  0xe3   : > { %v1141_v21 = vpop.f32.mrf.mxu1  ;;  %v461_v28 = vadd.f32 %v1137_v10, %v1127_v14 }
  0xe4   : > { %v349_v16 = vpop.f32.mrf.mxu0 }
  0xe5   : > { %v468_v18 = vpop.f32.mrf.mxu1  ;;  %v453_v32 = vadd.f32 %v452_v12, %v349_v16 }
  0xe8   : > { %v1130_v19 = vpop.f32.mrf.mxu0 }
  0xe9   : > { %v474_v42 = vadd.f32 %v1140_v15, %v1130_v19 }
  0xea   : > { %v362_v20 = vpop.f32.mrf.mxu0 }
  0xeb   : > { %v466_v47 = vadd.f32 %v465_v17, %v362_v20 }
  0xec   : > { %v1131_v22 = vpop.f32.mrf.mxu0 }
  0xed   : > { %v477_v54 = vadd.f32 %v1141_v21, %v1131_v22 }
  0xee   : > { %v365_v23 = vpop.f32.mrf.mxu0 }
  0xef   : > { %v469_v63 = vadd.f32 %v468_v18, %v365_v23 }
  0xf0   : > { %v1146_v24 = vpop.f32.mrf.mxu0 }
  0xf1   : > { %v605_v26 = vadd.f32 %v1146_v24, %v458_v33 }
  0xf2   : > { %v572_v27 = vpop.f32.mrf.mxu0 }
  0xf3   : > { %v1156_v29 = vpop.f32.mrf.mxu1  ;;  %v603_v30 = vadd.f32 %v572_v27, %v450_v25 }
  0xf4   : > { %v823_v31 = vadd.f32 %v1156_v29, %v605_v26  ;;  %v1147_v2 = vpop.f32.mrf.mxu0 }
  0xf5   : > { %v790_v34 = vpop.f32.mrf.mxu1  ;;  %v606_v35 = vadd.f32 %v1147_v2, %v461_v28 }
  0xf6   : > { %832 = vst.msk [vmem:[#allocation2 + $0x10] sm:$0xff] %vm829_vm4, %v823_v31  ;;  %v821_v36 = vadd.f32 %v790_v34, %v603_v30  ;;  %v575_v37 = vpop.f32.mrf.mxu0  ;;  %v862_v49 = vmul.f32 %v823_v31, %v823_v31  ;;  %v841_v57 = vsel %vm829_vm4, %v823_v31, 0.0 }
  0xf7   : > { %v1157_v38 = vpop.f32.mrf.mxu1  ;;  %v604_v39 = vadd.f32 %v575_v37, %v453_v32 }
  0xf8   : > { %830 = vst.msk [vmem:[#allocation2] sm:$0xff] %vm829_vm4, %v821_v36  ;;  %v824_v40 = vadd.f32 %v1157_v38, %v606_v35  ;;  %v1150_v41 = vpop.f32.mrf.mxu0  ;;  %v860_v44 = vmul.f32 %v821_v36, %v821_v36  ;;  %v838_v50 = vsel %vm829_vm4, %v821_v36, 0.0  ;;  %v871_v5 = vsel %vm829_vm4, %v862_v49, 0.0 }
  0xf9   : > { %v793_v43 = vpop.f32.mrf.mxu1  ;;  %v609_v48 = vadd.f32 %v1150_v41, %v474_v42 }
  0xfa   : > { %833 = vst.msk [vmem:[#allocation2 + $0x18] sm:$0xff] %vm829_vm4, %v824_v40  ;;  %v822_v45 = vadd.f32 %v793_v43, %v604_v39  ;;  %v588_v46 = vpop.f32.mrf.mxu0  ;;  %v868_v58 = vsel %vm829_vm4, %v860_v44, 0.0  ;;  %v863_v59 = vmul.f32 %v824_v40, %v824_v40  ;;  %v843_v7 = vsel %vm829_vm4, %v824_v40, 0.0 }
  0xfb   : > { %v607_v56 = vadd.f32 %v588_v46, %v466_v47 }
  0xfc   : > { %831 = vst.msk [vmem:[#allocation2 + $0x8] sm:$0xff] %vm829_vm4, %v822_v45  ;;  %v839_v51 = vsel %vm829_vm4, %v822_v45, 0.0  ;;  %v861_v52 = vmul.f32 %v822_v45, %v822_v45  ;;  %v1151_v53 = vpop.f32.mrf.mxu0  ;;  %v873_v11 = vsel %vm829_vm4, %v863_v59, 0.0 }
  0xfd   : > { %v840_v55 = vadd.f32 %v839_v51, %v838_v50  ;;  %v610_v6 = vadd.f32 %v1151_v53, %v477_v54 }
  0xfe   : > { %v1160_v60 = vpop.f32.mrf.mxu1  ;;  %v869_v61 = vsel %vm829_vm4, %v861_v52, 0.0  ;;  %v591_v62 = vpop.f32.mrf.mxu0 }
  0xff   : > { %v842_v0 = vadd.f32 %v841_v57, %v840_v55  ;;  %v870_v1 = vadd.f32 %v869_v61, %v868_v58  ;;  %v827_v4 = vadd.f32 %v1160_v60, %v609_v48  ;;  %v608_v10 = vadd.f32 %v591_v62, %v469_v63  ;;  %v899_v55 = vld [vmem:[#allocation2 + $0x10] sm:$0xff] }
 0x100   : > { %v806_v3 = vpop.f32.mrf.mxu1 }
 0x101   : > { %v872_v8 = vadd.f32 %v871_v5, %v870_v1  ;;  %836 = vst.msk [vmem:[#allocation2 + $0x30] sm:$0xff] %vm829_vm4, %v827_v4  ;;  %v825_v9 = vadd.f32 %v806_v3, %v607_v56  ;;  %v844_v13 = vadd.f32 %v843_v7, %v842_v0  ;;  %v866_v33 = vmul.f32 %v827_v4, %v827_v4  ;;  %v897_v56 = vld [vmem:[#allocation2] sm:$0xff]  ;;  %v900_v57 = vld [vmem:[#allocation2 + $0x18] sm:$0xff] }
 0x102   : > { %v1161_v12 = vpop.f32.mrf.mxu1  ;;  %v849_v26 = vsel %vm829_vm4, %v827_v4, 0.0 }
 0x103   : > { %834 = vst.msk [vmem:[#allocation2 + $0x20] sm:$0xff] %vm829_vm4, %v825_v9  ;;  %v845_v14 = vsel %vm829_vm4, %v825_v9, 0.0  ;;  %v864_v15 = vmul.f32 %v825_v9, %v825_v9  ;;  %v874_v16 = vadd.f32 %v873_v11, %v872_v8  ;;  %v828_v20 = vadd.f32 %v1161_v12, %v610_v6  ;;  %v898_v58 = vld [vmem:[#allocation2 + $0x8] sm:$0xff] }
 0x104   : > { %v846_v17 = vadd.f32 %v845_v14, %v844_v13  ;;  %v809_v19 = vpop.f32.mrf.mxu1  ;;  %v879_v31 = vsel %vm829_vm4, %v866_v33, 0.0 }
 0x105   : > { %v875_v21 = vsel %vm829_vm4, %v864_v15, 0.0  ;;  %v826_v22 = vadd.f32 %v809_v19, %v608_v10  ;;  %837 = vst.msk [vmem:[#allocation2 + $0x38] sm:$0xff] %vm829_vm4, %v828_v20  ;;  %v867_v27 = vmul.f32 %v828_v20, %v828_v20  ;;  %v851_v2 = vsel %vm829_vm4, %v828_v20, 0.0 }
 0x106   : > { %v876_v23 = vadd.f32 %v875_v21, %v874_v16 }
 0x107   : > { %835 = vst.msk [vmem:[#allocation2 + $0x28] sm:$0xff] %vm829_vm4, %v826_v22  ;;  %v847_v18 = vsel %vm829_vm4, %v826_v22, 0.0  ;;  %v865_v24 = vmul.f32 %v826_v22, %v826_v22  ;;  %v881_v35 = vsel %vm829_vm4, %v867_v27, 0.0 }
 0x108   : > { %v848_v25 = vadd.f32 %v847_v18, %v846_v17  ;;  %v903_v59 = vld [vmem:[#allocation2 + $0x30] sm:$0xff] }
 0x109   : > { %v877_v28 = vsel %vm829_vm4, %v865_v24, 0.0 }
 0x10a   : > { %v850_v29 = vadd.f32 %v849_v26, %v848_v25  ;;  %v878_v30 = vadd.f32 %v877_v28, %v876_v23  ;;  %v901_v60 = vld [vmem:[#allocation2 + $0x20] sm:$0xff] }
 0x10c   : > { %v852_v32 = vadd.f32 %v851_v2, %v850_v29  ;;  %v880_v34 = vadd.f32 %v879_v31, %v878_v30  ;;  %v904_v61 = vld [vmem:[#allocation2 + $0x38] sm:$0xff] }
 0x10e   : > { %v853_v36 = vrot.slane %v852_v32, 4  ;;  %v882_v37 = vadd.f32 %v881_v35, %v880_v34  ;;  %v902_v62 = vld [vmem:[#allocation2 + $0x28] sm:$0xff] }
 0x110   : > { %v854_v38 = vadd.f32 %v853_v36, %v852_v32  ;;  %v883_v39 = vrot.slane %v882_v37, 4 }
 0x112   : > { %v855_v40 = vrot.slane %v854_v38, 2  ;;  %v884_v41 = vadd.f32 %v883_v39, %v882_v37 }
 0x114   : > { %v856_v42 = vadd.f32 %v855_v40, %v854_v38  ;;  %v885_v43 = vrot.slane %v884_v41, 2 }
 0x116   : > { %v857_v44 = vrot.slane %v856_v42, 1  ;;  %v886_v45 = vadd.f32 %v885_v43, %v884_v41 }
 0x118   : > { %v858_v46 = vadd.f32 %v857_v44, %v856_v42  ;;  %v887_v47 = vrot.slane %v886_v45, 1 }
 0x11a   : > { %v888_v48 = vadd.f32 %v887_v47, %v886_v45  ;;  %v890_v49 = vmul.f32 0.015625, %v858_v46 }
 0x11c   : > { %v891_v50 = vmul.f32 0.015625, %v888_v48  ;;  %v892_v51 = vmul.f32 %v890_v49, %v890_v49  ;;  %v905_v63 = vsub.f32 %v897_v56, %v890_v49  ;;  %v906_v0 = vsub.f32 %v898_v58, %v890_v49 }
 0x11d   : > { %v907_v1 = vsub.f32 %v899_v55, %v890_v49  ;;  %v908_v4 = vsub.f32 %v900_v57, %v890_v49  ;;  %v909_v3 = vsub.f32 %v901_v60, %v890_v49  ;;  %v910_v6 = vsub.f32 %v902_v62, %v890_v49 }
 0x11e   : > { %v893_v52 = vsub.f32 %v891_v50, %v892_v51  ;;  %v911_v7 = vsub.f32 %v903_v59, %v890_v49  ;;  %v912_v8 = vsub.f32 %v904_v61, %v890_v49 }
 0x120   : > { %v894_v53 = vmax.f32 %v893_v52, 0.0 }
 0x122   : > { %v895_v54 = vadd.f32 1e-05, %v894_v53 }
 0x124   : > { %1183 = vrsqrt.f32 %v895_v54 }
 0x131   : > { %v1184_v5 = vpop.eup %1183 }
 0x132   : > { %v913_v9 = vmul.f32 %v1184_v5, %v905_v63  ;;  %v914_v10 = vmul.f32 %v1184_v5, %v906_v0  ;;  %v915_v11 = vmul.f32 %v1184_v5, %v907_v1  ;;  %v916_v12 = vmul.f32 %v1184_v5, %v908_v4 }
 0x133   : > { %v917_v13 = vmul.f32 %v1184_v5, %v909_v3  ;;  %v918_v14 = vmul.f32 %v1184_v5, %v910_v6  ;;  %v919_v15 = vmul.f32 %v1184_v5, %v911_v7  ;;  %v920_v16 = vmul.f32 %v1184_v5, %v912_v8 }
 0x134   : > { %v1094_v17 = vpack.c.bf16 %v913_v9, %v913_v9  ;;  %v1095_v19 = vpack.c.bf16 %v914_v10, %v914_v10  ;;  %v1096_v20 = vpack.c.bf16 %v915_v11, %v915_v11  ;;  %v1097_v21 = vpack.c.bf16 %v916_v12, %v916_v12 }
 0x135   : > { %v1098_v22 = vpack.c.bf16 %v917_v13, %v917_v13  ;;  %v1099_v23 = vpack.c.bf16 %v918_v14, %v918_v14  ;;  %v1100_v33 = vpack.c.bf16 %v919_v15, %v919_v15  ;;  %v1101_v18 = vpack.c.bf16 %v920_v16, %v920_v16 }
 0x136   : > { %954 = vst.msk [vmem:[%s143_s26] sm:$0xf] %vm953_vm5, %v1094_v17  ;;  %955 = vst.msk [vmem:[%s143_s26 + $0x4] sm:$0xf] %vm953_vm5, %v1095_v19 }
 0x137   : > { %956 = vst.msk [vmem:[%s143_s26 + $0x8] sm:$0xf] %vm953_vm5, %v1096_v20  ;;  %957 = vst.msk [vmem:[%s143_s26 + $0xc] sm:$0xf] %vm953_vm5, %v1097_v21 }
 0x138   : > { %958 = vst.msk [vmem:[%s143_s26 + $0x10] sm:$0xf] %vm953_vm5, %v1098_v22  ;;  %959 = vst.msk [vmem:[%s143_s26 + $0x14] sm:$0xf] %vm953_vm5, %v1099_v23 }
 0x139   : > { %960 = vst.msk [vmem:[%s143_s26 + $0x18] sm:$0xf] %vm953_vm5, %v1100_v33  ;;  %961 = vst.msk [vmem:[%s143_s26 + $0x1c] sm:$0xf] %vm953_vm5, %v1101_v18 }
 0x13a PF: > { %s12_s9 = sadd.s32 1, %s1191_s9  }
 0x13b   : > { %p9_p4 = scmp.ge.s32.totalorder %s12_s9, 4  }
 0x13d   :  { %11 = sbr.rel (!%p9_p4) target bundleno = 1 (0x1), region = 62 }

// kernel: unet_encoder2_forward.4
= control target key start
LH: loop header
LB: loop body
LE: loop exit
PB: predicated region body
PF: predicated region fallthrough
CT: control target
= control target key end

     0   :  { %s904_s9 = smov 0   ;;  %s1043_s0 = inlined_call_operand.vmem [shape: bf16[2,5,5,32], index: 0, kind: input, shape index: {}]   ;;  %s1044_s1 = inlined_call_operand.vmem [shape: bf16[4,32,16], index: 1, kind: input, shape index: {}]   ;;  %s1045_s2 = inlined_call_operand.vmem [shape: bf16[2,16,16], index: 2, kind: output, shape index: {}]  }
   0x1 LB: > { %s765_s10 = sadd.s32 4294967295, %s884_s9   ;;  %p769_p0 = scmp.ge.s32.totalorder %s884_s9, 1  ;;  %s884_s9 = sphi %s904_s9, %s12_s9  }
   0x2   : > { %p112_p1 = scmp.lt.s32.totalorder %s884_s9, 3 }
   0x4   : > { %p113_p2 = pnand %p769_p0, %p112_p1 }
   0x5   : > { %p134_p3 = scmp.lt.s32.totalorder (!%p113_p2), %s765_s10, 1 }
   0x6   : > { %116 = sbr.rel (%p113_p2) target bundleno = 297 (0x129), region = 28 }
   0xb   : > { %v864_v0 = vld [vmem:[%s1044_s1 + $0x8] sm:$0xff]   ;;  %v886_v1 = vmov 0.0   ;;  %v865_v2 = vld [vmem:[%s1044_s1 + $0x18] sm:$0xff]   ;;  %v160_v3 = vlaneseq  ;;  %v866_v4 = vld [vmem:[%s1044_s1] sm:$0xff]   ;;  %vm887_vm0 = vmmov 0   ;;  %s1049_s10 = smov (!%p134_p3, %s765_s10), 1 }
   0xc   : > { %828 = vmatprep.subr.bf16.mxu1 %v886_v1  ;;  %820 = vmatprep.subr.bf16.mxu0 %v886_v1  ;;  %v867_v5 = vld [vmem:[%s1044_s1 + $0x10] sm:$0xff]   ;;  %v888_v6 = vmov 1983009808   ;;  %s852_s19 = smul.u32 20, %s1049_s10  ;;  %vm189_vm1 = vsmask.f32 1280 }
   0xd   : > { %829 = vmatpush3.bf16.msra.mxu1 %v864_v0  ;;  %832 = vmatprep.mubr.msk.bf16.mxu1 %vm887_vm0, %v886_v1  ;;  %v158_v7 = vunpack.c.l.s4 %v888_v6  ;;  %v161_v8 = vshrl.u32 %v160_v3, 7  ;;  %vm190_vm2 = vsmask.f32 3336  ;;  %vm286_vm3 = vcmask 261120   ;;  %v870_v44 = vld [vmem:[%s1044_s1 + $0x38] sm:$0xff]   ;;  %v872_v3 = vld [vmem:[%s1044_s1 + $0x30] sm:$0xff]  }
   0xe   : > { %821 = vmatpush3.bf16.msra.mxu0 %v865_v2  ;;  %830 = vmatprep.subr.bf16.mxu1 %v886_v1  ;;  %s939_s22 = scalar_lea.vmem %s1043_s0, %s852_s19  ;;  %vm192_vm4 = vsmask.f32 5392  ;;  %vm194_vm5 = vsmask.f32 7448  ;;  %vm191_vm6 = vmor %vm189_vm1, %vm190_vm2  ;;  %vm661_vm9 = vcmask 130048   ;;  %s805_s3 = sshll.u32 %s1049_s10, 3 }
   0xf   : > { %822 = vmatprep.subr.bf16.mxu0 %v886_v1  ;;  %824 = vmatprep.mubr.msk.bf16.mxu0 %vm887_vm0, %v886_v1  ;;  %v159_v9 = vunpack.c.0.s8 %v158_v7  ;;  %v145_v10 = vld [vmem:[%s939_s22] sm:$0x7]  ;;  %v146_v11 = vld [vmem:[%s939_s22 + $0x4] sm:$0x7]  ;;  %v147_v12 = vld [vmem:[%s939_s22 + $0x8] sm:$0x7]  ;;  %s143_s6 = scalar_lea.vmem %s1045_s2, %s805_s3 }
  0x10   : > { %v148_v14 = vld [vmem:[%s939_s22 + $0xc] sm:$0x7]  ;;  %v331_v15 = vcombine.low %v145_v10, %v146_v11  ;;  %v953_v20 = vld [vmem:[%s939_s22 + $0x4] sm:$0x7]  ;;  %vm193_vm7 = vmor %vm191_vm6, %vm192_vm4  ;;  %vm707_vm10 = vcmask 125952  }
  0x11   : > { %831 = vmatpush3.bf16.msra.mxu1 %v866_v4  ;;  %v945_v13 = vsub.s32 %v159_v9, %v161_v8  ;;  %v332_v21 = vcombine.low %v147_v12, %v148_v14  ;;  %v968_v53 = vld [vmem:[%s939_s22 + $0x8] sm:$0x7]  ;;  %vm971_vm8 = vmor %vm193_vm7, %vm194_vm5  ;;  %v976_v59 = vld [vmem:[%s939_s22 + $0xc] sm:$0x7] }
  0x12   : > { %823 = vmatpush3.bf16.msra.mxu0 %v867_v5  ;;  %844 = vmatprep.subr.bf16.mxu1 %v886_v1  ;;  %v980_v0 = vld [vmem:[%s939_s22 + $0x10] sm:$0x7] }
  0x13   : > { %836 = vmatprep.subr.bf16.mxu0 %v886_v1  ;;  %v163_v16 = vrot.slane %v145_v10, %v945_v13  ;;  %v171_v17 = vrot.slane %v146_v11, %v945_v13  ;;  %v179_v18 = vrot.slane %v147_v12, %v945_v13  ;;  %v187_v19 = vrot.slane %v148_v14, %v945_v13 }
  0x14   : > { %v339_v22 = vrot.slane %v331_v15, %v945_v13  ;;  %v958_v23 = vrot.slane %v953_v20, %v945_v13  ;;  %v346_v40 = vrot.slane %v332_v21, %v945_v13  ;;  %v507_v5 = vrot.slane %v968_v53, %v945_v13 }
  0x15   : > { %v197_v24 = vshrl.u32 %v163_v16, 16  ;;  %v200_v25 = vshll.u32 %v163_v16, 16  ;;  %v211_v26 = vshrl.u32 %v171_v17, 16  ;;  %v214_v27 = vshll.u32 %v171_v17, 16 }
  0x16   : > { %v225_v28 = vshrl.u32 %v179_v18, 16  ;;  %v228_v29 = vshll.u32 %v179_v18, 16  ;;  %v239_v30 = vshrl.u32 %v187_v19, 16  ;;  %v242_v31 = vshll.u32 %v187_v19, 16 }
  0x17   : > { %v199_v32 = vrot.slane %v197_v24, 6  ;;  %v202_v33 = vrot.slane %v200_v25, 7  ;;  %v213_v34 = vrot.slane %v211_v26, 6  ;;  %v216_v35 = vrot.slane %v214_v27, 7 }
  0x18   : > { %v227_v36 = vrot.slane %v225_v28, 6  ;;  %v230_v37 = vrot.slane %v228_v29, 7  ;;  %v241_v38 = vrot.slane %v239_v30, 6  ;;  %v244_v39 = vrot.slane %v242_v31, 7 }
  0x19   : > { %v164_v41 = vcombine.high %v163_v16, %v163_v16  ;;  %v172_v42 = vcombine.high %v171_v17, %v171_v17  ;;  %v180_v43 = vcombine.high %v179_v18, %v179_v18  ;;  %v188_v45 = vcombine.high %v187_v19, %v187_v19 }
  0x1a   : > { %v203_v46 = vor.u32 %v202_v33, %v199_v32  ;;  %v217_v47 = vor.u32 %v216_v35, %v213_v34  ;;  %v231_v48 = vor.u32 %v230_v37, %v227_v36  ;;  %v347_v49 = vcombine.low %v339_v22, %v346_v40 }
  0x1b   : > { %v206_v50 = vshll.u32 %v164_v41, 16  ;;  %v220_v51 = vshll.u32 %v172_v42, 16  ;;  %v234_v52 = vshll.u32 %v180_v43, 16  ;;  %v245_v58 = vor.u32 %v244_v39, %v241_v38 }
  0x1c   : > { %v204_v55 = vrot.slane %v203_v46, 2  ;;  %v218_v56 = vrot.slane %v217_v47, 2  ;;  %v232_v57 = vrot.slane %v231_v48, 2  ;;  %833 = vmatmul.mubr.msk.bf16.vlgmr.msra.gmra.mxu1 %vm286_vm3, %v347_v49  ;;  %v248_v63 = vshll.u32 %v188_v45, 16  ;;  %v873_v49 = vld [vmem:[%s1044_s1 + $0x20] sm:$0xff]  }
  0x1d   : > { %v208_v60 = vrot.slane %v206_v50, 7  ;;  %v222_v61 = vrot.slane %v220_v51, 7  ;;  %v236_v62 = vrot.slane %v234_v52, 7  ;;  %845 = vmatpush3.bf16.msra.mxu1 %v870_v44  ;;  %v246_v2 = vrot.slane %v245_v58, 2  ;;  %848 = vmatprep.mubr.msk.bf16.mxu1 %vm887_vm0, %v886_v1 }
  0x1e   : > { %v500_v4 = vcombine.high %v958_v23, %v958_v23  ;;  %v250_v9 = vrot.slane %v248_v63, 7  ;;  %846 = vmatprep.subr.bf16.mxu1 %v886_v1  ;;  %v508_v11 = vcombine.high %v507_v5, %v507_v5  ;;  %v515_v12 = vrot.slane %v976_v59, %v945_v13 }
  0x1f   : > { %v209_v6 = vsel %vm971_vm8, %v204_v55, %v208_v60  ;;  %v223_v7 = vsel %vm971_vm8, %v218_v56, %v222_v61  ;;  %v237_v8 = vsel %vm971_vm8, %v232_v57, %v236_v62  ;;  %v523_v14 = vrot.slane %v980_v0, %v945_v13 }
  0x20   : > { %v257_v10 = vcombine.low %v209_v6, %v223_v7  ;;  %v251_v15 = vsel %vm971_vm8, %v246_v2, %v250_v9  ;;  %v526_v16 = vshrl.u32 %v958_v23, 16  ;;  %v529_v17 = vshll.u32 %v958_v23, 16  ;;  %v871_v23 = vld [vmem:[%s1044_s1 + $0x28] sm:$0xff]  }
  0x21   : > { %v535_v18 = vshll.u32 %v500_v4, 16  ;;  %v258_v19 = vcombine.low %v237_v8, %v251_v15  ;;  %847 = vmatpush3.bf16.msra.mxu1 %v872_v3  ;;  %v516_v22 = vcombine.high %v515_v12, %v515_v12  ;;  %v540_v24 = vshrl.u32 %v507_v5, 16 }
  0x22   : > { %v265_v21 = vrot.slane %v257_v10, %v945_v13  ;;  %v524_v25 = vcombine.high %v523_v14, %v523_v14  ;;  %v528_v26 = vrot.slane %v526_v16, 6  ;;  %v531_v27 = vrot.slane %v529_v17, 7 }
  0x23   : > { %v543_v28 = vshll.u32 %v507_v5, 16  ;;  %v272_v29 = vrot.slane %v258_v19, %v945_v13  ;;  %v542_v30 = vrot.slane %v540_v24, 6  ;;  %v549_v31 = vshll.u32 %v508_v11, 16 }
  0x24   : > { %v554_v32 = vshrl.u32 %v515_v12, 16  ;;  %v532_v33 = vor.u32 %v531_v27, %v528_v26  ;;  %v537_v34 = vrot.slane %v535_v18, 7  ;;  %v557_v36 = vshll.u32 %v515_v12, 16 }
  0x25   : > { %v545_v35 = vrot.slane %v543_v28, 7  ;;  %v273_v37 = vcombine.low %v265_v21, %v272_v29  ;;  %v563_v39 = vshll.u32 %v516_v22, 16  ;;  %v568_v40 = vshrl.u32 %v523_v14, 16 }
  0x26   : > { %v556_v38 = vrot.slane %v554_v32, 6  ;;  %v533_v41 = vrot.slane %v532_v33, 2  ;;  %v551_v43 = vrot.slane %v549_v31, 7  ;;  %v559_v44 = vrot.slane %v557_v36, 7 }
  0x27   : > { %v546_v42 = vor.u32 %v545_v35, %v542_v30  ;;  %825 = vmatmul.mubr.msk.bf16.vlgmr.msra.gmra.mxu0 %vm286_vm3, %v273_v37  ;;  %v570_v45 = vrot.slane %v568_v40, 6  ;;  %v571_v46 = vshll.u32 %v523_v14, 16  ;;  %v577_v47 = vshll.u32 %v524_v25, 16 }
  0x28   : > { %v418_v48 = vcombine.low %v953_v20, %v968_v53  ;;  %837 = vmatpush3.bf16.msra.mxu0 %v871_v23  ;;  %v560_v51 = vor.u32 %v559_v44, %v556_v38  ;;  %840 = vmatprep.mubr.msk.bf16.mxu0 %vm887_vm0, %v886_v1  ;;  %v419_v52 = vcombine.low %v976_v59, %v980_v0  ;;  %v565_v56 = vrot.slane %v563_v39, 7 }
  0x29   : > { %v547_v50 = vrot.slane %v546_v42, 2  ;;  %838 = vmatprep.subr.bf16.mxu0 %v886_v1  ;;  %v538_v55 = vsel %vm971_vm8, %v533_v41, %v537_v34  ;;  %v573_v20 = vrot.slane %v571_v46, 7  ;;  %v579_v62 = vrot.slane %v577_v47, 7 }
  0x2a   : > { %v426_v53 = vrot.slane %v418_v48, %v945_v13  ;;  %v561_v58 = vrot.slane %v560_v51, 2  ;;  %v433_v60 = vrot.slane %v419_v52, %v945_v13 }
  0x2b   : > { %v552_v57 = vsel %vm971_vm8, %v547_v50, %v551_v43  ;;  %v574_v61 = vor.u32 %v573_v20, %v570_v45 }
  0x2c   : > { %839 = vmatpush3.bf16.msra.mxu0 %v873_v49  ;;  %v586_v63 = vcombine.low %v538_v55, %v552_v57  ;;  %v434_v59 = vcombine.low %v426_v53, %v433_v60  ;;  %v566_v1 = vsel %vm971_vm8, %v561_v58, %v565_v56 }
  0x2d   : > { %v575_v0 = vrot.slane %v574_v61, 2 }
  0x2e   : > { %v594_v4 = vrot.slane %v586_v63, %v945_v13 }
  0x2f   : > { %v580_v2 = vsel %vm971_vm8, %v575_v0, %v579_v62  ;;  %841 = vmatmul.mubr.msk.bf16.vlgmr.msra.gmra.mxu0 %vm286_vm3, %v434_v59 }
  0x30   : > { %v587_v3 = vcombine.low %v566_v1, %v580_v2 }
  0x32   : > { %v601_v5 = vrot.slane %v587_v3, %v945_v13 }
  0x34   : > { %v602_v6 = vcombine.low %v594_v4, %v601_v5 }
  0x36   : > { %849 = vmatmul.mubr.msk.bf16.vlgmr.msra.gmra.mxu1 %vm286_vm3, %v602_v6 }
  0xdc   : > { %v397_v7 = vpop.f32.mrf.mxu1 }
  0xde   : > { %v834_v8 = vpop.f32.mrf.mxu1 }
  0xe0   : > { %v400_v9 = vpop.f32.mrf.mxu1 }
  0xe2   : > { %v835_v10 = vpop.f32.mrf.mxu1 }
  0xe7   : > { %v324_v11 = vpop.f32.mrf.mxu0 }
  0xe8   : > { %v398_v16 = vadd.f32 %v397_v7, %v324_v11 }
  0xe9   : > { %v826_v12 = vpop.f32.mrf.mxu0 }
  0xeb   : > { %v327_v14 = vpop.f32.mrf.mxu0 }
  0xec   : > { %v401_v21 = vadd.f32 %v400_v9, %v327_v14 }
  0xed   : > { %v827_v15 = vpop.f32.mrf.mxu0 }
  0xef   : > { %v484_v54 = vpop.f32.mrf.mxu0 }
  0xf0   : > { %v491_v18 = vadd.f32 %v484_v54, %v398_v16 }
  0xf1   : > { %v842_v17 = vpop.f32.mrf.mxu0 }
  0xf3   : > { %v487_v19 = vpop.f32.mrf.mxu0 }
  0xf4   : > { %v492_v25 = vadd.f32 %v487_v19, %v401_v21 }
  0xf5   : > { %v843_v22 = vpop.f32.mrf.mxu0 }
  0xf6   : > { %v652_v24 = vpop.f32.mrf.mxu1 }
  0xf7   : > { %v659_v13 = vadd.f32 %v652_v24, %v491_v18 }
  0xf8   : > { %v850_v26 = vpop.f32.mrf.mxu1 }
  0xf9   : > { %662 = vst.msk [vmem:[#allocation2] sm:$0xff] %vm661_vm9, %v659_v13  ;;  %v674_v28 = vmul.f32 %v659_v13, %v659_v13  ;;  %v664_v31 = vsel %vm661_vm9, %v659_v13, 0.0 }
  0xfa   : > { %v655_v27 = vpop.f32.mrf.mxu1 }
  0xfb   : > { %v660_v29 = vadd.f32 %v655_v27, %v492_v25  ;;  %v676_v34 = vsel %vm661_vm9, %v674_v28, 0.0 }
  0xfc   : > { %v851_v30 = vpop.f32.mrf.mxu1 }
  0xfd   : > { %663 = vst.msk [vmem:[#allocation2 + $0x8] sm:$0xff] %vm661_vm9, %v660_v29  ;;  %v665_v32 = vsel %vm661_vm9, %v660_v29, 0.0  ;;  %v675_v23 = vmul.f32 %v660_v29, %v660_v29 }
  0xfe   : > { %v666_v33 = vadd.f32 %v665_v32, %v664_v31 }
  0xff   : > { %v677_v35 = vsel %vm661_vm9, %v675_v23, 0.0 }
 0x100   : > { %v667_v36 = vrot.slane %v666_v33, 4  ;;  %v678_v37 = vadd.f32 %v677_v35, %v676_v34  ;;  %v693_v20 = vld [vmem:[#allocation2] sm:$0xff] }
 0x102   : > { %v668_v38 = vadd.f32 %v667_v36, %v666_v33  ;;  %v679_v39 = vrot.slane %v678_v37, 4 }
 0x104   : > { %v669_v40 = vrot.slane %v668_v38, 2  ;;  %v680_v41 = vadd.f32 %v679_v39, %v678_v37  ;;  %v694_v53 = vld [vmem:[#allocation2 + $0x8] sm:$0xff] }
 0x106   : > { %v670_v42 = vadd.f32 %v669_v40, %v668_v38  ;;  %v681_v43 = vrot.slane %v680_v41, 2 }
 0x108   : > { %v671_v44 = vrot.slane %v670_v42, 1  ;;  %v682_v45 = vadd.f32 %v681_v43, %v680_v41 }
 0x10a   : > { %v672_v46 = vadd.f32 %v671_v44, %v670_v42  ;;  %v683_v47 = vrot.slane %v682_v45, 1 }
 0x10c   : > { %v684_v48 = vadd.f32 %v683_v47, %v682_v45  ;;  %v686_v49 = vmul.f32 0.0625, %v672_v46 }
 0x10e   : > { %v687_v50 = vmul.f32 0.0625, %v684_v48  ;;  %v688_v51 = vmul.f32 %v686_v49, %v686_v49  ;;  %v695_v57 = vsub.f32 %v693_v20, %v686_v49  ;;  %v696_v58 = vsub.f32 %v694_v53, %v686_v49 }
 0x110   : > { %v689_v52 = vsub.f32 %v687_v50, %v688_v51 }
 0x112   : > { %v690_v55 = vmax.f32 %v689_v52, 0.0 }
 0x114   : > { %v691_v56 = vadd.f32 1e-05, %v690_v55 }
 0x116   : > { %876 = vrsqrt.f32 %v691_v56 }
 0x123   : > { %v877_v60 = vpop.eup %876 }
 0x124   : > { %v697_v61 = vmul.f32 %v877_v60, %v695_v57  ;;  %v698_v62 = vmul.f32 %v877_v60, %v696_v58 }
 0x126   : > { %v806_v63 = vpack.c.bf16 %v697_v61, %v697_v61  ;;  %v807_v59 = vpack.c.bf16 %v698_v62, %v698_v62 }
 0x128   : > { %708 = vst.msk [vmem:[%s143_s6] sm:$0xf] %vm707_vm10, %v806_v63  ;;  %709 = vst.msk [vmem:[%s143_s6 + $0x4] sm:$0xf] %vm707_vm10, %v807_v59 }
 0x129 PF: > { %s12_s9 = sadd.s32 1, %s884_s9  }
 0x12a   : > { %p9_p4 = scmp.ge.s32.totalorder %s12_s9, 4  }
 0x12c   :  { %11 = sbr.rel (!%p9_p4) target bundleno = 1 (0x1), region = 62 }

// kernel: unet_encoder2_forward.5
= control target key start
LH: loop header
LB: loop body
LE: loop exit
PB: predicated region body
PF: predicated region fallthrough
CT: control target
= control target key end

     0   :  { %s2896_s12 = smov 0   ;;  %s3618_s0 = inlined_call_operand.vmem [shape: bf16[2,4,4,16], index: 0, kind: input, shape index: {}]   ;;  %s3619_s1 = inlined_call_operand.vmem [shape: bf16[9,16,16], index: 1, kind: input, shape index: {}]   ;;  %s3620_s2 = inlined_call_operand.vmem [shape: bf16[9,16,16], index: 2, kind: input, shape index: {}]   ;;  %s3621_s3 = inlined_call_operand.vmem [shape: bf16[2,16,16], index: 3, kind: output, shape index: {}]  }
   0x1 LB: > { %s2555_s13 = sadd.s32 4294967295, %s2870_s12   ;;  %p2559_p0 = scmp.ge.s32.totalorder %s2870_s12, 1  ;;  %s2870_s12 = sphi %s2896_s12, %s13_s12  }
   0x2   : > { %p137_p1 = scmp.lt.s32.totalorder %s2870_s12, 3 }
   0x4   : > { %p138_p2 = pnand %p2559_p0, %p137_p1 }
   0x5   : > { %p2916_p3 = scmp.lt.s32.totalorder (!%p138_p2), %s2555_s13, 1 }
   0x6   : > { %141 = sbr.rel (%p138_p2) target bundleno = 674 (0x2a2), region = 32 }
   0xb   : > { %v2832_v0 = vld [vmem:[%s3619_s1 + $0x8] sm:$0xff]   ;;  %v2872_v1 = vmov 0.0   ;;  %v2833_v2 = vld [vmem:[%s3619_s1] sm:$0xff]   ;;  %v354_v3 = vlaneseq  ;;  %vm2873_vm0 = vmmov 0   ;;  %vm172_vm1 = vcmask 124928   ;;  %s3638_s13 = smov (!%p2916_p3, %s2555_s13), 1 }
   0xc   : > { %2712 = vmatprep.subr.bf16.mxu0 %v2872_v1  ;;  %2718 = vmatprep.subr.bf16.mxu1 %v2872_v1  ;;  %vm176_vm2 = vcmask 122880   ;;  %vm177_vm3 = vsmask.f32 256  ;;  %v2874_v4 = vmov 0   ;;  %v182_v6 = vld [vmem:[#allocation2 + $0x4] sm:$0x1] }
   0xd   : > { %2713 = vmatpush3.bf16.msra.mxu0 %v2832_v0  ;;  %2714 = vmatprep.mubr.msk.bf16.mxu0 %vm2873_vm0, %v2872_v1  ;;  %173 = vst.msk [vmem:[#allocation2] sm:$0x7] %vm172_vm1, %v2874_v4  ;;  %vm2923_vm4 = vmand %vm176_vm2, %vm177_vm3  ;;  %v185_v7 = vld [vmem:[#allocation2 + $0x8] sm:$0x1]  ;;  %vm197_vm5 = vcmask 124930   ;;  %s2668_s19 = sshll.u32 %s3638_s13, 3 }
   0xe   : > { %2719 = vmatpush3.bf16.msra.mxu1 %v2833_v2  ;;  %2720 = vmatprep.mubr.msk.bf16.mxu1 %vm2873_vm0, %v2872_v1  ;;  %175 = vst.msk [vmem:[#allocation2 + $0x14] sm:$0x7] %vm172_vm1, %v2874_v4  ;;  %218 = vst.msk [vmem:[#allocation3] sm:$0x7] %vm172_vm1, %v2874_v4  ;;  %v183_v8 = vsel %vm2923_vm4, 0, %v182_v6  ;;  %v186_v9 = vsel %vm2923_vm4, 0, %v185_v7  ;;  %s2955_s22 = scalar_lea.vmem %s3618_s0, %s2668_s19  ;;  %s170_s6 = scalar_lea.vmem %s3621_s3, %s2668_s19 }
   0xf   : > { %220 = vst.msk [vmem:[#allocation3 + $0x14] sm:$0x7] %vm172_vm1, %v2874_v4  ;;  %2724 = vmatprep.subr.bf16.mxu0 %v2872_v1  ;;  %v188_v10 = vld [vmem:[#allocation2 + $0xc] sm:$0x1]  ;;  %2730 = vmatprep.subr.bf16.mxu1 %v2872_v1  ;;  %184 = vst [vmem:[#allocation2 + $0x4] sm:$0x1] %v183_v8 }
  0x10   : > { %187 = vst [vmem:[#allocation2 + $0x8] sm:$0x1] %v186_v9  ;;  %v189_v11 = vsel %vm2923_vm4, 0, %v188_v10  ;;  %vm198_vm6 = vsmask.f32 7946  ;;  %v355_v16 = vshrl.u32 %v354_v3, 7 }
  0x11   : > { %v203_v12 = vld [vmem:[#allocation2 + $0x4] sm:$0x4]  ;;  %190 = vst [vmem:[#allocation2 + $0xc] sm:$0x1] %v189_v11  ;;  %vm2946_vm7 = vmand %vm197_vm5, %vm198_vm6  ;;  %v206_v14 = vld [vmem:[#allocation2 + $0x8] sm:$0x4] }
  0x12   : > { %v209_v15 = vld [vmem:[#allocation2 + $0xc] sm:$0x4]  ;;  %v204_v17 = vsel %vm2946_vm7, 0, %v203_v12  ;;  %v207_v18 = vsel %vm2946_vm7, 0, %v206_v14  ;;  %vm327_vm8 = vsmask.f32 2306 }
  0x13   : > { %v210_v19 = vsel %vm2946_vm7, 0, %v209_v15  ;;  %205 = vst [vmem:[#allocation2 + $0x4] sm:$0x4] %v204_v17  ;;  %208 = vst [vmem:[#allocation2 + $0x8] sm:$0x4] %v207_v18  ;;  %vm584_vm15 = vcmask 1040384  }
  0x14   : > { %211 = vst [vmem:[#allocation2 + $0xc] sm:$0x4] %v210_v19  ;;  %v2564_v20 = vld.sshfl [vmem:[%s2955_s22] sm:$0x3 pattern:$0x76325410]  ;;  %vm2972_vm9 = vmand %vm172_vm1, %vm327_vm8 }
  0x15   : > { %v2565_v21 = vld.sshfl [vmem:[%s2955_s22 + $0x2] sm:$0x3 pattern:$0x76325410]  ;;  %v294_v22 = vshrl.u32 %v2564_v20, 16  ;;  %v297_v23 = vshll.u32 %v2564_v20, 16 }
  0x16   : > { %v2875_v24 = vmov 1983009808   ;;  %v179_v26 = vld [vmem:[#allocation2] sm:$0x1]  ;;  %v200_v27 = vld [vmem:[#allocation2] sm:$0x4] }
  0x17   : > { %v352_v25 = vunpack.c.l.s4 %v2875_v24  ;;  %v301_v28 = vshrl.u32 %v2565_v21, 16  ;;  %v304_v29 = vshll.u32 %v2565_v21, 16  ;;  %v180_v30 = vsel %vm2923_vm4, 0, %v179_v26  ;;  %v191_v49 = vld [vmem:[#allocation2 + $0x10] sm:$0x1] }
  0x18   : > { %v201_v31 = vsel %vm2946_vm7, 0, %v200_v27  ;;  %v2566_v32 = vld.sshfl [vmem:[%s2955_s22 + $0x4] sm:$0x3 pattern:$0x76325410]  ;;  %v296_v34 = vrot.slane %v294_v22, 7 }
  0x19   : > { %v353_v33 = vunpack.c.0.s8 %v352_v25  ;;  %181 = vst [vmem:[#allocation2] sm:$0x1] %v180_v30  ;;  %202 = vst [vmem:[#allocation2] sm:$0x4] %v201_v31  ;;  %v303_v35 = vrot.slane %v301_v28, 7  ;;  %v308_v36 = vshrl.u32 %v2566_v32, 16 }
  0x1a   : > { %v311_v37 = vshll.u32 %v2566_v32, 16  ;;  %vm383_vm10 = vsmask.f32 1280  ;;  %v299_v39 = vor.u32 %v297_v23, %v296_v34  ;;  %vm384_vm11 = vsmask.f32 3336 }
  0x1b   : > { %v306_v40 = vor.u32 %v304_v29, %v303_v35  ;;  %v310_v41 = vrot.slane %v308_v36, 7  ;;  %v329_v42 = vld [vmem:[#allocation2 + $0x4] sm:$0x7]  ;;  %v332_v43 = vld [vmem:[#allocation2 + $0x8] sm:$0x7]  ;;  %v2976_v45 = vsub.s32 %v353_v33, %v355_v16  ;;  %v192_v52 = vsel %vm2923_vm4, 0, %v191_v49  ;;  %vm385_vm14 = vmor %vm383_vm10, %vm384_vm11 }
  0x1c   : > { %v335_v44 = vld [vmem:[#allocation2 + $0xc] sm:$0x7]  ;;  %v330_v47 = vsel %vm2972_vm9, %v299_v39, %v329_v42  ;;  %vm386_vm12 = vsmask.f32 5392  ;;  %vm388_vm13 = vsmask.f32 7448 }
  0x1d   : > { %v313_v46 = vor.u32 %v311_v37, %v310_v41  ;;  %v333_v48 = vsel %vm2972_vm9, %v306_v40, %v332_v43  ;;  %331 = vst [vmem:[#allocation2 + $0x4] sm:$0x7] %v330_v47  ;;  %v212_v50 = vld [vmem:[#allocation2 + $0x10] sm:$0x4]  ;;  %193 = vst [vmem:[#allocation2 + $0x10] sm:$0x1] %v192_v52 }
  0x1e   : > { %334 = vst [vmem:[#allocation2 + $0x8] sm:$0x7] %v333_v48  ;;  %v213_v53 = vsel %vm2946_vm7, 0, %v212_v50  ;;  %vm585_vm1 = vcmask 1042434   ;;  %vm587_vm2 = vcmask 1044484   ;;  %vm3002_vm3 = vmor %vm385_vm14, %vm386_vm12  ;;  %vm589_vm5 = vcmask 1046534  }
  0x1f   : > { %v336_v51 = vsel %vm2972_vm9, %v313_v46, %v335_v44  ;;  %v2567_v54 = vld.sshfl [vmem:[%s2955_s22 + $0x6] sm:$0x3 pattern:$0x76325410]  ;;  %214 = vst [vmem:[#allocation2 + $0x10] sm:$0x4] %v213_v53  ;;  %vm3008_vm6 = vmor %vm584_vm15, %vm585_vm1 }
  0x20   : > { %337 = vst [vmem:[#allocation2 + $0xc] sm:$0x7] %v336_v51  ;;  %v2989_v55 = vld [vmem:[#allocation2] sm:$0x7]  ;;  %v315_v56 = vshrl.u32 %v2567_v54, 16  ;;  %v318_v58 = vshll.u32 %v2567_v54, 16  ;;  %vm3026_vm8 = vmor %vm3002_vm3, %vm388_vm13 }
  0x21   : > { %v2993_v57 = vrot.slane %v2989_v55, %v2976_v45  ;;  %vm472_vm10 = vcmask 130048   ;;  %vm588_vm11 = vmor %vm3008_vm6, %vm587_vm2 }
  0x22   : > { %v317_v59 = vrot.slane %v315_v56, 7  ;;  %vm3047_vm12 = vmor %vm588_vm11, %vm589_vm5 }
  0x23   : > { %v358_v60 = vcombine.high %v2993_v57, %v2993_v57  ;;  %v391_v61 = vshrl.u32 %v2993_v57, 16  ;;  %v394_v62 = vshll.u32 %v2993_v57, 16  ;;  %v2574_v0 = vrot.slane %v2993_v57, 9  ;;  %v2835_v57 = vld [vmem:[%s3619_s1 + $0x18] sm:$0xff]  }
  0x24   : > { %v342_v2 = vld [vmem:[#allocation2 + $0x4] sm:$0x7]  ;;  %v3012_v8 = vor.u32 %v318_v58, %v317_v59 }
  0x25   : > { %v343_v3 = vld [vmem:[#allocation2 + $0x8] sm:$0x7]  ;;  %v393_v4 = vrot.slane %v391_v61, 6  ;;  %v396_v6 = vrot.slane %v394_v62, 7  ;;  %v365_v9 = vrot.slane %v342_v2, %v2976_v45  ;;  %v400_v11 = vshll.u32 %v358_v60, 16 }
  0x26   : > { %v3016_v10 = vrot.slane %v343_v3, %v2976_v45  ;;  %v517_v12 = vcombine.low %v2989_v55, %v342_v2  ;;  %v3019_v14 = vld [vmem:[#allocation2 + $0x4] sm:$0x7]  ;;  %v3021_v15 = vld [vmem:[#allocation2 + $0x8] sm:$0x7]  ;;  %v593_v19 = vrot.slane %v358_v60, 7 }
  0x27   : > { %v344_v16 = vld [vmem:[#allocation2 + $0xc] sm:$0x7]  ;;  %v397_v18 = vor.u32 %v396_v6, %v393_v4  ;;  %v690_v20 = vcombine.low %v3019_v14, %v3021_v15  ;;  %v3034_v21 = vrot.slane %v3019_v14, %v2976_v45  ;;  %v366_v22 = vcombine.high %v365_v9, %v365_v9  ;;  %v338_v58 = vld [vmem:[#allocation2 + $0x10] sm:$0x7] }
  0x28   : > { %v374_v23 = vcombine.high %v3016_v10, %v3016_v10  ;;  %v381_v24 = vrot.slane %v344_v16, %v2976_v45  ;;  %v402_v25 = vrot.slane %v400_v11, 7  ;;  %v405_v27 = vshrl.u32 %v365_v9, 16  ;;  %v3061_v4 = vld [vmem:[#allocation2 + $0xc] sm:$0x7] }
  0x29   : > { %v398_v26 = vrot.slane %v397_v18, 2  ;;  %v408_v28 = vshll.u32 %v365_v9, 16  ;;  %v419_v29 = vshrl.u32 %v3016_v10, 16  ;;  %v414_v31 = vshll.u32 %v366_v22, 16 }
  0x2a   : > { %v382_v30 = vcombine.high %v381_v24, %v381_v24  ;;  %v422_v32 = vshll.u32 %v3016_v10, 16  ;;  %v428_v33 = vshll.u32 %v374_v23, 16  ;;  %v407_v35 = vrot.slane %v405_v27, 6 }
  0x2b   : > { %v403_v34 = vsel %vm3026_vm8, %v398_v26, %v402_v25  ;;  %v410_v36 = vrot.slane %v408_v28, 7  ;;  %v421_v37 = vrot.slane %v419_v29, 6  ;;  %v416_v40 = vrot.slane %v414_v31, 7 }
  0x2c   : > { %v424_v41 = vrot.slane %v422_v32, 7  ;;  %v430_v42 = vrot.slane %v428_v33, 7  ;;  %v433_v43 = vshrl.u32 %v381_v24, 16  ;;  %v436_v46 = vshll.u32 %v381_v24, 16 }
  0x2d   : > { %v411_v44 = vor.u32 %v410_v36, %v407_v35  ;;  %v442_v47 = vshll.u32 %v382_v30, 16  ;;  %v518_v48 = vcombine.low %v343_v3, %v344_v16  ;;  %v525_v51 = vrot.slane %v517_v12, %v2976_v45 }
  0x2e   : > { %v425_v49 = vor.u32 %v424_v41, %v421_v37  ;;  %v435_v50 = vrot.slane %v433_v43, 6  ;;  %v594_v52 = vsel %vm3047_vm12, %v2574_v0, %v593_v19  ;;  %v438_v54 = vrot.slane %v436_v46, 7  ;;  %v2834_v37 = vld [vmem:[%s3619_s1 + $0x10] sm:$0xff]  }
  0x2f   : > { %v412_v53 = vrot.slane %v411_v44, 2  ;;  %v444_v55 = vrot.slane %v442_v47, 7  ;;  %v532_v56 = vrot.slane %v518_v48, %v2976_v45  ;;  %v2575_v60 = vrot.slane %v365_v9, 9 }
  0x30   : > { %v426_v59 = vrot.slane %v425_v49, 2  ;;  %v597_v61 = vrot.slane %v366_v22, 7  ;;  %v2576_v62 = vrot.slane %v3016_v10, 9  ;;  %v439_v2 = vor.u32 %v438_v54, %v435_v50 }
  0x31   : > { %v417_v63 = vsel %vm3026_vm8, %v412_v53, %v416_v40  ;;  %v533_v0 = vcombine.low %v525_v51, %v532_v56  ;;  %v601_v3 = vrot.slane %v374_v23, 7  ;;  %v2577_v12 = vrot.slane %v381_v24, 9 }
  0x32   : > { %v431_v6 = vsel %vm3026_vm8, %v426_v59, %v430_v42  ;;  %v449_v7 = vcombine.low %v403_v34, %v417_v63  ;;  %v598_v11 = vsel %vm3047_vm12, %v2575_v60, %v597_v61  ;;  %v440_v9 = vrot.slane %v439_v2, 2 }
  0x33   : > { %2721 = vmatmul.mubr.msk.bf16.vlgmr.msra.gmra.mxu1 %vm472_vm10, %v533_v0  ;;  %v602_v10 = vsel %vm3047_vm12, %v2576_v62, %v601_v3  ;;  %v605_v14 = vrot.slane %v382_v30, 7  ;;  %v610_v16 = vcombine.low %v594_v52, %v598_v11  ;;  %v339_v19 = vsel %vm2972_vm9, %v3012_v8, %v338_v58 }
  0x34   : > { %v457_v18 = vrot.slane %v449_v7, %v2976_v45  ;;  %2731 = vmatpush3.bf16.msra.mxu1 %v2835_v57  ;;  %2732 = vmatprep.mubr.msk.bf16.mxu1 %vm2873_vm0, %v2872_v1  ;;  %v3077_v22 = vrot.slane %v690_v20, %v2976_v45  ;;  %v792_v23 = vshrl.u32 %v3034_v21, 16  ;;  %v445_v24 = vsel %vm3026_vm8, %v440_v9, %v444_v55  ;;  %v2839_v7 = vld [vmem:[%s3619_s1 + $0x28] sm:$0xff]  }
  0x35   : > { %v606_v25 = vsel %vm3047_vm12, %v2577_v12, %v605_v14  ;;  %v3085_v26 = vrot.slane %v610_v16, %v2976_v45  ;;  %340 = vst [vmem:[#allocation2 + $0x10] sm:$0x7] %v339_v19  ;;  %v3089_v27 = vrot.slane %v3021_v15, %v2976_v45  ;;  %2742 = vmatprep.subr.bf16.mxu1 %v2872_v1  ;;  %v795_v32 = vshll.u32 %v3034_v21, 16  ;;  %v2838_v16 = vld [vmem:[%s3619_s1 + $0x20] sm:$0xff]  }
  0x36   : > { %v450_v8 = vcombine.low %v431_v6, %v445_v24  ;;  %v611_v20 = vcombine.low %v602_v10, %v606_v25  ;;  %v3094_v28 = vrot.slane %v3061_v4, %v2976_v45  ;;  %v766_v29 = vcombine.high %v3034_v21, %v3034_v21  ;;  %v194_v24 = vld [vmem:[#allocation2 + $0x14] sm:$0x1] }
  0x37   : > { %v774_v30 = vcombine.high %v3089_v27, %v3089_v27  ;;  %v794_v31 = vrot.slane %v792_v23, 6  ;;  %v806_v15 = vshrl.u32 %v3089_v27, 16  ;;  %v797_v40 = vrot.slane %v795_v32, 7  ;;  %v1008_v32 = vld [vmem:[#allocation2 + $0x8] sm:$0x7] }
  0x38   : > { %v464_v33 = vrot.slane %v450_v8, %v2976_v45  ;;  %v625_v34 = vrot.slane %v611_v20, %v2976_v45  ;;  %v3106_v35 = vcombine.high %v3094_v28, %v3094_v28  ;;  %v801_v36 = vshll.u32 %v766_v29, 16  ;;  %v215_v20 = vld [vmem:[#allocation2 + $0x14] sm:$0x4] }
  0x39   : > { %v808_v41 = vrot.slane %v806_v15, 6  ;;  %v809_v42 = vshll.u32 %v3089_v27, 16  ;;  %v815_v43 = vshll.u32 %v774_v30, 16  ;;  %v820_v48 = vshrl.u32 %v3094_v28, 16 }
  0x3a   : > { %v465_v44 = vcombine.low %v457_v18, %v464_v33  ;;  %v626_v46 = vcombine.low %v3085_v26, %v625_v34  ;;  %v803_v47 = vrot.slane %v801_v36, 7  ;;  %v798_v49 = vor.u32 %v797_v40, %v794_v31  ;;  %v1009_v36 = vld [vmem:[#allocation2 + $0xc] sm:$0x7] }
  0x3b   : > { %v811_v50 = vrot.slane %v809_v42, 7  ;;  %v817_v51 = vrot.slane %v815_v43, 7  ;;  %v823_v52 = vshll.u32 %v3094_v28, 16  ;;  %v822_v54 = vrot.slane %v820_v48, 6 }
  0x3c   : > { %2715 = vmatmul.mubr.msk.bf16.vlgmr.msra.gmra.mxu0 %vm472_vm10, %v465_v44  ;;  %v682_v53 = vld [vmem:[#allocation2 + $0x10] sm:$0x7]  ;;  %v829_v55 = vshll.u32 %v3106_v35, 16  ;;  %v2590_v56 = vrot.slane %v3034_v21, 9  ;;  %v921_v57 = vrot.slane %v766_v29, 7  ;;  %v799_v60 = vrot.slane %v798_v49, 2 }
  0x3d   : > { %2725 = vmatpush3.bf16.msra.mxu0 %v2834_v37  ;;  %2726 = vmatprep.mubr.msk.bf16.mxu0 %vm2873_vm0, %v2872_v1  ;;  %v691_v58 = vcombine.low %v3061_v4, %v682_v53  ;;  %v789_v59 = vrot.slane %v682_v53, %v2976_v45  ;;  %v812_v61 = vor.u32 %v811_v50, %v808_v41  ;;  %v825_v62 = vrot.slane %v823_v52, 7  ;;  %v3147_v37 = vld [vmem:[#allocation2 + $0x10] sm:$0x7] }
  0x3e   : > { %2736 = vmatprep.subr.bf16.mxu0 %v2872_v1  ;;  %v831_v63 = vrot.slane %v829_v55, 7  ;;  %v922_v2 = vsel %vm3047_vm12, %v2590_v56, %v921_v57  ;;  %v2591_v21 = vrot.slane %v3089_v27, 9  ;;  %v804_v6 = vsel %vm3026_vm8, %v799_v60, %v803_v47  ;;  %v2841_v60 = vld [vmem:[%s3619_s1 + $0x38] sm:$0xff]  }
  0x3f   : > { %v705_v0 = vrot.slane %v691_v58, %v2976_v45  ;;  %v790_v3 = vcombine.high %v789_v59, %v789_v59  ;;  %v813_v4 = vrot.slane %v812_v61, 2  ;;  %v826_v11 = vor.u32 %v825_v62, %v822_v54 }
  0x40   : > { %v834_v12 = vshrl.u32 %v789_v59, 16  ;;  %v837_v9 = vshll.u32 %v789_v59, 16  ;;  %v925_v10 = vrot.slane %v774_v30, 7  ;;  %v2592_v23 = vrot.slane %v3094_v28, 9 }
  0x41   : > { %v706_v14 = vcombine.low %v3077_v22, %v705_v0  ;;  %v818_v18 = vsel %vm3026_vm8, %v813_v4, %v817_v51  ;;  %v843_v19 = vshll.u32 %v790_v3, 16  ;;  %v827_v25 = vrot.slane %v826_v11, 2  ;;  %v2840_v4 = vld [vmem:[%s3619_s1 + $0x30] sm:$0xff]  }
  0x42   : > { %v836_v26 = vrot.slane %v834_v12, 6  ;;  %v839_v27 = vrot.slane %v837_v9, 7  ;;  %v850_v8 = vcombine.low %v804_v6, %v818_v18  ;;  %v926_v22 = vsel %vm3047_vm12, %v2591_v21, %v925_v10 }
  0x43   : > { %2733 = vmatmul.mubr.msk.bf16.vlgmr.msra.gmra.mxu1 %vm472_vm10, %v706_v14  ;;  %v845_v29 = vrot.slane %v843_v19, 7  ;;  %v929_v30 = vrot.slane %v3106_v35, 7  ;;  %v2593_v31 = vrot.slane %v789_v59, 9  ;;  %v832_v28 = vsel %vm3026_vm8, %v827_v25, %v831_v63 }
  0x44   : > { %2727 = vmatmul.mubr.msk.bf16.vlgmr.msra.gmra.mxu0 %vm472_vm10, %v626_v46  ;;  %2743 = vmatpush3.bf16.msra.mxu1 %v2839_v7  ;;  %v840_v15 = vor.u32 %v839_v27, %v836_v26  ;;  %v858_v33 = vrot.slane %v850_v8, %v2976_v45  ;;  %v933_v34 = vrot.slane %v790_v3, 7  ;;  %v938_v40 = vcombine.low %v922_v2, %v926_v22 }
  0x45   : > { %2737 = vmatpush3.bf16.msra.mxu0 %v2838_v16  ;;  %2738 = vmatprep.mubr.msk.bf16.mxu0 %vm2873_vm0, %v2872_v1  ;;  %v930_v35 = vsel %vm3047_vm12, %v2592_v23, %v929_v30  ;;  %v195_v41 = vsel %vm2923_vm4, 0, %v194_v24  ;;  %v216_v42 = vsel %vm2946_vm7, 0, %v215_v20  ;;  %v1019_v46 = vcombine.low %v1008_v32, %v1009_v36 }
  0x46   : > { %2744 = vmatprep.mubr.msk.bf16.mxu1 %vm2873_vm0, %v2872_v1  ;;  %2748 = vmatprep.subr.bf16.mxu0 %v2872_v1  ;;  %v841_v43 = vrot.slane %v840_v15, 2  ;;  %v934_v44 = vsel %vm3047_vm12, %v2593_v31, %v933_v34  ;;  %196 = vst [vmem:[#allocation2 + $0x14] sm:$0x1] %v195_v41  ;;  %217 = vst [vmem:[#allocation2 + $0x14] sm:$0x4] %v216_v42  ;;  %v3163_v47 = vrot.slane %v1008_v32, %v2976_v45 }
  0x47   : > { %v939_v48 = vcombine.low %v930_v35, %v934_v44  ;;  %v946_v49 = vrot.slane %v938_v40, %v2976_v45  ;;  %2754 = vmatprep.subr.bf16.mxu1 %v2872_v1  ;;  %v3168_v50 = vrot.slane %v1009_v36, %v2976_v45  ;;  %v3172_v51 = vrot.slane %v3147_v37, %v2976_v45 }
  0x48   : > { %v846_v52 = vsel %vm3026_vm8, %v841_v43, %v845_v29  ;;  %v3177_v53 = vrot.slane %v1019_v46, %v2976_v45  ;;  %v3181_v54 = vcombine.high %v3163_v47, %v3163_v47  ;;  %v1121_v55 = vshrl.u32 %v3163_v47, 16  ;;  %v2844_v46 = vld [vmem:[%s3619_s1 + $0x40] sm:$0xff]  }
  0x49   : > { %v851_v56 = vcombine.low %v832_v28, %v846_v52  ;;  %v953_v57 = vrot.slane %v939_v48, %v2976_v45  ;;  %v3187_v58 = vcombine.high %v3168_v50, %v3168_v50  ;;  %v3191_v59 = vcombine.high %v3172_v51, %v3172_v51 }
  0x4a   : > { %v1123_v61 = vrot.slane %v1121_v55, 6  ;;  %v1124_v62 = vshll.u32 %v3163_v47, 16  ;;  %v1130_v63 = vshll.u32 %v3181_v54, 16  ;;  %v1135_v2 = vshrl.u32 %v3168_v50, 16 }
  0x4b   : > { %v865_v21 = vrot.slane %v851_v56, %v2976_v45  ;;  %v954_v0 = vcombine.low %v946_v49, %v953_v57  ;;  %v1138_v3 = vshll.u32 %v3168_v50, 16  ;;  %v1144_v6 = vshll.u32 %v3187_v58, 16 }
  0x4c   : > { %v1126_v7 = vrot.slane %v1124_v62, 7  ;;  %v1132_v11 = vrot.slane %v1130_v63, 7  ;;  %v1137_v12 = vrot.slane %v1135_v2, 6  ;;  %v1149_v9 = vshrl.u32 %v3172_v51, 16 }
  0x4d   : > { %v866_v10 = vcombine.low %v858_v33, %v865_v21  ;;  %2745 = vmatmul.mubr.msk.bf16.vlgmr.msra.gmra.mxu1 %vm472_vm10, %v954_v0  ;;  %v1011_v14 = vld [vmem:[#allocation2 + $0x14] sm:$0x7]  ;;  %v1140_v16 = vrot.slane %v1138_v3, 7  ;;  %v1146_v18 = vrot.slane %v1144_v6, 7  ;;  %v1152_v19 = vshll.u32 %v3172_v51, 16 }
  0x4e   : > { %2755 = vmatpush3.bf16.msra.mxu1 %v2841_v60  ;;  %2756 = vmatprep.mubr.msk.bf16.mxu1 %vm2873_vm0, %v2872_v1  ;;  %v1020_v23 = vcombine.low %v3147_v37, %v1011_v14  ;;  %v1118_v24 = vrot.slane %v1011_v14, %v2976_v45  ;;  %v1127_v25 = vor.u32 %v1126_v7, %v1123_v61  ;;  %v1151_v26 = vrot.slane %v1149_v9, 6  ;;  %v227_v9 = vld [vmem:[#allocation3 + $0x8] sm:$0x1] }
  0x4f   : > { %2739 = vmatmul.mubr.msk.bf16.vlgmr.msra.gmra.mxu0 %vm472_vm10, %v866_v10  ;;  %v1141_v27 = vor.u32 %v1140_v16, %v1137_v12  ;;  %v1154_v8 = vrot.slane %v1152_v19, 7  ;;  %v1158_v20 = vshll.u32 %v3191_v59, 16  ;;  %v2606_v29 = vrot.slane %v3163_v47, 9  ;;  %2766 = vmatprep.subr.bf16.mxu1 %v2872_v1  ;;  %v224_v12 = vld [vmem:[#allocation3 + $0x4] sm:$0x1] }
  0x50   : > { %2749 = vmatpush3.bf16.msra.mxu0 %v2840_v4  ;;  %2750 = vmatprep.mubr.msk.bf16.mxu0 %vm2873_vm0, %v2872_v1  ;;  %v1034_v22 = vrot.slane %v1020_v23, %v2976_v45  ;;  %v1119_v30 = vcombine.high %v1118_v24, %v1118_v24  ;;  %v1128_v31 = vrot.slane %v1127_v25, 2  ;;  %v1163_v32 = vshrl.u32 %v1118_v24, 16  ;;  %v230_v10 = vld [vmem:[#allocation3 + $0xc] sm:$0x1]  ;;  %v233_v19 = vld [vmem:[#allocation3 + $0x10] sm:$0x1] }
  0x51   : > { %2760 = vmatprep.subr.bf16.mxu0 %v2872_v1  ;;  %v1142_v28 = vrot.slane %v1141_v27, 2  ;;  %v1155_v15 = vor.u32 %v1154_v8, %v1151_v26  ;;  %v1160_v33 = vrot.slane %v1158_v20, 7  ;;  %v1166_v34 = vshll.u32 %v1118_v24, 16  ;;  %v245_v25 = vld [vmem:[#allocation3 + $0x8] sm:$0x4] }
  0x52   : > { %v1035_v36 = vcombine.low %v3177_v53, %v1034_v22  ;;  %v1133_v37 = vsel %vm3026_vm8, %v1128_v31, %v1132_v11  ;;  %v1165_v35 = vrot.slane %v1163_v32, 6  ;;  %v1172_v40 = vshll.u32 %v1119_v30, 16  ;;  %v248_v8 = vld [vmem:[#allocation3 + $0xc] sm:$0x4]  ;;  %v251_v20 = vld [vmem:[#allocation3 + $0x10] sm:$0x4] }
  0x53   : > { %v1147_v41 = vsel %vm3026_vm8, %v1142_v28, %v1146_v18  ;;  %v1156_v42 = vrot.slane %v1155_v15, 2  ;;  %v1168_v43 = vrot.slane %v1166_v34, 7  ;;  %v1250_v44 = vrot.slane %v3181_v54, 7  ;;  %v221_v31 = vld [vmem:[#allocation3] sm:$0x1] }
  0x54   : > { %v2607_v47 = vrot.slane %v3168_v50, 9  ;;  %v1254_v48 = vrot.slane %v3187_v58, 7  ;;  %v1174_v52 = vrot.slane %v1172_v40, 7  ;;  %v2608_v55 = vrot.slane %v3172_v51, 9  ;;  %v239_v32 = vld [vmem:[#allocation3] sm:$0x4] }
  0x55   : > { %v1169_v49 = vor.u32 %v1168_v43, %v1165_v35  ;;  %v1251_v53 = vsel %vm3047_vm12, %v2606_v29, %v1250_v44  ;;  %v1179_v56 = vcombine.low %v1133_v37, %v1147_v41  ;;  %v1258_v54 = vrot.slane %v3191_v59, 7  ;;  %v236_v34 = vld [vmem:[#allocation3 + $0x14] sm:$0x1] }
  0x56   : > { %v1255_v57 = vsel %vm3047_vm12, %v2607_v47, %v1254_v48  ;;  %v2609_v60 = vrot.slane %v1118_v24, 9  ;;  %v1161_v50 = vsel %vm3026_vm8, %v1156_v42, %v1160_v33  ;;  %v1262_v61 = vrot.slane %v1119_v30, 7  ;;  %v242_v24 = vld [vmem:[#allocation3 + $0x4] sm:$0x4]  ;;  %v2845_v30 = vld [vmem:[%s3620_s2] sm:$0xff]   ;;  %v2848_v33 = vld [vmem:[%s3620_s2 + $0x8] sm:$0xff]  }
  0x57   : > { %2751 = vmatmul.mubr.msk.bf16.vlgmr.msra.gmra.mxu0 %vm472_vm10, %v1035_v36  ;;  %v1170_v58 = vrot.slane %v1169_v49, 2  ;;  %v1267_v62 = vcombine.low %v1251_v53, %v1255_v57  ;;  %v1259_v51 = vsel %vm3047_vm12, %v2608_v55, %v1258_v54  ;;  %v1187_v21 = vrot.slane %v1179_v56, %v2976_v45  ;;  %v254_v36 = vld [vmem:[#allocation3 + $0x14] sm:$0x4] }
  0x58   : > { %2761 = vmatpush3.bf16.msra.mxu0 %v2844_v46  ;;  %2762 = vmatprep.mubr.msk.bf16.mxu0 %vm2873_vm0, %v2872_v1  ;;  %v1263_v59 = vsel %vm3047_vm12, %v2609_v60, %v1262_v61  ;;  %v225_v14 = vsel %vm2923_vm4, 0, %v224_v12  ;;  %v228_v16 = vsel %vm2923_vm4, 0, %v227_v9  ;;  %v231_v18 = vsel %vm2923_vm4, 0, %v230_v10 }
  0x59   : > { %v1175_v63 = vsel %vm3026_vm8, %v1170_v58, %v1174_v52  ;;  %2772 = vmatprep.subr.bf16.mxu0 %v2872_v1  ;;  %v1268_v0 = vcombine.low %v1259_v51, %v1263_v59  ;;  %v1275_v3 = vrot.slane %v1267_v62, %v2976_v45  ;;  %226 = vst [vmem:[#allocation3 + $0x4] sm:$0x1] %v225_v14  ;;  %229 = vst [vmem:[#allocation3 + $0x8] sm:$0x1] %v228_v16 }
  0x5a   : > { %v1180_v2 = vcombine.low %v1161_v50, %v1175_v63  ;;  %232 = vst [vmem:[#allocation3 + $0xc] sm:$0x1] %v231_v18  ;;  %v234_v23 = vsel %vm2923_vm4, 0, %v233_v19  ;;  %v243_v26 = vsel %vm2946_vm7, 0, %v242_v24  ;;  %v246_v27 = vsel %vm2946_vm7, 0, %v245_v25 }
  0x5b   : > { %v1282_v4 = vrot.slane %v1268_v0, %v2976_v45  ;;  %235 = vst [vmem:[#allocation3 + $0x10] sm:$0x1] %v234_v23  ;;  %244 = vst [vmem:[#allocation3 + $0x4] sm:$0x4] %v243_v26  ;;  %v249_v29 = vsel %vm2946_vm7, 0, %v248_v8  ;;  %v252_v22 = vsel %vm2946_vm7, 0, %v251_v20 }
  0x5c   : > { %v1194_v6 = vrot.slane %v1180_v2, %v2976_v45  ;;  %247 = vst [vmem:[#allocation3 + $0x8] sm:$0x4] %v246_v27  ;;  %250 = vst [vmem:[#allocation3 + $0xc] sm:$0x4] %v249_v29  ;;  %v222_v28 = vsel %vm2923_vm4, 0, %v221_v31  ;;  %v240_v15 = vsel %vm2946_vm7, 0, %v239_v32 }
  0x5d   : > { %v1283_v11 = vcombine.low %v1275_v3, %v1282_v4  ;;  %253 = vst [vmem:[#allocation3 + $0x10] sm:$0x4] %v252_v22  ;;  %223 = vst [vmem:[#allocation3] sm:$0x1] %v222_v28  ;;  %v237_v37 = vsel %vm2923_vm4, 0, %v236_v34  ;;  %v255_v35 = vsel %vm2946_vm7, 0, %v254_v36 }
  0x5e   : > { %v1195_v7 = vcombine.low %v1187_v21, %v1194_v6  ;;  %241 = vst [vmem:[#allocation3] sm:$0x4] %v240_v15  ;;  %238 = vst [vmem:[#allocation3 + $0x14] sm:$0x1] %v237_v37 }
  0x5f   : > { %2763 = vmatmul.mubr.msk.bf16.vlgmr.msra.gmra.mxu0 %vm472_vm10, %v1283_v11  ;;  %256 = vst [vmem:[#allocation3 + $0x14] sm:$0x4] %v255_v35 }
  0x60   : > { %2757 = vmatmul.mubr.msk.bf16.vlgmr.msra.gmra.mxu1 %vm472_vm10, %v1195_v7  ;;  %2774 = vmatprep.mubr.msk.bf16.mxu0 %vm2873_vm0, %v2872_v1 }
  0x61   : > { %2768 = vmatprep.mubr.msk.bf16.mxu1 %vm2873_vm0, %v2872_v1  ;;  %2773 = vmatpush3.bf16.msra.mxu0 %v2845_v30 }
  0x62   : > { %2784 = vmatprep.subr.bf16.mxu0 %v2872_v1  ;;  %2767 = vmatpush3.bf16.msra.mxu1 %v2848_v33 }
  0x63   : > { %2778 = vmatprep.subr.bf16.mxu1 %v2872_v1 }
  0xf3   : > { %v577_v40 = vpop.f32.mrf.mxu1 }
  0xf5   : > { %v2722_v41 = vpop.f32.mrf.mxu1 }
  0xf7   : > { %v580_v42 = vpop.f32.mrf.mxu1 }
  0xf9   : > { %v2723_v43 = vpop.f32.mrf.mxu1 }
  0xfc   : > { %v510_v44 = vpop.f32.mrf.mxu0 }
  0xfd   : > { %v578_v60 = vadd.f32 %v577_v40, %v510_v44 }
  0xfe   : > { %v2716_v46 = vpop.f32.mrf.mxu0 }
 0x100   : > { %v513_v47 = vpop.f32.mrf.mxu0 }
 0x101   : > { %v581_v63 = vadd.f32 %v580_v42, %v513_v47 }
 0x102   : > { %v2717_v48 = vpop.f32.mrf.mxu0 }
 0x103   : > { %v750_v49 = vpop.f32.mrf.mxu1 }
 0x104   : > { %v670_v52 = vpop.f32.mrf.mxu0 }
 0x105   : > { %v2734_v53 = vpop.f32.mrf.mxu1  ;;  %v677_v61 = vadd.f32 %v670_v52, %v578_v60 }
 0x106   : > { %v2728_v5 = vpop.f32.mrf.mxu0 }
 0x107   : > { %v753_v55 = vpop.f32.mrf.mxu1  ;;  %v757_v21 = vadd.f32 %v750_v49, %v677_v61 }
 0x108   : > { %v673_v56 = vpop.f32.mrf.mxu0 }
 0x109   : > { %v2735_v13 = vpop.f32.mrf.mxu1  ;;  %v678_v0 = vadd.f32 %v673_v56, %v581_v63 }
 0x10a   : > { %v2729_v57 = vpop.f32.mrf.mxu0 }
 0x10b   : > { %v758_v7 = vadd.f32 %v753_v55, %v678_v0 }
 0x10d   : > { %v998_v54 = vpop.f32.mrf.mxu1 }
 0x10f   : > { %v910_v50 = vpop.f32.mrf.mxu0  ;;  %v2746_v58 = vpop.f32.mrf.mxu1 }
 0x110   : > { %v917_v6 = vadd.f32 %v910_v50, %v757_v21 }
 0x111   : > { %v2740_v62 = vpop.f32.mrf.mxu0  ;;  %v1001_v51 = vpop.f32.mrf.mxu1 }
 0x112   : > { %v1005_v12 = vadd.f32 %v998_v54, %v917_v6  ;;  %v3297_v62 = vld [vmem:[#allocation3] sm:$0x7] }
 0x113   : > { %v913_v59 = vpop.f32.mrf.mxu0  ;;  %v2747_v2 = vpop.f32.mrf.mxu1  ;;  %v3301_v0 = vrot.slane %v3297_v62, %v2976_v45 }
 0x114   : > { %v918_v9 = vadd.f32 %v913_v59, %v758_v7 }
 0x115   : > { %v2741_v3 = vpop.f32.mrf.mxu0 }
 0x116   : > { %v1006_v18 = vadd.f32 %v1001_v51, %v918_v9  ;;  %v3303_v3 = vld [vmem:[#allocation3 + $0x14] sm:$0x7] }
 0x117   : > { %v1079_v4 = vpop.f32.mrf.mxu0  ;;  %v3308_v9 = vrot.slane %v3303_v3, %v2976_v45 }
 0x118   : > { %v1086_v14 = vadd.f32 %v1079_v4, %v1005_v12  ;;  %v1489_v12 = vshrl.u32 %v3301_v0, 16 }
 0x119   : > { %v2752_v11 = vpop.f32.mrf.mxu0 }
 0x11b   : > { %v1082_v10 = vpop.f32.mrf.mxu0 }
 0x11c   : > { %v1087_v25 = vadd.f32 %v1082_v10, %v1006_v18 }
 0x11d   : > { %v2753_v16 = vpop.f32.mrf.mxu0 }
 0x11f   : > { %v1327_v23 = vpop.f32.mrf.mxu0 }
 0x120   : > { %v1239_v19 = vpop.f32.mrf.mxu1 }
 0x121   : > { %v1246_v24 = vadd.f32 %v1239_v19, %v1086_v14  ;;  %v2764_v27 = vpop.f32.mrf.mxu0  ;;  %v1492_v19 = vshll.u32 %v3301_v0, 16 }
 0x122   : > { %v2758_v26 = vpop.f32.mrf.mxu1  ;;  %v1491_v27 = vrot.slane %v1489_v12, 6 }
 0x123   : > { %v1334_v8 = vadd.f32 %v1327_v23, %v1246_v24  ;;  %v1330_v29 = vpop.f32.mrf.mxu0 }
 0x124   : > { %v1242_v20 = vpop.f32.mrf.mxu1 }
 0x125   : > { %v1247_v22 = vadd.f32 %v1242_v20, %v1087_v25  ;;  %1336 = vst.msk [vmem:[#allocation4] sm:$0xff] %vm472_vm10, %v1334_v8  ;;  %v2765_v31 = vpop.f32.mrf.mxu0  ;;  %v1348_v32 = vmul.f32 %v1334_v8, %v1334_v8  ;;  %v1338_v15 = vsel %vm472_vm10, %v1334_v8, 0.0  ;;  %v2253_v8 = vshrl.u32 %v3308_v9, 16 }
 0x126   : > { %v2759_v30 = vpop.f32.mrf.mxu1  ;;  %v2256_v20 = vshll.u32 %v3308_v9, 16 }
 0x127   : > { %v1335_v28 = vadd.f32 %v1330_v29, %v1247_v22  ;;  %v1350_v37 = vsel %vm472_vm10, %v1348_v32, 0.0 }
 0x129   : > { %1337 = vst.msk [vmem:[#allocation4 + $0x8] sm:$0xff] %vm472_vm10, %v1335_v28  ;;  %v1339_v33 = vsel %vm472_vm10, %v1335_v28, 0.0  ;;  %v1349_v34 = vmul.f32 %v1335_v28, %v1335_v28 }
 0x12a   : > { %v1340_v36 = vadd.f32 %v1339_v33, %v1338_v15  ;;  %v1434_v33 = vld [vmem:[#allocation3 + $0x4] sm:$0x7] }
 0x12b   : > { %v1351_v35 = vsel %vm472_vm10, %v1349_v34, 0.0  ;;  %v1494_v34 = vrot.slane %v1492_v19, 7 }
 0x12c   : > { %v1341_v40 = vrot.slane %v1340_v36, 4  ;;  %v1352_v41 = vadd.f32 %v1351_v35, %v1350_v37  ;;  %v1367_v58 = vld [vmem:[#allocation4] sm:$0xff] }
 0x12e   : > { %v1342_v42 = vadd.f32 %v1341_v40, %v1340_v36  ;;  %v1353_v43 = vrot.slane %v1352_v41, 4 }
 0x130   : > { %v1343_v44 = vrot.slane %v1342_v42, 2  ;;  %v1354_v46 = vadd.f32 %v1353_v43, %v1352_v41  ;;  %v1368_v61 = vld [vmem:[#allocation4 + $0x8] sm:$0xff]  ;;  %v1440_v41 = vld [vmem:[#allocation3 + $0xc] sm:$0x7]  ;;  %v1437_v43 = vld [vmem:[#allocation3 + $0x8] sm:$0x7] }
 0x132   : > { %v1344_v47 = vadd.f32 %v1343_v44, %v1342_v42  ;;  %v1355_v48 = vrot.slane %v1354_v46, 2  ;;  %v1443_v44 = vld [vmem:[#allocation3 + $0x10] sm:$0x7] }
 0x134   : > { %v1345_v49 = vrot.slane %v1344_v47, 1  ;;  %v1356_v52 = vadd.f32 %v1355_v48, %v1354_v46  ;;  %v1463_v46 = vcombine.high %v3301_v0, %v3301_v0 }
 0x136   : > { %v1346_v53 = vadd.f32 %v1345_v49, %v1344_v47  ;;  %v1357_v5 = vrot.slane %v1356_v52, 1  ;;  %v2255_v47 = vrot.slane %v2253_v8, 6 }
 0x138   : > { %v1358_v55 = vadd.f32 %v1357_v5, %v1356_v52  ;;  %v1360_v56 = vmul.f32 0.0625, %v1346_v53  ;;  %v2258_v53 = vrot.slane %v2256_v20, 7 }
 0x13a   : > { %v1361_v13 = vmul.f32 0.0625, %v1358_v55  ;;  %v1362_v57 = vmul.f32 %v1360_v56, %v1360_v56  ;;  %v1369_v51 = vsub.f32 %v1367_v58, %v1360_v56  ;;  %v1370_v63 = vsub.f32 %v1368_v61, %v1360_v56 }
 0x13b   : > { %v1495_v55 = vor.u32 %v1494_v34, %v1491_v27  ;;  %v1498_v56 = vshll.u32 %v1463_v46, 16 }
 0x13c   : > { %v1363_v54 = vsub.f32 %v1361_v13, %v1362_v57 }
 0x13d   : > { %v3328_v58 = vrot.slane %v1495_v55, 2  ;;  %v3330_v61 = vrot.slane %v1498_v56, 7 }
 0x13e   : > { %v1364_v60 = vmax.f32 %v1363_v54, 0.0  ;;  %v3325_v54 = vcombine.high %v3308_v9, %v3308_v9 }
 0x13f   : > { %v1501_v12 = vsel %vm3026_vm8, %v3328_v58, %v3330_v61 }
 0x140   : > { %v1365_v50 = vadd.f32 1e-05, %v1364_v60  ;;  %v2259_v60 = vor.u32 %v2258_v53, %v2255_v47 }
 0x142   : > { %2860 = vrsqrt.f32 %v1365_v50  ;;  %v2262_v50 = vshll.u32 %v3325_v54, 16  ;;  %v3333_v38 = vrot.slane %v2259_v60, 2 }
 0x14f   : > { %v2861_v59 = vpop.eup %2860 }
 0x150   : > { %v1371_v2 = vmul.f32 %v2861_v59, %v1369_v51  ;;  %v1372_v21 = vmul.f32 %v2861_v59, %v1370_v63  ;;  %v2624_v51 = vrot.slane %v3301_v0, 9  ;;  %v1683_v63 = vrot.slane %v1463_v46, 7 }
 0x152   : > { %vm1373_vm4 = vcmp.ge.f32.partialorder %v1371_v2, 0.0  ;;  %vm1374_vm7 = vcmp.ge.f32.partialorder %v1372_v21, 0.0  ;;  %v1375_v6 = vmul.f32 0.01, %v1371_v2  ;;  %v1376_v4 = vmul.f32 0.01, %v1372_v21 }
 0x154   : > { %v1377_v7 = vsel %vm1373_vm4, %v1371_v2, %v1375_v6  ;;  %v1378_v11 = vsel %vm1374_vm7, %v1372_v21, %v1376_v4  ;;  %v3335_v21 = vrot.slane %v2262_v50, 7 }
 0x155   : > { %v1381_v10 = vcombine.high %v1377_v7, %v1377_v7  ;;  %v1382_v14 = vcombine.high %v1378_v11, %v1378_v11  ;;  %v2670_v16 = vpack.c.bf16 %v1377_v7, %v1377_v7  ;;  %v2672_v18 = vpack.c.bf16 %v1378_v11, %v1378_v11 }
 0x157   : > { %v2671_v23 = vpack.c.bf16 %v1381_v10, %v1381_v10  ;;  %v2673_v24 = vpack.c.bf16 %v1382_v14, %v1382_v14  ;;  %v1402_v25 = vshrl.u32 %v2670_v16, 16  ;;  %v1416_v26 = vshrl.u32 %v2672_v18, 16 }
 0x158   : > { %v1405_v22 = vshll.u32 %v2670_v16, 16  ;;  %v1419_v15 = vshll.u32 %v2672_v18, 16 }
 0x159   : > { %v1404_v29 = vrot.slane %v1402_v25, 7  ;;  %v1409_v30 = vshrl.u32 %v2671_v23, 16  ;;  %v1423_v31 = vshrl.u32 %v2673_v24, 16  ;;  %v1412_v32 = vshll.u32 %v2671_v23, 16 }
 0x15a   : > { %v1418_v28 = vrot.slane %v1416_v26, 7  ;;  %v1426_v40 = vshll.u32 %v2673_v24, 16 }
 0x15b   : > { %v1407_v36 = vor.u32 %v1405_v22, %v1404_v29  ;;  %v1411_v37 = vrot.slane %v1409_v30, 7  ;;  %v1425_v35 = vrot.slane %v1423_v31, 7 }
 0x15c   : > { %v1421_v42 = vor.u32 %v1419_v15, %v1418_v28  ;;  %v2849_v15 = vld [vmem:[%s3620_s2 + $0x18] sm:$0xff]  }
 0x15d   : > { %v1414_v48 = vor.u32 %v1412_v32, %v1411_v37  ;;  %v1428_v49 = vor.u32 %v1426_v40, %v1425_v35  ;;  %v1435_v52 = vsel %vm2972_vm9, %v1407_v36, %v1434_v33 }
 0x15e   : > { %1436 = vst [vmem:[#allocation3 + $0x4] sm:$0x7] %v1435_v52  ;;  %v1441_v5 = vsel %vm2972_vm9, %v1421_v42, %v1440_v41 }
 0x15f   : > { %v1438_v13 = vsel %vm2972_vm9, %v1414_v48, %v1437_v43  ;;  %1442 = vst [vmem:[#allocation3 + $0xc] sm:$0x7] %v1441_v5  ;;  %v1444_v57 = vsel %vm2972_vm9, %v1428_v49, %v1443_v44 }
 0x160   : > { %1439 = vst [vmem:[#allocation3 + $0x8] sm:$0x7] %v1438_v13  ;;  %1445 = vst [vmem:[#allocation3 + $0x10] sm:$0x7] %v1444_v57 }
 0x165   : > { %v1447_v59 = vld [vmem:[#allocation3 + $0x4] sm:$0x7] }
 0x166   : > { %v1769_v2 = vld [vmem:[#allocation3 + $0x4] sm:$0x7]  ;;  %v1449_v6 = vld [vmem:[#allocation3 + $0xc] sm:$0x7]  ;;  %v3338_v4 = vrot.slane %v1447_v59, %v2976_v45  ;;  %v1614_v7 = vcombine.low %v3297_v62, %v1447_v59  ;;  %v3358_v62 = vsel %vm3047_vm12, %v2624_v51, %v1683_v63 }
 0x167   : > { %v1771_v11 = vld [vmem:[#allocation3 + $0xc] sm:$0x7]  ;;  %v1448_v10 = vld [vmem:[#allocation3 + $0x8] sm:$0x7]  ;;  %v3348_v14 = vrot.slane %v1449_v6, %v2976_v45  ;;  %v1772_v18 = vld [vmem:[#allocation3 + $0x10] sm:$0x7]  ;;  %v3351_v19 = vrot.slane %v1769_v2, %v2976_v45 }
 0x168   : > { %v3345_v0 = vld [vmem:[#allocation3 + $0xc] sm:$0x7]  ;;  %v1770_v16 = vld [vmem:[#allocation3 + $0x8] sm:$0x7]  ;;  %v3354_v23 = vrot.slane %v1771_v11, %v2976_v45  ;;  %v3361_v24 = vrot.slane %v1448_v10, %v2976_v45  ;;  %v1615_v25 = vcombine.low %v1448_v10, %v1449_v6  ;;  %v1622_v8 = vrot.slane %v1614_v7, %v2976_v45 }
 0x169   : > { %v1780_v26 = vcombine.low %v1769_v2, %v1770_v16  ;;  %v3365_v27 = vrot.slane %v3345_v0, %v2976_v45  ;;  %v1781_v20 = vcombine.low %v1771_v11, %v1772_v18  ;;  %v3369_v29 = vrot.slane %v1770_v16, %v2976_v45 }
 0x16a   : > { %v3373_v22 = vcombine.high %v3338_v4, %v3338_v4  ;;  %v1629_v30 = vrot.slane %v1615_v25, %v2976_v45  ;;  %v3379_v32 = vcombine.high %v3361_v24, %v3361_v24  ;;  %v3383_v28 = vcombine.high %v3348_v14, %v3348_v14 }
 0x16b   : > { %v1788_v31 = vrot.slane %v1780_v26, %v2976_v45  ;;  %v1795_v33 = vrot.slane %v1781_v20, %v2976_v45  ;;  %v1503_v34 = vshrl.u32 %v3338_v4, 16  ;;  %v1506_v36 = vshll.u32 %v3338_v4, 16  ;;  %v2853_v26 = vld [vmem:[%s3620_s2 + $0x28] sm:$0xff]  }
 0x16c   : > { %v1512_v37 = vshll.u32 %v3373_v22, 16  ;;  %v1630_v35 = vcombine.low %v1622_v8, %v1629_v30  ;;  %v3393_v40 = vrot.slane %v1772_v18, %v2976_v45  ;;  %v1517_v41 = vshrl.u32 %v3361_v24, 16 }
 0x16d   : > { %v1520_v42 = vshll.u32 %v3361_v24, 16  ;;  %v1796_v43 = vcombine.low %v1788_v31, %v1795_v33  ;;  %v1505_v44 = vrot.slane %v1503_v34, 6  ;;  %v1508_v46 = vrot.slane %v1506_v36, 7 }
 0x16e   : > { %v1526_v47 = vshll.u32 %v3379_v32, 16  ;;  %2775 = vmatmul.mubr.msk.bf16.vlgmr.msra.gmra.mxu0 %vm472_vm10, %v1630_v35  ;;  %v1514_v48 = vrot.slane %v1512_v37, 7  ;;  %v1519_v49 = vrot.slane %v1517_v41, 6  ;;  %v1531_v53 = vshrl.u32 %v3348_v14, 16 }
 0x16f   : > { %v1522_v52 = vrot.slane %v1520_v42, 7  ;;  %2785 = vmatpush3.bf16.msra.mxu0 %v2849_v15  ;;  %2786 = vmatprep.mubr.msk.bf16.mxu0 %vm2873_vm0, %v2872_v1  ;;  %v1509_v5 = vor.u32 %v1508_v46, %v1505_v44  ;;  %v1534_v55 = vshll.u32 %v3348_v14, 16  ;;  %v1540_v56 = vshll.u32 %v3383_v28, 16 }
 0x170   : > { %v3406_v13 = vcombine.high %v3351_v19, %v3351_v19  ;;  %v1533_v60 = vrot.slane %v1531_v53, 6  ;;  %2796 = vmatprep.subr.bf16.mxu0 %v2872_v1  ;;  %v3411_v50 = vcombine.high %v3369_v29, %v3369_v29  ;;  %v3415_v51 = vcombine.high %v3354_v23, %v3354_v23  ;;  %v3462_v53 = vld [vmem:[#allocation3 + $0x10] sm:$0x7] }
 0x171   : > { %v1523_v57 = vor.u32 %v1522_v52, %v1519_v49  ;;  %v1510_v63 = vrot.slane %v1509_v5, 2  ;;  %v1528_v59 = vrot.slane %v1526_v47, 7  ;;  %v1536_v2 = vrot.slane %v1534_v55, 7  ;;  %v3449_v47 = vld [vmem:[#allocation3 + $0x8] sm:$0x7] }
 0x172   : > { %v3419_v6 = vcombine.high %v3393_v40, %v3393_v40  ;;  %v1542_v11 = vrot.slane %v1540_v56, 7  ;;  %v2640_v10 = vrot.slane %v3351_v19, 9  ;;  %v2011_v16 = vrot.slane %v3406_v13, 7 }
 0x173   : > { %v1524_v7 = vrot.slane %v1523_v57, 2  ;;  %v1515_v18 = vsel %vm3026_vm8, %v1510_v63, %v1514_v48  ;;  %v1537_v25 = vor.u32 %v1536_v2, %v1533_v60  ;;  %v2641_v8 = vrot.slane %v3369_v29, 9  ;;  %v2852_v63 = vld [vmem:[%s3620_s2 + $0x10] sm:$0xff]  }
 0x174   : > { %v2015_v20 = vrot.slane %v3411_v50, 7  ;;  %v2012_v31 = vsel %vm3047_vm12, %v2640_v10, %v2011_v16  ;;  %v2642_v15 = vrot.slane %v3354_v23, 9  ;;  %v2019_v33 = vrot.slane %v3415_v51, 7 }
 0x175   : > { %v1529_v30 = vsel %vm3026_vm8, %v1524_v7, %v1528_v59  ;;  %v1538_v34 = vrot.slane %v1537_v25, 2  ;;  %v2643_v37 = vrot.slane %v3393_v40, 9  ;;  %v2023_v35 = vrot.slane %v3419_v6, 7 }
 0x176   : > { %v2016_v36 = vsel %vm3047_vm12, %v2641_v8, %v2015_v20  ;;  %2787 = vmatmul.mubr.msk.bf16.vlgmr.msra.gmra.mxu0 %vm472_vm10, %v1796_v43  ;;  %v1547_v41 = vcombine.low %v1501_v12, %v1515_v18  ;;  %v2020_v42 = vsel %vm3047_vm12, %v2642_v15, %v2019_v33  ;;  %v2625_v46 = vrot.slane %v3338_v4, 9  ;;  %v2855_v18 = vld [vmem:[%s3620_s2 + $0x38] sm:$0xff]  }
 0x177   : > { %v2028_v44 = vcombine.low %v2012_v31, %v2016_v36  ;;  %v1543_v48 = vsel %vm3026_vm8, %v1538_v34, %v1542_v11  ;;  %2797 = vmatpush3.bf16.msra.mxu0 %v2853_v26  ;;  %2798 = vmatprep.mubr.msk.bf16.mxu0 %vm2873_vm0, %v2872_v1  ;;  %v2024_v43 = vsel %vm3047_vm12, %v2643_v37, %v2023_v35  ;;  %v1687_v58 = vrot.slane %v3373_v22, 7 }
 0x178   : > { %v2626_v61 = vrot.slane %v3361_v24, 9  ;;  %v1548_v12 = vcombine.low %v1529_v30, %v1543_v48  ;;  %v2029_v49 = vcombine.low %v2020_v42, %v2024_v43  ;;  %v1691_v52 = vrot.slane %v3379_v32, 7  ;;  %2808 = vmatprep.subr.bf16.mxu0 %v2872_v1 }
 0x179   : > { %v2036_v4 = vrot.slane %v2028_v44, %v2976_v45  ;;  %v1688_v5 = vsel %vm3047_vm12, %v2625_v46, %v1687_v58  ;;  %v2627_v55 = vrot.slane %v3348_v14, 9  ;;  %v1695_v56 = vrot.slane %v3383_v28, 7 }
 0x17a   : > { %v3470_v24 = vrot.slane %v3449_v47, %v2976_v45  ;;  %v1555_v22 = vrot.slane %v1547_v41, %v2976_v45  ;;  %v1562_v57 = vrot.slane %v1548_v12, %v2976_v45  ;;  %v2043_v32 = vrot.slane %v2029_v49, %v2976_v45  ;;  %v2854_v49 = vld [vmem:[%s3620_s2 + $0x20] sm:$0xff]  }
 0x17b   : > { %v1692_v60 = vsel %vm3047_vm12, %v2626_v61, %v1691_v52  ;;  %v1696_v14 = vsel %vm3047_vm12, %v2627_v55, %v1695_v56  ;;  %v3488_v59 = vcombine.high %v3365_v27, %v3365_v27  ;;  %v3492_v2 = vrot.slane %v3462_v53, %v2976_v45 }
 0x17c   : > { %v3484_v28 = vcombine.high %v3470_v24, %v3470_v24  ;;  %v1563_v7 = vcombine.low %v1555_v22, %v1562_v57  ;;  %v2044_v11 = vcombine.low %v2036_v4, %v2043_v32  ;;  %v1700_v10 = vcombine.low %v3358_v62, %v1688_v5 }
 0x17d   : > { %v1701_v16 = vcombine.low %v1692_v60, %v1696_v14  ;;  %v3500_v25 = vcombine.high %v3492_v2, %v3492_v2  ;;  %v2211_v26 = vshrl.u32 %v3470_v24, 16  ;;  %v2214_v8 = vshll.u32 %v3470_v24, 16 }
 0x17e   : > { %v2220_v20 = vshll.u32 %v3484_v28, 16  ;;  %2769 = vmatmul.mubr.msk.bf16.vlgmr.msra.gmra.mxu1 %vm472_vm10, %v1563_v7  ;;  %2799 = vmatmul.mubr.msk.bf16.vlgmr.msra.gmra.mxu0 %vm472_vm10, %v2044_v11  ;;  %v2225_v30 = vshrl.u32 %v3365_v27, 16  ;;  %v2228_v31 = vshll.u32 %v3365_v27, 16  ;;  %v2265_v15 = vsel %vm3026_vm8, %v3333_v38, %v3335_v21 }
 0x17f   : > { %v1715_v62 = vrot.slane %v1701_v16, %v2976_v45  ;;  %2779 = vmatpush3.bf16.msra.mxu1 %v2852_v63  ;;  %2780 = vmatprep.mubr.msk.bf16.mxu1 %vm2873_vm0, %v2872_v1  ;;  %v2213_v33 = vrot.slane %v2211_v26, 6  ;;  %v2216_v34 = vrot.slane %v2214_v8, 7  ;;  %v2234_v36 = vshll.u32 %v3488_v59, 16 }
 0x180   : > { %v2239_v37 = vshrl.u32 %v3492_v2, 16  ;;  %2790 = vmatprep.subr.bf16.mxu1 %v2872_v1  ;;  %v1708_v35 = vrot.slane %v1700_v10, %v2976_v45  ;;  %2809 = vmatpush3.bf16.msra.mxu0 %v2855_v18  ;;  %v2222_v41 = vrot.slane %v2220_v20, 7  ;;  %v2227_v42 = vrot.slane %v2225_v30, 6 }
 0x181   : > { %v2230_v44 = vrot.slane %v2228_v31, 7  ;;  %2810 = vmatprep.mubr.msk.bf16.mxu0 %vm2873_vm0, %v2872_v1  ;;  %v2217_v38 = vor.u32 %v2216_v34, %v2213_v33  ;;  %v2242_v46 = vshll.u32 %v3492_v2, 16  ;;  %v2248_v48 = vshll.u32 %v3500_v25, 16 }
 0x182   : > { %v2241_v21 = vrot.slane %v2239_v37, 6  ;;  %v1716_v43 = vcombine.low %v1708_v35, %v1715_v62  ;;  %v1882_v61 = vshrl.u32 %v3351_v19, 16  ;;  %v1885_v12 = vshll.u32 %v3351_v19, 16 }
 0x183   : > { %v2231_v58 = vor.u32 %v2230_v44, %v2227_v42  ;;  %v2218_v4 = vrot.slane %v2217_v38, 2  ;;  %v2236_v52 = vrot.slane %v2234_v36, 7  ;;  %v2244_v5 = vrot.slane %v2242_v46, 7 }
 0x184   : > { %v1896_v55 = vshrl.u32 %v3369_v29, 16  ;;  %v2250_v22 = vrot.slane %v2248_v48, 7  ;;  %v1884_v57 = vrot.slane %v1882_v61, 6  ;;  %v1887_v32 = vrot.slane %v1885_v12, 7 }
 0x185   : > { %v2232_v56 = vrot.slane %v2231_v58, 2  ;;  %v2223_v60 = vsel %vm3026_vm8, %v2218_v4, %v2222_v41  ;;  %v2245_v63 = vor.u32 %v2244_v5, %v2241_v21  ;;  %v1899_v19 = vshll.u32 %v3369_v29, 16 }
 0x186   : > { %v1898_v14 = vrot.slane %v1896_v55, 6  ;;  %2781 = vmatmul.mubr.msk.bf16.vlgmr.msra.gmra.mxu1 %vm472_vm10, %v1716_v43  ;;  %v1888_v11 = vor.u32 %v1887_v32, %v1884_v57  ;;  %v1905_v10 = vshll.u32 %v3411_v50, 16  ;;  %v1910_v16 = vshrl.u32 %v3354_v23, 16 }
 0x187   : > { %v2237_v7 = vsel %vm3026_vm8, %v2232_v56, %v2236_v52  ;;  %2791 = vmatpush3.bf16.msra.mxu1 %v2854_v49  ;;  %v2246_v18 = vrot.slane %v2245_v63, 2  ;;  %2792 = vmatprep.mubr.msk.bf16.mxu1 %vm2873_vm0, %v2872_v1  ;;  %v1901_v8 = vrot.slane %v1899_v19, 7  ;;  %v1913_v20 = vshll.u32 %v3354_v23, 16 }
 0x188   : > { %v2269_v26 = vcombine.low %v2223_v60, %v2237_v7  ;;  %2802 = vmatprep.subr.bf16.mxu1 %v2872_v1  ;;  %v1891_v29 = vshll.u32 %v3406_v13, 16  ;;  %v1912_v62 = vrot.slane %v1910_v16, 6  ;;  %v1889_v36 = vrot.slane %v1888_v11, 2 }
 0x189   : > { %v2251_v30 = vsel %vm3026_vm8, %v2246_v18, %v2250_v22  ;;  %v1902_v50 = vor.u32 %v1901_v8, %v1898_v14  ;;  %v1915_v31 = vrot.slane %v1913_v20, 7  ;;  %v1924_v37 = vshrl.u32 %v3393_v40, 16  ;;  %v2856_v22 = vld [vmem:[%s3620_s2 + $0x30] sm:$0xff]  }
 0x18a   : > { %v2270_v33 = vcombine.low %v2251_v30, %v2265_v15  ;;  %v2277_v34 = vrot.slane %v2269_v26, %v2976_v45  ;;  %v1907_v41 = vrot.slane %v1905_v10, 7  ;;  %v1927_v23 = vshll.u32 %v3393_v40, 16 }
 0x18b   : > { %v1903_v35 = vrot.slane %v1902_v50, 2  ;;  %v1916_v42 = vor.u32 %v1915_v31, %v1912_v62  ;;  %v1893_v13 = vrot.slane %v1891_v29, 7  ;;  %v1926_v38 = vrot.slane %v1924_v37, 6 }
 0x18c   : > { %v2284_v44 = vrot.slane %v2270_v33, %v2976_v45  ;;  %v1919_v46 = vshll.u32 %v3415_v51, 16  ;;  %v1929_v15 = vrot.slane %v1927_v23, 7  ;;  %v1933_v48 = vshll.u32 %v3419_v6, 16 }
 0x18d   : > { %v1908_v21 = vsel %vm3026_vm8, %v1903_v35, %v1907_v41  ;;  %v1894_v58 = vsel %vm3026_vm8, %v1889_v36, %v1893_v13  ;;  %v1917_v61 = vrot.slane %v1916_v42, 2  ;;  %v2109_v32 = vcombine.low %v3449_v47, %v3345_v0 }
 0x18e   : > { %v2285_v43 = vcombine.low %v2277_v34, %v2284_v44  ;;  %v1930_v12 = vor.u32 %v1929_v15, %v1926_v38  ;;  %v1940_v40 = vcombine.low %v1894_v58, %v1908_v21  ;;  %v1921_v49 = vrot.slane %v1919_v46, 7 }
 0x18f   : > { %v1935_v52 = vrot.slane %v1933_v48, 7  ;;  %v2110_v60 = vcombine.low %v3462_v53, %v3303_v3  ;;  %v2340_v63 = vrot.slane %v3484_v28, 7  ;;  %v2348_v17 = vrot.slane %v3500_v25, 7 }
 0x190   : > { %2811 = vmatmul.mubr.msk.bf16.vlgmr.msra.gmra.mxu0 %vm472_vm10, %v2285_v43  ;;  %v1931_v4 = vrot.slane %v1930_v12, 2  ;;  %v1922_v5 = vsel %vm3026_vm8, %v1917_v61, %v1921_v49  ;;  %v1948_v6 = vrot.slane %v1940_v40, %v2976_v45  ;;  %v2659_v14 = vrot.slane %v3308_v9, 9 }
 0x191   : > { %v2352_v19 = vrot.slane %v3325_v54, 7  ;;  %v2656_v7 = vrot.slane %v3470_v24, 9  ;;  %v2344_v0 = vrot.slane %v3488_v59, 7  ;;  %v2658_v3 = vrot.slane %v3492_v2, 9  ;;  %v2859_v59 = vld [vmem:[%s3620_s2 + $0x40] sm:$0xff]  }
 0x192   : > { %v1936_v51 = vsel %vm3026_vm8, %v1931_v4, %v1935_v52  ;;  %v2117_v47 = vrot.slane %v2109_v32, %v2976_v45  ;;  %v2124_v9 = vrot.slane %v2110_v60, %v2976_v45  ;;  %v2657_v53 = vrot.slane %v3365_v27, 9 }
 0x193   : > { %v1941_v55 = vcombine.low %v1922_v5, %v1936_v51  ;;  %v2341_v54 = vsel %vm3047_vm12, %v2656_v7, %v2340_v63  ;;  %v2349_v28 = vsel %vm3047_vm12, %v2658_v3, %v2348_v17  ;;  %v2353_v24 = vsel %vm3047_vm12, %v2659_v14, %v2352_v19 }
 0x194   : > { %v2345_v2 = vsel %vm3047_vm12, %v2657_v53, %v2344_v0  ;;  %v2125_v25 = vcombine.low %v2117_v47, %v2124_v9  ;;  %v2358_v10 = vcombine.low %v2349_v28, %v2353_v24 }
 0x195   : > { %v1955_v56 = vrot.slane %v1941_v55, %v2976_v45  ;;  %v2357_v11 = vcombine.low %v2341_v54, %v2345_v2 }
 0x196   : > { %v2372_v16 = vrot.slane %v2358_v10, %v2976_v45 }
 0x197   : > { %v1956_v57 = vcombine.low %v1948_v6, %v1955_v56  ;;  %v2365_v27 = vrot.slane %v2357_v11, %v2976_v45 }
 0x199   : > { %2793 = vmatmul.mubr.msk.bf16.vlgmr.msra.gmra.mxu1 %vm472_vm10, %v1956_v57  ;;  %v2373_v18 = vcombine.low %v2365_v27, %v2372_v16 }
 0x19a   : > { %2803 = vmatpush3.bf16.msra.mxu1 %v2856_v22  ;;  %2804 = vmatprep.mubr.msk.bf16.mxu1 %vm2873_vm0, %v2872_v1 }
 0x19b   : > { %2814 = vmatprep.subr.bf16.mxu1 %v2872_v1 }
 0x1a1   : > { %2805 = vmatmul.mubr.msk.bf16.vlgmr.msra.gmra.mxu1 %vm472_vm10, %v2125_v25 }
 0x1a2   : > { %2815 = vmatpush3.bf16.msra.mxu1 %v2859_v59  ;;  %2816 = vmatprep.mubr.msk.bf16.mxu1 %vm2873_vm0, %v2872_v1  ;;  %vm2497_vm0 = vcmask 125952  }
 0x1a9   : > { %2817 = vmatmul.mubr.msk.bf16.vlgmr.msra.gmra.mxu1 %vm472_vm10, %v2373_v18 }
 0x22e   : > { %v1674_v26 = vpop.f32.mrf.mxu0 }
 0x230   : > { %v2776_v8 = vpop.f32.mrf.mxu0 }
 0x232   : > { %v1677_v39 = vpop.f32.mrf.mxu0 }
 0x234   : > { %v2777_v20 = vpop.f32.mrf.mxu0 }
 0x236   : > { %v1840_v29 = vpop.f32.mrf.mxu0 }
 0x238   : > { %v2788_v62 = vpop.f32.mrf.mxu0 }
 0x23a   : > { %v1843_v30 = vpop.f32.mrf.mxu0 }
 0x23c   : > { %v2789_v50 = vpop.f32.mrf.mxu0 }
 0x23e   : > { %v1607_v31 = vpop.f32.mrf.mxu1  ;;  %v2088_v33 = vpop.f32.mrf.mxu0 }
 0x23f   : > { %v1675_v15 = vadd.f32 %v1674_v26, %v1607_v31 }
 0x240   : > { %v2770_v34 = vpop.f32.mrf.mxu1  ;;  %v2800_v36 = vpop.f32.mrf.mxu0 }
 0x242   : > { %v1610_v1 = vpop.f32.mrf.mxu1  ;;  %v2091_v37 = vpop.f32.mrf.mxu0 }
 0x243   : > { %v1678_v58 = vadd.f32 %v1677_v39, %v1610_v1 }
 0x244   : > { %v2771_v35 = vpop.f32.mrf.mxu1  ;;  %v2801_v41 = vpop.f32.mrf.mxu0 }
 0x245   : > { %v2463_v35 = vld [vmem:[%s2955_s22] sm:$0x3]  ;;  %v2464_v41 = vld [vmem:[%s2955_s22 + $0x2] sm:$0x3] }
 0x246   : > { %v1760_v45 = vpop.f32.mrf.mxu1 }
 0x247   : > { %v1767_v48 = vadd.f32 %v1760_v45, %v1675_v15  ;;  %v2465_v45 = vld [vmem:[%s2955_s22 + $0x4] sm:$0x3]  ;;  %v2468_v15 = vunpack.c.l.bf16 %v2464_v41 }
 0x248   : > { %v2782_v42 = vpop.f32.mrf.mxu1 }
 0x249   : > { %v1847_v40 = vadd.f32 %v1840_v29, %v1767_v48 }
 0x24a   : > { %v1763_v23 = vpop.f32.mrf.mxu1 }
 0x24b   : > { %v1768_v12 = vadd.f32 %v1763_v23, %v1678_v58  ;;  %v2469_v58 = vunpack.c.l.bf16 %v2465_v45 }
 0x24c   : > { %v2783_v44 = vpop.f32.mrf.mxu1 }
 0x24d   : > { %v1848_v5 = vadd.f32 %v1843_v30, %v1768_v12  ;;  %v2466_v44 = vld [vmem:[%s2955_s22 + $0x6] sm:$0x3] }
 0x250   : > { %v2329_v13 = vpop.f32.mrf.mxu0 }
 0x252   : > { %v2812_v38 = vpop.f32.mrf.mxu0 }
 0x254   : > { %v2332_v21 = vpop.f32.mrf.mxu0 }
 0x256   : > { %v2813_v46 = vpop.f32.mrf.mxu0 }
 0x257   : > { %v2467_v46 = vunpack.c.l.bf16 %v2463_v35 }
 0x259   : > { %v2000_v43 = vpop.f32.mrf.mxu1 }
 0x25a   : > { %v2007_v4 = vadd.f32 %v2000_v43, %v1847_v40 }
 0x25b   : > { %v2794_v61 = vpop.f32.mrf.mxu1 }
 0x25c   : > { %v2095_v6 = vadd.f32 %v2088_v33, %v2007_v4  ;;  %v2470_v61 = vunpack.c.l.bf16 %v2466_v44 }
 0x25d   : > { %v2003_v49 = vpop.f32.mrf.mxu1 }
 0x25e   : > { %v2008_v55 = vadd.f32 %v2003_v49, %v1848_v5 }
 0x25f   : > { %v2795_v52 = vpop.f32.mrf.mxu1 }
 0x260   : > { %v2096_v32 = vadd.f32 %v2091_v37, %v2008_v55 }
 0x261   : > { %v2169_v51 = vpop.f32.mrf.mxu1 }
 0x262   : > { %v2176_v22 = vadd.f32 %v2169_v51, %v2095_v6 }
 0x263   : > { %v2806_v56 = vpop.f32.mrf.mxu1 }
 0x264   : > { %v2336_v17 = vadd.f32 %v2329_v13, %v2176_v22 }
 0x265   : > { %v2172_v57 = vpop.f32.mrf.mxu1 }
 0x266   : > { %v2177_v63 = vadd.f32 %v2172_v57, %v2096_v32 }
 0x267   : > { %v2807_v60 = vpop.f32.mrf.mxu1 }
 0x268   : > { %v2337_v0 = vadd.f32 %v2332_v21, %v2177_v63 }
 0x269   : > { %v2417_v14 = vpop.f32.mrf.mxu1 }
 0x26a   : > { %v2424_v19 = vadd.f32 %v2417_v14, %v2336_v17 }
 0x26b   : > { %v2818_v7 = vpop.f32.mrf.mxu1 }
 0x26c   : > { %2426 = vst.msk [vmem:[#allocation4] sm:$0xff] %vm472_vm10, %v2424_v19  ;;  %v2438_v47 = vmul.f32 %v2424_v19, %v2424_v19  ;;  %v2428_v53 = vsel %vm472_vm10, %v2424_v19, 0.0 }
 0x26d   : > { %v2420_v3 = vpop.f32.mrf.mxu1 }
 0x26e   : > { %v2425_v9 = vadd.f32 %v2420_v3, %v2337_v0  ;;  %v2440_v2 = vsel %vm472_vm10, %v2438_v47, 0.0 }
 0x26f   : > { %v2819_v54 = vpop.f32.mrf.mxu1 }
 0x270   : > { %2427 = vst.msk [vmem:[#allocation4 + $0x8] sm:$0xff] %vm472_vm10, %v2425_v9  ;;  %v2429_v28 = vsel %vm472_vm10, %v2425_v9, 0.0  ;;  %v2439_v24 = vmul.f32 %v2425_v9, %v2425_v9 }
 0x271   : > { %v2430_v59 = vadd.f32 %v2429_v28, %v2428_v53 }
 0x272   : > { %v2441_v25 = vsel %vm472_vm10, %v2439_v24, 0.0 }
 0x273   : > { %v2431_v11 = vrot.slane %v2430_v59, 4  ;;  %v2442_v10 = vadd.f32 %v2441_v25, %v2440_v2  ;;  %v2457_v42 = vld [vmem:[#allocation4] sm:$0xff] }
 0x275   : > { %v2432_v27 = vadd.f32 %v2431_v11, %v2430_v59  ;;  %v2443_v16 = vrot.slane %v2442_v10, 4 }
 0x277   : > { %v2433_v18 = vrot.slane %v2432_v27, 2  ;;  %v2444_v26 = vadd.f32 %v2443_v16, %v2442_v10  ;;  %v2458_v23 = vld [vmem:[#allocation4 + $0x8] sm:$0xff] }
 0x279   : > { %v2434_v8 = vadd.f32 %v2433_v18, %v2432_v27  ;;  %v2445_v39 = vrot.slane %v2444_v26, 2 }
 0x27b   : > { %v2435_v20 = vrot.slane %v2434_v8, 1  ;;  %v2446_v29 = vadd.f32 %v2445_v39, %v2444_v26 }
 0x27d   : > { %v2436_v62 = vadd.f32 %v2435_v20, %v2434_v8  ;;  %v2447_v30 = vrot.slane %v2446_v29, 1 }
 0x27f   : > { %v2448_v50 = vadd.f32 %v2447_v30, %v2446_v29  ;;  %v2450_v31 = vmul.f32 0.0625, %v2436_v62 }
 0x281   : > { %v2451_v33 = vmul.f32 0.0625, %v2448_v50  ;;  %v2452_v34 = vmul.f32 %v2450_v31, %v2450_v31  ;;  %v2459_v13 = vsub.f32 %v2457_v42, %v2450_v31  ;;  %v2460_v38 = vsub.f32 %v2458_v23, %v2450_v31 }
 0x283   : > { %v2453_v36 = vsub.f32 %v2451_v33, %v2452_v34 }
 0x285   : > { %v2454_v1 = vmax.f32 %v2453_v36, 0.0 }
 0x287   : > { %v2455_v37 = vadd.f32 1e-05, %v2454_v1 }
 0x289   : > { %2862 = vrsqrt.f32 %v2455_v37 }
 0x296   : > { %v2863_v21 = vpop.eup %2862 }
 0x297   : > { %v2461_v48 = vmul.f32 %v2863_v21, %v2459_v13  ;;  %v2462_v43 = vmul.f32 %v2863_v21, %v2460_v38 }
 0x299   : > { %v2473_v12 = vcombine.high %v2461_v48, %v2461_v48  ;;  %v2474_v40 = vcombine.high %v2462_v43, %v2462_v43  ;;  %v2477_v49 = vadd.f32 %v2467_v46, %v2461_v48  ;;  %v2479_v52 = vadd.f32 %v2469_v58, %v2462_v43 }
 0x29b   : > { %v2478_v4 = vadd.f32 %v2473_v12, %v2468_v15  ;;  %v2480_v5 = vadd.f32 %v2474_v40, %v2470_v61 }
 0x29d   : > { %v2485_v51 = vcombine.low %v2477_v49, %v2478_v4  ;;  %v2486_v55 = vcombine.low %v2479_v52, %v2480_v5 }
 0x29f   : > { %v2674_v6 = vpack.c.bf16 %v2485_v51, %v2485_v51  ;;  %v2675_v56 = vpack.c.bf16 %v2486_v55, %v2486_v55 }
 0x2a1   : > { %2498 = vst.msk [vmem:[%s170_s6] sm:$0xf] %vm2497_vm0, %v2674_v6  ;;  %2499 = vst.msk [vmem:[%s170_s6 + $0x4] sm:$0xf] %vm2497_vm0, %v2675_v56 }
 0x2a2 PF: > { %s13_s12 = sadd.s32 1, %s2870_s12  }
 0x2a3   : > { %p10_p4 = scmp.ge.s32.totalorder %s13_s12, 4  }
 0x2a5   :  { %12 = sbr.rel (!%p10_p4) target bundleno = 1 (0x1), region = 84 }

</bundles_post_ra>
